<compile_context>
chip_gen: v7x
topology: tpu7x:2x2x1
jax: 0.10.0
libtpu: 0.0.40
codegen_flags: <defaults>
</compile_context>

<pallas_src>
import jax
import jax.numpy as jnp
import numpy as np
from jax.experimental import pallas as pl
from jax.experimental.pallas import tpu as pltpu

LN_EPS = 1e-5


def _gelu_tanh(x):
    c = 0.7978845608028654  # sqrt(2/pi)
    return 0.5 * x * (1.0 + jnp.tanh(c * (x + 0.044715 * x * x * x)))


def _layer_norm_nobias(x, gamma):
    mu = jnp.mean(x, axis=-1, keepdims=True)
    xc = x - mu
    var = jnp.mean(xc * xc, axis=-1, keepdims=True)
    return xc * jax.lax.rsqrt(var + LN_EPS) * gamma


# ----------------------------------------------------------------------------
# Fused PIPsConvBlock kernel (optionally with the input Linear and/or the head)
# ----------------------------------------------------------------------------
def _make_block_kernel(first, last, T, C):
    C4 = 4 * C
    f32 = jnp.float32

    def kernel(*refs):
        i = 0
        x_ref = refs[i]; i += 1
        ctx_ref = refs[i]; i += 1
        if first:
            lin_w_ref, lin_b_ref = refs[i], refs[i + 1]
            i += 2
        (ln1_g_ref, w1m_ref, b1_ref, v2m_ref, b2f_ref,
         ln2_g_ref, up_w_ref, up_b_ref, down_w_ref, down_b_ref) = refs[i:i + 10]
        i += 10
        if last:
            hln_g_ref, head_w_ref, head_b_ref = refs[i:i + 3]
            i += 3
        out_ref, nctx_ref = refs[i], refs[i + 1]

        cdt = w1m_ref.dtype                        # bf16 MXU operand dtype
        TB = x_ref.shape[0]
        R = TB * T

        # ---- optional fused input Linear(Cin -> C) ---------------------------
        if first:
            cin = x_ref.shape[-1]
            xin = jnp.dot(x_ref[...].reshape(R, cin).astype(cdt), lin_w_ref[...],
                          preferred_element_type=f32) + lin_b_ref[...]
            x_in = xin.reshape(TB, T, C)
        else:
            x_in = x_ref[...].astype(f32)          # no-op cast when already f32

        ctx = ctx_ref[...].astype(f32)             # (TB, 2, 5C)
        cc1 = ctx[:, :, :C]
        cc2 = ctx[:, :, C:]

        # ---- step 1: LN -> causal conv (C -> 4C, k=3) as one im2col matmul ---
        # Only conv outputs that survive the later `[..., num_extra:, :]` drop are
        # needed; they never touch the F.pad((2,0)) zero rows, so no zero padding
        # is materialized:  out[s] = [c[s], c[s+1], c[s+2]] @ w1m,
        #                   c = [cc1_0, cc1_1, x_ln_0 .. x_ln_{T-1}].
        x_ln = _layer_norm_nobias(x_in, ln1_g_ref[...])        # (TB, T, C) f32
        c = jnp.concatenate([cc1.astype(cdt), x_ln.astype(cdt)], axis=1)
        cm = jnp.concatenate([c[:, 0:T], c[:, 1:T + 1], c[:, 2:T + 2]], axis=-1)
        h = jnp.dot(cm.reshape(R, 3 * C), w1m_ref[...],
                    preferred_element_type=f32) + b1_ref[...]
        g = _gelu_tanh(h).reshape(TB, T, C4)                   # (TB, T, 4C) f32

        # New causal context: last 2 rows of [cc1; x_ln] and of [cc2; g] (T >= 2).
        nctx_ref[...] = jnp.concatenate(
            [x_ln[:, T - 2:, :], g[:, T - 2:, :]], axis=-1).astype(nctx_ref.dtype)

        # ---- step 2: causal conv (4C -> 4C) + folded group-sum, one matmul ----
        d = jnp.concatenate([cc2.astype(cdt), g.astype(cdt)], axis=1)
        dm = jnp.concatenate([d[:, 0:T], d[:, 1:T + 1], d[:, 2:T + 2]], axis=-1)
        z = x_in + b2f_ref[...]                                # skip + folded bias
        z = z + jnp.dot(dm.reshape(R, 3 * C4), v2m_ref[...],
                        preferred_element_type=f32).reshape(TB, T, C)

        # ---- ConvChannelsMixer: LN -> Linear(C,4C) -> gelu -> Linear(4C,C) ----
        z_ln = _layer_norm_nobias(z, ln2_g_ref[...])
        u = _gelu_tanh(jnp.dot(z_ln.reshape(R, C).astype(cdt), up_w_ref[...],
                               preferred_element_type=f32) + up_b_ref[...])
        dn = jnp.dot(u.astype(cdt), down_w_ref[...],
                     preferred_element_type=f32) + down_b_ref[...]
        y = dn.reshape(TB, T, C) + z

        # ---- optional fused head: LayerNorm + Linear(C -> Cout) ---------------
        if last:
            y_ln = _layer_norm_nobias(y.reshape(R, C), hln_g_ref[...])
            o = jnp.dot(y_ln.astype(cdt), head_w_ref[...],
                        preferred_element_type=f32) + head_b_ref[...]
            out_ref[...] = o.reshape(TB, T, -1).astype(out_ref.dtype)
        else:
            out_ref[...] = y.astype(out_ref.dtype)

    return kernel


# ----------------------------------------------------------------------------
# VMEM budget / batch-tile selection
# ----------------------------------------------------------------------------
def _vmem_budget_bytes():
    cap = 64 << 20                                 # conservative fallback (v7x)
    try:
        info = pltpu.get_tpu_info()
        cap = int(getattr(info, "vmem_capacity_bytes", cap))
    except Exception:
        pass
    return int(0.85 * cap)                         # leave headroom for compiler scratch


def _estimate_block_vmem_bytes(tb, T, C, cin, cout):
    c4 = 4 * C
    w = 2 * (3 * C * c4 + 3 * c4 * C + 2 * C * c4)            # bf16 conv + mixer weights
    w += 2 * (cin * C + C * cout)                             # boundary matmul weights
    w += 4 * (8 * C + 3 * c4 + cout)                          # small f32 params (rough)
    io = 2 * 4 * tb * (T * C + T * max(C, cout) + 4 * 5 * C)  # double-buffered f32 I/O
    live = 120 * tb * T * C                                   # rough in-kernel temporaries
    return int(w + io + live)


def _pick_tb(B, T, C, cin, cout, budget, min_rows=256):
    """Batch elements per grid step: fill the MXU M dim (tb*T >= 256) while keeping
    at least 2 grid steps (v7x dual TC / pipelining) and fitting the VMEM budget."""
    divs = [d for d in range(1, B + 1) if B % d == 0]
    ok = [d for d in divs if B // d >= 2] or [B]
    cands = [d for d in ok if d * T >= min_rows]
    tb = min(cands) if cands else max(ok)
    while tb > 1 and _estimate_block_vmem_bytes(tb, T, C, cin, cout) > budget:
        smaller = [d for d in ok if d < tb]
        if not smaller:
            break
        tb = max(smaller)
    return tb


def _vmem_limit_bytes(tb, T, C, cin, cout, budget):
    est = _estimate_block_vmem_bytes(tb, T, C, cin, cout)
    return int(min(budget, max(int(1.4 * est), 32 << 20)))


# ----------------------------------------------------------------------------
# pallas_call wrappers
# ----------------------------------------------------------------------------
def _wspec():
    # Unblocked, whole-array VMEM resident: loaded once, never double-buffered.
    return pl.BlockSpec(memory_space=pltpu.MemorySpace.VMEM)


def _block_apply(h, ctx, bp, pp, tb, first, last, vmem_limit):
    B, T, cin = h.shape
    C = pp['ln_g'].shape[-1]
    C5 = 5 * C
    cout = pp['head_w'].shape[-1] if last else C
    assert B % tb == 0 and T >= 2
    cdt = bp['w1m'].dtype

    in_specs = [pl.BlockSpec((tb, T, cin), lambda i: (i, 0, 0)),
                pl.BlockSpec((tb, 2, C5), lambda i: (i, 0, 0))]
    args = [h, ctx]
    if first:
        in_specs += [_wspec(), _wspec()]
        args += [pp['lin_w'], pp['lin_b']]
    in_specs += [_wspec() for _ in range(10)]
    args += [bp['ln1_g'], bp['w1m'], bp['b1'], bp['v2m'], bp['b2f'],
             bp['ln2_g'], bp['up_w'], bp['up_b'], bp['down_w'], bp['down_b']]
    if last:
        in_specs += [_wspec() for _ in range(3)]
        args += [pp['ln_g'], pp['head_w'], pp['head_b']]

    gs = pltpu.PrefetchScalarGridSpec(
        num_scalar_prefetch=0,
        grid=(B // tb,),
        in_specs=in_specs,
        out_specs=[pl.BlockSpec((tb, T, cout), lambda i: (i, 0, 0)),
                   pl.BlockSpec((tb, 2, C5), lambda i: (i, 0, 0))])
    out_shapes = (jax.ShapeDtypeStruct((B, T, cout), jnp.float32),
                  jax.ShapeDtypeStruct((B, 2, C5), ctx.dtype))
    return pl.pallas_call(
        _make_block_kernel(first, last, T, C),
        out_shape=out_shapes,
        grid_spec=gs,
        compiler_params=pltpu.CompilerParams(
            dimension_semantics=("parallel",),
            vmem_limit_bytes=vmem_limit),
    )(*args)


def pallas_forward(x, causal_context, pp, tb=None):
    """PIPSMLPMixer.forward.  x: (B, T, Cin); causal_context: (nblocks, B, 2, 5C)."""
    B, T, cin = x.shape
    C = pp['ln_g'].shape[-1]
    cout = pp['head_b'].shape[-1]
    nblocks = len(pp['blocks'])
    assert nblocks >= 1

    budget = _vmem_budget_bytes()
    if tb is None:
        tb = _pick_tb(B, T, C, cin, cout, budget)
    vlim = _vmem_limit_bytes(tb, T, C, cin, cout, budget)

    h = x
    new_ctx = []
    for i, bp in enumerate(pp['blocks']):
        h, nctx = _block_apply(h, causal_context[i], bp, pp, tb,
                               first=(i == 0), last=(i == nblocks - 1),
                               vmem_limit=vlim)
        new_ctx.append(nctx)
    return h, jnp.stack(new_ctx, axis=0)


# ----------------------------------------------------------------------------
# Host-side weight packing: fold group-sum into conv2, flatten conv taps for
# im2col, cast all matmul weights to bf16.
# ----------------------------------------------------------------------------
def pack_params(raw, compute_dtype=jnp.bfloat16):
    C = raw['lin_w'].shape[1]
    C4 = 4 * C
    # torch: h2.view(..., C, 4).sum(-1)  ==  h2 @ S  with S[j, c] = (j // 4 == c)
    S = (jnp.arange(C4)[:, None] // 4 == jnp.arange(C)[None, :]).astype(jnp.float32)
    pp = {
        'lin_w': raw['lin_w'].astype(compute_dtype),
        'lin_b': raw['lin_b'],
        'ln_g': raw['ln_g'],
        'head_w': raw['head_w'].astype(compute_dtype),
        'head_b': raw['head_b'],
        'blocks': [],
    }
    for bp in raw['blocks']:
        v2 = jnp.einsum('kij,jc->kic', bp['w2'], S)              # (3, 4C, C)
        pp['blocks'].append({
            'ln1_g': bp['ln1_g'],
            'w1m': bp['w1'].reshape(3 * C, C4).astype(compute_dtype),   # taps stacked
            'b1': bp['b1'],
            'v2m': v2.reshape(3 * C4, C).astype(compute_dtype),         # taps stacked
            'b2f': bp['b2'] @ S,
            'ln2_g': bp['ln2_g'],
            'up_w': bp['up_w'].astype(compute_dtype),
            'up_b': bp['up_b'],
            'down_w': bp['down_w'].astype(compute_dtype),
            'down_b': bp['down_b'],
        })
    return pp


# ----------------------------------------------------------------------------
# Pure-JAX references
# ----------------------------------------------------------------------------
def _cast_matmul(x, w):
    """Matmul with the same numerics as the kernels: cast to w.dtype, f32 acc."""
    return jax.lax.dot_general(
        x.astype(w.dtype), w,
        dimension_numbers=(((x.ndim - 1,), (0,)), ((), ())),
        preferred_element_type=jnp.float32)


def _ref_packed_block(x, cc1, cc2, p):
    B, T, C = x.shape
    x_ln = _layer_norm_nobias(x, p['ln1_g'])
    c = jnp.concatenate([cc1, x_ln], axis=1)                       # (B, T+2, C)
    cm = jnp.concatenate([c[:, k:k + T] for k in range(3)], axis=-1)
    g = _gelu_tanh(_cast_matmul(cm, p['w1m']) + p['b1'])           # (B, T, 4C)
    nctx = jnp.concatenate([x_ln[:, T - 2:], g[:, T - 2:]], axis=-1)
    d = jnp.concatenate([cc2, g], axis=1)                          # (B, T+2, 4C)
    dm = jnp.concatenate([d[:, k:k + T] for k in range(3)], axis=-1)
    z = x + p['b2f'] + _cast_matmul(dm, p['v2m'])
    z_ln = _layer_norm_nobias(z, p['ln2_g'])
    u = _gelu_tanh(_cast_matmul(z_ln, p['up_w']) + p['up_b'])
    out = _cast_matmul(u, p['down_w']) + p['down_b'] + z
    return out, nctx


def ref_packed_forward(x, causal_context, pp):
    C = pp['ln_g'].shape[-1]
    h = _cast_matmul(x, pp['lin_w']) + pp['lin_b']
    nccs = []
    for i, bp in enumerate(pp['blocks']):
        h, nc = _ref_packed_block(h, causal_context[i, :, :, :C],
                                  causal_context[i, :, :, C:], bp)
        nccs.append(nc)
    hn = _layer_norm_nobias(h, pp['ln_g'])
    out = _cast_matmul(hn, pp['head_w']) + pp['head_b']
    return out, jnp.stack(nccs, axis=0)


def _ref_exact_block(x, cc1, cc2, p):
    # Torch-faithful math in f32 (zero pad rows, unfolded conv2 + group-sum).
    B, T, C = x.shape
    to_skip = x
    x_ln = _layer_norm_nobias(x, p['ln1_g'])
    cat1 = jnp.concatenate([cc1, x_ln], axis=1)                    # (B, T+2, C)
    ncc1 = cat1[:, -2:, :]
    pad1 = jnp.concatenate([jnp.zeros((B, 2, C), x.dtype), cat1], axis=1)
    h1 = p['b1'][None]
    for k in range(3):
        h1 = h1 + jnp.einsum('btc,cd->btd', pad1[:, k:k + T + 2, :], p['w1'][k],
                             precision='highest')
    h1 = _gelu_tanh(h1)                                            # (B, T+2, 4C)
    cat2 = jnp.concatenate([cc2, h1[:, 2:, :]], axis=1)
    ncc2 = cat2[:, -2:, :]
    pad2 = jnp.concatenate([jnp.zeros((B, 2, 4 * C), x.dtype), cat2], axis=1)
    h2 = p['b2'][None]
    for k in range(3):
        h2 = h2 + jnp.einsum('btc,cd->btd', pad2[:, k:k + T + 2, :], p['w2'][k],
                             precision='highest')
    h2 = h2[:, 2:, :]
    z = h2.reshape(B, T, C, 4).sum(-1) + to_skip
    z_ln = _layer_norm_nobias(z, p['ln2_g'])
    u = _gelu_tanh(jnp.einsum('btc,cd->btd', z_ln, p['up_w'],
                              precision='highest') + p['up_b'][None])
    d = jnp.einsum('btc,cd->btd', u, p['down_w'],
                   precision='highest') + p['down_b'][None]
    return d + z, jnp.concatenate([ncc1, ncc2], axis=-1)


def ref_exact_forward(x, causal_context, params):
    C = params['lin_w'].shape[1]
    h = jnp.einsum('btc,cd->btd', x, params['lin_w'],
                   precision='highest') + params['lin_b'][None]
    nccs = []
    for i, bp in enumerate(params['blocks']):
        h, ncc = _ref_exact_block(h, causal_context[i, :, :, :C],
                                  causal_context[i, :, :, C:], bp)
        nccs.append(ncc)
    h = _layer_norm_nobias(h, params['ln_g'])
    out = jnp.einsum('btc,cd->btd', h, params['head_w'],
                     precision='highest') + params['head_b'][None]
    return out, jnp.stack(nccs, axis=0)


# ----------------------------------------------------------------------------
# Deterministic synthetic parameter init (f32 "raw" weights, conv layout (K, Cin, Cout))
# ----------------------------------------------------------------------------
def init_params(key, cin, cout, c, num_blocks):
    c4 = 4 * c
    keys = jax.random.split(key, 2 + num_blocks)

    def nrm(k, shape, scale=0.1):
        return scale * jax.random.normal(k, shape, jnp.float32)

    params = {
        'lin_w': nrm(jax.random.fold_in(keys[0], 0), (cin, c)),
        'lin_b': nrm(jax.random.fold_in(keys[0], 1), (1, c)),
        'ln_g': 1.0 + nrm(jax.random.fold_in(keys[1], 0), (1, c)),
        'head_w': nrm(jax.random.fold_in(keys[1], 1), (c, cout)),
        'head_b': nrm(jax.random.fold_in(keys[1], 2), (1, cout)),
        'blocks': [],
    }
    for i in range(num_blocks):
        sub = jax.random.split(keys[2 + i], 10)
        params['blocks'].append({
            'ln1_g': 1.0 + 0.1 * jax.random.normal(sub[0], (1, c), jnp.float32),
            'w1': nrm(sub[1], (3, c, c4)),
            'b1': nrm(sub[2], (1, c4)),
            'w2': nrm(sub[3], (3, c4, c4), 0.05),
            'b2': nrm(sub[4], (1, c4)),
            'ln2_g': 1.0 + 0.1 * jax.random.normal(sub[5], (1, c), jnp.float32),
            'up_w': nrm(sub[6], (c, c4)),
            'up_b': nrm(sub[7], (1, c4)),
            'down_w': nrm(sub[8], (c4, c)),
            'down_b': nrm(sub[9], (1, c)),
        })
    return params


if __name__ == "__main__":
    B, T = 2, 8                    # batch, sequence (time) length
    CIN, COUT = 16, 16             # input / output channels
    C, NUM_BLOCKS = 32, 3          # hidden_dim (stands in for 512), num mixer blocks
    K = 3                          # kernel_shape (causal context = kernel_shape-1 = 2)

    key = jax.random.PRNGKey(0)
    kx, kc, kp = jax.random.split(key, 3)
    x = jax.random.normal(kx, (B, T, CIN), jnp.float32)
    causal_context = 0.5 * jax.random.normal(kc, (NUM_BLOCKS, B, K - 1, 5 * C),
                                             jnp.float32)
    raw_params = init_params(kp, CIN, COUT, C, NUM_BLOCKS)
    packed_params = pack_params(raw_params)

    out, new_ctx = jax.jit(pallas_forward)(x, causal_context, packed_params)
    out = jax.block_until_ready(out)
    new_ctx = jax.block_until_ready(new_ctx)

    # Tight check against a pure-JAX reference with identical numerics
    # (folded group-sum, im2col taps, bf16 matmul operands, f32 accumulation).
    pr_out, pr_ctx = ref_packed_forward(x, causal_context, packed_params)
    np.testing.assert_allclose(np.asarray(out), np.asarray(pr_out),
                               rtol=2e-3, atol=2e-3)
    np.testing.assert_allclose(np.asarray(new_ctx), np.asarray(pr_ctx),
                               rtol=2e-3, atol=2e-3)

    # Loose check against the torch-faithful f32 reference (bf16 rounding only).
    ex_out, ex_ctx = ref_exact_forward(x, causal_context, raw_params)
    np.testing.assert_allclose(np.asarray(out), np.asarray(ex_out),
                               rtol=7.5e-2, atol=7.5e-2)
    np.testing.assert_allclose(np.asarray(new_ctx), np.asarray(ex_ctx),
                               rtol=7.5e-2, atol=7.5e-2)

    print("KERNEL_OK")
</pallas_src>

<mosaic_0001>
module attributes {stable_mosaic.version = 11 : i64} {
  func.func @kernel(%arg0: i32, %arg1: memref<1x8x16xf32, #tpu.memory_space<vmem>>, %arg2: memref<1x2x160xf32, #tpu.memory_space<vmem>>, %arg3: memref<16x32xbf16, #tpu.memory_space<vmem>>, %arg4: memref<1x32xf32, #tpu.memory_space<vmem>>, %arg5: memref<1x32xf32, #tpu.memory_space<vmem>>, %arg6: memref<96x128xbf16, #tpu.memory_space<vmem>>, %arg7: memref<1x128xf32, #tpu.memory_space<vmem>>, %arg8: memref<384x32xbf16, #tpu.memory_space<vmem>>, %arg9: memref<1x32xf32, #tpu.memory_space<vmem>>, %arg10: memref<1x32xf32, #tpu.memory_space<vmem>>, %arg11: memref<32x128xbf16, #tpu.memory_space<vmem>>, %arg12: memref<1x128xf32, #tpu.memory_space<vmem>>, %arg13: memref<128x32xbf16, #tpu.memory_space<vmem>>, %arg14: memref<1x32xf32, #tpu.memory_space<vmem>>, %arg15: memref<1x8x32xf32, #tpu.memory_space<vmem>>, %arg16: memref<1x2x160xf32, #tpu.memory_space<vmem>>) attributes {dimension_semantics = [#tpu.dimension_semantics<parallel>], iteration_bounds = array<i64: 2>, scalar_prefetch = 0 : i64, scratch_operands = 0 : i64, tpu.core_type = #tpu.core_type<tc>, window_params = [{transform_indices = @transform_0, window_bounds = array<i64: 1, 8, 16>}, {transform_indices = @transform_1, window_bounds = array<i64: 1, 2, 160>}, {pipeline_mode = #tpu.pipeline_mode<synchronous>, transform_indices = @transform_2, window_bounds = array<i64: 16, 32>}, {pipeline_mode = #tpu.pipeline_mode<synchronous>, transform_indices = @transform_3, window_bounds = array<i64: 1, 32>}, {pipeline_mode = #tpu.pipeline_mode<synchronous>, transform_indices = @transform_4, window_bounds = array<i64: 1, 32>}, {pipeline_mode = #tpu.pipeline_mode<synchronous>, transform_indices = @transform_5, window_bounds = array<i64: 96, 128>}, {pipeline_mode = #tpu.pipeline_mode<synchronous>, transform_indices = @transform_6, window_bounds = array<i64: 1, 128>}, {pipeline_mode = #tpu.pipeline_mode<synchronous>, transform_indices = @transform_7, window_bounds = array<i64: 384, 32>}, {pipeline_mode = #tpu.pipeline_mode<synchronous>, transform_indices = @transform_8, window_bounds = array<i64: 1, 32>}, {pipeline_mode = #tpu.pipeline_mode<synchronous>, transform_indices = @transform_9, window_bounds = array<i64: 1, 32>}, {pipeline_mode = #tpu.pipeline_mode<synchronous>, transform_indices = @transform_10, window_bounds = array<i64: 32, 128>}, {pipeline_mode = #tpu.pipeline_mode<synchronous>, transform_indices = @transform_11, window_bounds = array<i64: 1, 128>}, {pipeline_mode = #tpu.pipeline_mode<synchronous>, transform_indices = @transform_12, window_bounds = array<i64: 128, 32>}, {pipeline_mode = #tpu.pipeline_mode<synchronous>, transform_indices = @transform_13, window_bounds = array<i64: 1, 32>}, {transform_indices = @transform_14, window_bounds = array<i64: 1, 8, 32>}, {transform_indices = @transform_15, window_bounds = array<i64: 1, 2, 160>}]} {
    %c0 = arith.constant 0 : index
    %c0_0 = arith.constant 0 : index
    %c0_1 = arith.constant 0 : index
    %0 = vector.load %arg1[%c0, %c0_0, %c0_1] : memref<1x8x16xf32, #tpu.memory_space<vmem>>, vector<1x8x16xf32>
    %1 = vector.shape_cast %0 : vector<1x8x16xf32> to vector<8x16xf32>
    %2 = arith.truncf %1 : vector<8x16xf32> to vector<8x16xbf16>
    %c0_2 = arith.constant 0 : index
    %c0_3 = arith.constant 0 : index
    %3 = vector.load %arg3[%c0_2, %c0_3] : memref<16x32xbf16, #tpu.memory_space<vmem>>, vector<16x32xbf16>
    %cst = arith.constant dense<0.000000e+00> : vector<8x32xf32>
    %4 = tpu.matmul %2, %3, %cst {dimension_numbers = #tpu.dot_dimension_numbers<[1], [0], [0], [1], [0, 0, 1, 1], [], []>} : vector<8x16xbf16>, vector<16x32xbf16>, vector<8x32xf32> -> vector<8x32xf32>
    %c0_4 = arith.constant 0 : index
    %c0_5 = arith.constant 0 : index
    %5 = vector.load %arg4[%c0_4, %c0_5] : memref<1x32xf32, #tpu.memory_space<vmem>>, vector<1x32xf32>
    %6 = vector.broadcast %5 : vector<1x32xf32> to vector<8x32xf32>
    %7 = arith.addf %4, %6 : vector<8x32xf32>
    %8 = vector.shape_cast %7 : vector<8x32xf32> to vector<1x8x32xf32>
    %c0_6 = arith.constant 0 : index
    %c0_7 = arith.constant 0 : index
    %c0_8 = arith.constant 0 : index
    %9 = vector.load %arg2[%c0_6, %c0_7, %c0_8] : memref<1x2x160xf32, #tpu.memory_space<vmem>>, vector<1x2x160xf32>
    %10 = vector.extract_strided_slice %9 {offsets = [0, 0, 0], sizes = [1, 2, 32], strides = [1, 1, 1]} : vector<1x2x160xf32> to vector<1x2x32xf32>
    %11 = vector.extract_strided_slice %9 {offsets = [0, 0, 32], sizes = [1, 2, 128], strides = [1, 1, 1]} : vector<1x2x160xf32> to vector<1x2x128xf32>
    %c0_9 = arith.constant 0 : index
    %c0_10 = arith.constant 0 : index
    %12 = vector.load %arg5[%c0_9, %c0_10] : memref<1x32xf32, #tpu.memory_space<vmem>>, vector<1x32xf32>
    %cst_11 = arith.constant dense<0.000000e+00> : vector<1x8xf32>
    %13 = vector.multi_reduction <add>, %8, %cst_11 [2] : vector<1x8x32xf32> to vector<1x8xf32>
    %14 = vector.shape_cast %13 : vector<1x8xf32> to vector<1x8x1xf32>
    %cst_12 = arith.constant 3.200000e+01 : f32
    %15 = vector.broadcast %cst_12 : f32 to vector<1x8x1xf32>
    %16 = arith.divf %14, %15 : vector<1x8x1xf32>
    %17 = vector.broadcast %16 : vector<1x8x1xf32> to vector<1x8x32xf32>
    %18 = arith.subf %8, %17 : vector<1x8x32xf32>
    %19 = arith.mulf %18, %18 : vector<1x8x32xf32>
    %cst_13 = arith.constant dense<0.000000e+00> : vector<1x8xf32>
    %20 = vector.multi_reduction <add>, %19, %cst_13 [2] : vector<1x8x32xf32> to vector<1x8xf32>
    %21 = vector.shape_cast %20 : vector<1x8xf32> to vector<1x8x1xf32>
    %cst_14 = arith.constant 3.200000e+01 : f32
    %22 = vector.broadcast %cst_14 : f32 to vector<1x8x1xf32>
    %23 = arith.divf %21, %22 : vector<1x8x1xf32>
    %cst_15 = arith.constant 9.99999974E-6 : f32
    %24 = vector.broadcast %cst_15 : f32 to vector<1x8x1xf32>
    %25 = arith.addf %23, %24 : vector<1x8x1xf32>
    %26 = math.rsqrt %25 : vector<1x8x1xf32>
    %27 = vector.broadcast %26 : vector<1x8x1xf32> to vector<1x8x32xf32>
    %28 = arith.mulf %18, %27 : vector<1x8x32xf32>
    %29 = vector.shape_cast %12 : vector<1x32xf32> to vector<1x1x32xf32>
    %30 = vector.broadcast %29 : vector<1x1x32xf32> to vector<1x8x32xf32>
    %31 = arith.mulf %28, %30 : vector<1x8x32xf32>
    %32 = arith.truncf %10 : vector<1x2x32xf32> to vector<1x2x32xbf16>
    %33 = arith.truncf %31 : vector<1x8x32xf32> to vector<1x8x32xbf16>
    %34 = tpu.concatenate %32, %33 in 1 : vector<1x2x32xbf16>, vector<1x8x32xbf16> -> vector<1x10x32xbf16>
    %35 = vector.extract_strided_slice %34 {offsets = [0, 0, 0], sizes = [1, 8, 32], strides = [1, 1, 1]} : vector<1x10x32xbf16> to vector<1x8x32xbf16>
    %36 = vector.extract_strided_slice %34 {offsets = [0, 1, 0], sizes = [1, 8, 32], strides = [1, 1, 1]} : vector<1x10x32xbf16> to vector<1x8x32xbf16>
    %37 = vector.extract_strided_slice %34 {offsets = [0, 2, 0], sizes = [1, 8, 32], strides = [1, 1, 1]} : vector<1x10x32xbf16> to vector<1x8x32xbf16>
    %38 = tpu.concatenate %35, %36, %37 in 2 : vector<1x8x32xbf16>, vector<1x8x32xbf16>, vector<1x8x32xbf16> -> vector<1x8x96xbf16>
    %39 = vector.shape_cast %38 : vector<1x8x96xbf16> to vector<8x96xbf16>
    %c0_16 = arith.constant 0 : index
    %c0_17 = arith.constant 0 : index
    %40 = vector.load %arg6[%c0_16, %c0_17] : memref<96x128xbf16, #tpu.memory_space<vmem>>, vector<96x128xbf16>
    %cst_18 = arith.constant dense<0.000000e+00> : vector<8x128xf32>
    %41 = tpu.matmul %39, %40, %cst_18 {dimension_numbers = #tpu.dot_dimension_numbers<[1], [0], [0], [1], [0, 0, 1, 1], [], []>} : vector<8x96xbf16>, vector<96x128xbf16>, vector<8x128xf32> -> vector<8x128xf32>
    %c0_19 = arith.constant 0 : index
    %c0_20 = arith.constant 0 : index
    %42 = vector.load %arg7[%c0_19, %c0_20] : memref<1x128xf32, #tpu.memory_space<vmem>>, vector<1x128xf32>
    %43 = vector.broadcast %42 : vector<1x128xf32> to vector<8x128xf32>
    %44 = arith.addf %41, %43 : vector<8x128xf32>
    %cst_21 = arith.constant 5.000000e-01 : f32
    %45 = vector.broadcast %cst_21 : f32 to vector<8x128xf32>
    %46 = arith.mulf %45, %44 : vector<8x128xf32>
    %cst_22 = arith.constant 4.471500e-02 : f32
    %47 = vector.broadcast %cst_22 : f32 to vector<8x128xf32>
    %48 = arith.mulf %47, %44 : vector<8x128xf32>
    %49 = arith.mulf %48, %44 : vector<8x128xf32>
    %50 = arith.mulf %49, %44 : vector<8x128xf32>
    %51 = arith.addf %44, %50 : vector<8x128xf32>
    %cst_23 = arith.constant 0.797884583 : f32
    %52 = vector.broadcast %cst_23 : f32 to vector<8x128xf32>
    %53 = arith.mulf %52, %51 : vector<8x128xf32>
    %54 = math.tanh %53 : vector<8x128xf32>
    %cst_24 = arith.constant 1.000000e+00 : f32
    %55 = vector.broadcast %cst_24 : f32 to vector<8x128xf32>
    %56 = arith.addf %55, %54 : vector<8x128xf32>
    %57 = arith.mulf %46, %56 : vector<8x128xf32>
    %58 = vector.shape_cast %57 : vector<8x128xf32> to vector<1x8x128xf32>
    %59 = vector.extract_strided_slice %31 {offsets = [0, 6, 0], sizes = [1, 2, 32], strides = [1, 1, 1]} : vector<1x8x32xf32> to vector<1x2x32xf32>
    %60 = vector.extract_strided_slice %58 {offsets = [0, 6, 0], sizes = [1, 2, 128], strides = [1, 1, 1]} : vector<1x8x128xf32> to vector<1x2x128xf32>
    %61 = tpu.concatenate %59, %60 in 2 : vector<1x2x32xf32>, vector<1x2x128xf32> -> vector<1x2x160xf32>
    %c0_25 = arith.constant 0 : index
    %c0_26 = arith.constant 0 : index
    %c0_27 = arith.constant 0 : index
    %62 = vector.load %arg16[%c0_25, %c0_26, %c0_27] : memref<1x2x160xf32, #tpu.memory_space<vmem>>, vector<1x2x160xf32>
    tpu.vector_store %arg16[%c0_25, %c0_26, %c0_27], %61 {strides = array<i32>} : memref<1x2x160xf32, #tpu.memory_space<vmem>>, vector<1x2x160xf32>,
    %63 = arith.truncf %11 : vector<1x2x128xf32> to vector<1x2x128xbf16>
    %64 = arith.truncf %58 : vector<1x8x128xf32> to vector<1x8x128xbf16>
    %65 = tpu.concatenate %63, %64 in 1 : vector<1x2x128xbf16>, vector<1x8x128xbf16> -> vector<1x10x128xbf16>
    %66 = vector.extract_strided_slice %65 {offsets = [0, 0, 0], sizes = [1, 8, 128], strides = [1, 1, 1]} : vector<1x10x128xbf16> to vector<1x8x128xbf16>
    %67 = vector.extract_strided_slice %65 {offsets = [0, 1, 0], sizes = [1, 8, 128], strides = [1, 1, 1]} : vector<1x10x128xbf16> to vector<1x8x128xbf16>
    %68 = vector.extract_strided_slice %65 {offsets = [0, 2, 0], sizes = [1, 8, 128], strides = [1, 1, 1]} : vector<1x10x128xbf16> to vector<1x8x128xbf16>
    %69 = tpu.concatenate %66, %67, %68 in 2 : vector<1x8x128xbf16>, vector<1x8x128xbf16>, vector<1x8x128xbf16> -> vector<1x8x384xbf16>
    %c0_28 = arith.constant 0 : index
    %c0_29 = arith.constant 0 : index
    %70 = vector.load %arg9[%c0_28, %c0_29] : memref<1x32xf32, #tpu.memory_space<vmem>>, vector<1x32xf32>
    %71 = vector.shape_cast %70 : vector<1x32xf32> to vector<1x1x32xf32>
    %72 = vector.broadcast %71 : vector<1x1x32xf32> to vector<1x8x32xf32>
    %73 = arith.addf %8, %72 : vector<1x8x32xf32>
    %74 = vector.shape_cast %69 : vector<1x8x384xbf16> to vector<8x384xbf16>
    %c0_30 = arith.constant 0 : index
    %c0_31 = arith.constant 0 : index
    %75 = vector.load %arg8[%c0_30, %c0_31] : memref<384x32xbf16, #tpu.memory_space<vmem>>, vector<384x32xbf16>
    %cst_32 = arith.constant dense<0.000000e+00> : vector<8x32xf32>
    %76 = tpu.matmul %74, %75, %cst_32 {dimension_numbers = #tpu.dot_dimension_numbers<[1], [0], [0], [1], [0, 0, 1, 1], [], []>} : vector<8x384xbf16>, vector<384x32xbf16>, vector<8x32xf32> -> vector<8x32xf32>
    %77 = vector.shape_cast %76 : vector<8x32xf32> to vector<1x8x32xf32>
    %78 = arith.addf %73, %77 : vector<1x8x32xf32>
    %c0_33 = arith.constant 0 : index
    %c0_34 = arith.constant 0 : index
    %79 = vector.load %arg10[%c0_33, %c0_34] : memref<1x32xf32, #tpu.memory_space<vmem>>, vector<1x32xf32>
    %cst_35 = arith.constant dense<0.000000e+00> : vector<1x8xf32>
    %80 = vector.multi_reduction <add>, %78, %cst_35 [2] : vector<1x8x32xf32> to vector<1x8xf32>
    %81 = vector.shape_cast %80 : vector<1x8xf32> to vector<1x8x1xf32>
    %cst_36 = arith.constant 3.200000e+01 : f32
    %82 = vector.broadcast %cst_36 : f32 to vector<1x8x1xf32>
    %83 = arith.divf %81, %82 : vector<1x8x1xf32>
    %84 = vector.broadcast %83 : vector<1x8x1xf32> to vector<1x8x32xf32>
    %85 = arith.subf %78, %84 : vector<1x8x32xf32>
    %86 = arith.mulf %85, %85 : vector<1x8x32xf32>
    %cst_37 = arith.constant dense<0.000000e+00> : vector<1x8xf32>
    %87 = vector.multi_reduction <add>, %86, %cst_37 [2] : vector<1x8x32xf32> to vector<1x8xf32>
    %88 = vector.shape_cast %87 : vector<1x8xf32> to vector<1x8x1xf32>
    %cst_38 = arith.constant 3.200000e+01 : f32
    %89 = vector.broadcast %cst_38 : f32 to vector<1x8x1xf32>
    %90 = arith.divf %88, %89 : vector<1x8x1xf32>
    %cst_39 = arith.constant 9.99999974E-6 : f32
    %91 = vector.broadcast %cst_39 : f32 to vector<1x8x1xf32>
    %92 = arith.addf %90, %91 : vector<1x8x1xf32>
    %93 = math.rsqrt %92 : vector<1x8x1xf32>
    %94 = vector.broadcast %93 : vector<1x8x1xf32> to vector<1x8x32xf32>
    %95 = arith.mulf %85, %94 : vector<1x8x32xf32>
    %96 = vector.shape_cast %79 : vector<1x32xf32> to vector<1x1x32xf32>
    %97 = vector.broadcast %96 : vector<1x1x32xf32> to vector<1x8x32xf32>
    %98 = arith.mulf %95, %97 : vector<1x8x32xf32>
    %99 = vector.shape_cast %98 : vector<1x8x32xf32> to vector<8x32xf32>
    %100 = arith.truncf %99 : vector<8x32xf32> to vector<8x32xbf16>
    %c0_40 = arith.constant 0 : index
    %c0_41 = arith.constant 0 : index
    %101 = vector.load %arg11[%c0_40, %c0_41] : memref<32x128xbf16, #tpu.memory_space<vmem>>, vector<32x128xbf16>
    %cst_42 = arith.constant dense<0.000000e+00> : vector<8x128xf32>
    %102 = tpu.matmul %100, %101, %cst_42 {dimension_numbers = #tpu.dot_dimension_numbers<[1], [0], [0], [1], [0, 0, 1, 1], [], []>} : vector<8x32xbf16>, vector<32x128xbf16>, vector<8x128xf32> -> vector<8x128xf32>
    %c0_43 = arith.constant 0 : index
    %c0_44 = arith.constant 0 : index
    %103 = vector.load %arg12[%c0_43, %c0_44] : memref<1x128xf32, #tpu.memory_space<vmem>>, vector<1x128xf32>
    %104 = vector.broadcast %103 : vector<1x128xf32> to vector<8x128xf32>
    %105 = arith.addf %102, %104 : vector<8x128xf32>
    %cst_45 = arith.constant 5.000000e-01 : f32
    %106 = vector.broadcast %cst_45 : f32 to vector<8x128xf32>
    %107 = arith.mulf %106, %105 : vector<8x128xf32>
    %cst_46 = arith.constant 4.471500e-02 : f32
    %108 = vector.broadcast %cst_46 : f32 to vector<8x128xf32>
    %109 = arith.mulf %108, %105 : vector<8x128xf32>
    %110 = arith.mulf %109, %105 : vector<8x128xf32>
    %111 = arith.mulf %110, %105 : vector<8x128xf32>
    %112 = arith.addf %105, %111 : vector<8x128xf32>
    %cst_47 = arith.constant 0.797884583 : f32
    %113 = vector.broadcast %cst_47 : f32 to vector<8x128xf32>
    %114 = arith.mulf %113, %112 : vector<8x128xf32>
    %115 = math.tanh %114 : vector<8x128xf32>
    %cst_48 = arith.constant 1.000000e+00 : f32
    %116 = vector.broadcast %cst_48 : f32 to vector<8x128xf32>
    %117 = arith.addf %116, %115 : vector<8x128xf32>
    %118 = arith.mulf %107, %117 : vector<8x128xf32>
    %119 = arith.truncf %118 : vector<8x128xf32> to vector<8x128xbf16>
    %c0_49 = arith.constant 0 : index
    %c0_50 = arith.constant 0 : index
    %120 = vector.load %arg13[%c0_49, %c0_50] : memref<128x32xbf16, #tpu.memory_space<vmem>>, vector<128x32xbf16>
    %cst_51 = arith.constant dense<0.000000e+00> : vector<8x32xf32>
    %121 = tpu.matmul %119, %120, %cst_51 {dimension_numbers = #tpu.dot_dimension_numbers<[1], [0], [0], [1], [0, 0, 1, 1], [], []>} : vector<8x128xbf16>, vector<128x32xbf16>, vector<8x32xf32> -> vector<8x32xf32>
    %c0_52 = arith.constant 0 : index
    %c0_53 = arith.constant 0 : index
    %122 = vector.load %arg14[%c0_52, %c0_53] : memref<1x32xf32, #tpu.memory_space<vmem>>, vector<1x32xf32>
    %123 = vector.broadcast %122 : vector<1x32xf32> to vector<8x32xf32>
    %124 = arith.addf %121, %123 : vector<8x32xf32>
    %125 = vector.shape_cast %124 : vector<8x32xf32> to vector<1x8x32xf32>
    %126 = arith.addf %125, %78 : vector<1x8x32xf32>
    %c0_54 = arith.constant 0 : index
    %c0_55 = arith.constant 0 : index
    %c0_56 = arith.constant 0 : index
    %127 = vector.load %arg15[%c0_54, %c0_55, %c0_56] : memref<1x8x32xf32, #tpu.memory_space<vmem>>, vector<1x8x32xf32>
    tpu.vector_store %arg15[%c0_54, %c0_55, %c0_56], %126 {strides = array<i32>} : memref<1x8x32xf32, #tpu.memory_space<vmem>>, vector<1x8x32xf32>,
    return
  }
  func.func @transform_0(%arg0: i32) -> (i32, i32, i32) {
    %c0_i32 = arith.constant 0 : i32
    %c0_i32_0 = arith.constant 0 : i32
    %c0_i32_1 = arith.constant 0 : i32
    return %arg0, %c0_i32, %c0_i32_0 : i32, i32, i32
  }
  func.func @transform_1(%arg0: i32) -> (i32, i32, i32) {
    %c0_i32 = arith.constant 0 : i32
    %c0_i32_0 = arith.constant 0 : i32
    %c0_i32_1 = arith.constant 0 : i32
    return %arg0, %c0_i32, %c0_i32_0 : i32, i32, i32
  }
  func.func @transform_2(%arg0: i32) -> (i32, i32) {
    %c0_i32 = arith.constant 0 : i32
    %c0_i32_0 = arith.constant 0 : i32
    %c0_i32_1 = arith.constant 0 : i32
    return %c0_i32, %c0_i32_0 : i32, i32
  }
  func.func @transform_3(%arg0: i32) -> (i32, i32) {
    %c0_i32 = arith.constant 0 : i32
    %c0_i32_0 = arith.constant 0 : i32
    %c0_i32_1 = arith.constant 0 : i32
    return %c0_i32, %c0_i32_0 : i32, i32
  }
  func.func @transform_4(%arg0: i32) -> (i32, i32) {
    %c0_i32 = arith.constant 0 : i32
    %c0_i32_0 = arith.constant 0 : i32
    %c0_i32_1 = arith.constant 0 : i32
    return %c0_i32, %c0_i32_0 : i32, i32
  }
  func.func @transform_5(%arg0: i32) -> (i32, i32) {
    %c0_i32 = arith.constant 0 : i32
    %c0_i32_0 = arith.constant 0 : i32
    %c0_i32_1 = arith.constant 0 : i32
    return %c0_i32, %c0_i32_0 : i32, i32
  }
  func.func @transform_6(%arg0: i32) -> (i32, i32) {
    %c0_i32 = arith.constant 0 : i32
    %c0_i32_0 = arith.constant 0 : i32
    %c0_i32_1 = arith.constant 0 : i32
    return %c0_i32, %c0_i32_0 : i32, i32
  }
  func.func @transform_7(%arg0: i32) -> (i32, i32) {
    %c0_i32 = arith.constant 0 : i32
    %c0_i32_0 = arith.constant 0 : i32
    %c0_i32_1 = arith.constant 0 : i32
    return %c0_i32, %c0_i32_0 : i32, i32
  }
  func.func @transform_8(%arg0: i32) -> (i32, i32) {
    %c0_i32 = arith.constant 0 : i32
    %c0_i32_0 = arith.constant 0 : i32
    %c0_i32_1 = arith.constant 0 : i32
    return %c0_i32, %c0_i32_0 : i32, i32
  }
  func.func @transform_9(%arg0: i32) -> (i32, i32) {
    %c0_i32 = arith.constant 0 : i32
    %c0_i32_0 = arith.constant 0 : i32
    %c0_i32_1 = arith.constant 0 : i32
    return %c0_i32, %c0_i32_0 : i32, i32
  }
  func.func @transform_10(%arg0: i32) -> (i32, i32) {
    %c0_i32 = arith.constant 0 : i32
    %c0_i32_0 = arith.constant 0 : i32
    %c0_i32_1 = arith.constant 0 : i32
    return %c0_i32, %c0_i32_0 : i32, i32
  }
  func.func @transform_11(%arg0: i32) -> (i32, i32) {
    %c0_i32 = arith.constant 0 : i32
    %c0_i32_0 = arith.constant 0 : i32
    %c0_i32_1 = arith.constant 0 : i32
    return %c0_i32, %c0_i32_0 : i32, i32
  }
  func.func @transform_12(%arg0: i32) -> (i32, i32) {
    %c0_i32 = arith.constant 0 : i32
    %c0_i32_0 = arith.constant 0 : i32
    %c0_i32_1 = arith.constant 0 : i32
    return %c0_i32, %c0_i32_0 : i32, i32
  }
  func.func @transform_13(%arg0: i32) -> (i32, i32) {
    %c0_i32 = arith.constant 0 : i32
    %c0_i32_0 = arith.constant 0 : i32
    %c0_i32_1 = arith.constant 0 : i32
    return %c0_i32, %c0_i32_0 : i32, i32
  }
  func.func @transform_14(%arg0: i32) -> (i32, i32, i32) {
    %c0_i32 = arith.constant 0 : i32
    %c0_i32_0 = arith.constant 0 : i32
    %c0_i32_1 = arith.constant 0 : i32
    return %arg0, %c0_i32, %c0_i32_0 : i32, i32, i32
  }
  func.func @transform_15(%arg0: i32) -> (i32, i32, i32) {
    %c0_i32 = arith.constant 0 : i32
    %c0_i32_0 = arith.constant 0 : i32
    %c0_i32_1 = arith.constant 0 : i32
    return %arg0, %c0_i32, %c0_i32_0 : i32, i32, i32
  }
}

module attributes {stable_mosaic.version = 11 : i64} {
  func.func @kernel(%arg0: i32, %arg1: memref<1x8x32xf32, #tpu.memory_space<vmem>>, %arg2: memref<1x2x160xf32, #tpu.memory_space<vmem>>, %arg3: memref<1x32xf32, #tpu.memory_space<vmem>>, %arg4: memref<96x128xbf16, #tpu.memory_space<vmem>>, %arg5: memref<1x128xf32, #tpu.memory_space<vmem>>, %arg6: memref<384x32xbf16, #tpu.memory_space<vmem>>, %arg7: memref<1x32xf32, #tpu.memory_space<vmem>>, %arg8: memref<1x32xf32, #tpu.memory_space<vmem>>, %arg9: memref<32x128xbf16, #tpu.memory_space<vmem>>, %arg10: memref<1x128xf32, #tpu.memory_space<vmem>>, %arg11: memref<128x32xbf16, #tpu.memory_space<vmem>>, %arg12: memref<1x32xf32, #tpu.memory_space<vmem>>, %arg13: memref<1x8x32xf32, #tpu.memory_space<vmem>>, %arg14: memref<1x2x160xf32, #tpu.memory_space<vmem>>) attributes {dimension_semantics = [#tpu.dimension_semantics<parallel>], iteration_bounds = array<i64: 2>, scalar_prefetch = 0 : i64, scratch_operands = 0 : i64, tpu.core_type = #tpu.core_type<tc>, window_params = [{transform_indices = @transform_0, window_bounds = array<i64: 1, 8, 32>}, {transform_indices = @transform_1, window_bounds = array<i64: 1, 2, 160>}, {pipeline_mode = #tpu.pipeline_mode<synchronous>, transform_indices = @transform_2, window_bounds = array<i64: 1, 32>}, {pipeline_mode = #tpu.pipeline_mode<synchronous>, transform_indices = @transform_3, window_bounds = array<i64: 96, 128>}, {pipeline_mode = #tpu.pipeline_mode<synchronous>, transform_indices = @transform_4, window_bounds = array<i64: 1, 128>}, {pipeline_mode = #tpu.pipeline_mode<synchronous>, transform_indices = @transform_5, window_bounds = array<i64: 384, 32>}, {pipeline_mode = #tpu.pipeline_mode<synchronous>, transform_indices = @transform_6, window_bounds = array<i64: 1, 32>}, {pipeline_mode = #tpu.pipeline_mode<synchronous>, transform_indices = @transform_7, window_bounds = array<i64: 1, 32>}, {pipeline_mode = #tpu.pipeline_mode<synchronous>, transform_indices = @transform_8, window_bounds = array<i64: 32, 128>}, {pipeline_mode = #tpu.pipeline_mode<synchronous>, transform_indices = @transform_9, window_bounds = array<i64: 1, 128>}, {pipeline_mode = #tpu.pipeline_mode<synchronous>, transform_indices = @transform_10, window_bounds = array<i64: 128, 32>}, {pipeline_mode = #tpu.pipeline_mode<synchronous>, transform_indices = @transform_11, window_bounds = array<i64: 1, 32>}, {transform_indices = @transform_12, window_bounds = array<i64: 1, 8, 32>}, {transform_indices = @transform_13, window_bounds = array<i64: 1, 2, 160>}]} {
    %c0 = arith.constant 0 : index
    %c0_0 = arith.constant 0 : index
    %c0_1 = arith.constant 0 : index
    %0 = vector.load %arg1[%c0, %c0_0, %c0_1] : memref<1x8x32xf32, #tpu.memory_space<vmem>>, vector<1x8x32xf32>
    %c0_2 = arith.constant 0 : index
    %c0_3 = arith.constant 0 : index
    %c0_4 = arith.constant 0 : index
    %1 = vector.load %arg2[%c0_2, %c0_3, %c0_4] : memref<1x2x160xf32, #tpu.memory_space<vmem>>, vector<1x2x160xf32>
    %2 = vector.extract_strided_slice %1 {offsets = [0, 0, 0], sizes = [1, 2, 32], strides = [1, 1, 1]} : vector<1x2x160xf32> to vector<1x2x32xf32>
    %3 = vector.extract_strided_slice %1 {offsets = [0, 0, 32], sizes = [1, 2, 128], strides = [1, 1, 1]} : vector<1x2x160xf32> to vector<1x2x128xf32>
    %c0_5 = arith.constant 0 : index
    %c0_6 = arith.constant 0 : index
    %4 = vector.load %arg3[%c0_5, %c0_6] : memref<1x32xf32, #tpu.memory_space<vmem>>, vector<1x32xf32>
    %cst = arith.constant dense<0.000000e+00> : vector<1x8xf32>
    %5 = vector.multi_reduction <add>, %0, %cst [2] : vector<1x8x32xf32> to vector<1x8xf32>
    %6 = vector.shape_cast %5 : vector<1x8xf32> to vector<1x8x1xf32>
    %cst_7 = arith.constant 3.200000e+01 : f32
    %7 = vector.broadcast %cst_7 : f32 to vector<1x8x1xf32>
    %8 = arith.divf %6, %7 : vector<1x8x1xf32>
    %9 = vector.broadcast %8 : vector<1x8x1xf32> to vector<1x8x32xf32>
    %10 = arith.subf %0, %9 : vector<1x8x32xf32>
    %11 = arith.mulf %10, %10 : vector<1x8x32xf32>
    %cst_8 = arith.constant dense<0.000000e+00> : vector<1x8xf32>
    %12 = vector.multi_reduction <add>, %11, %cst_8 [2] : vector<1x8x32xf32> to vector<1x8xf32>
    %13 = vector.shape_cast %12 : vector<1x8xf32> to vector<1x8x1xf32>
    %cst_9 = arith.constant 3.200000e+01 : f32
    %14 = vector.broadcast %cst_9 : f32 to vector<1x8x1xf32>
    %15 = arith.divf %13, %14 : vector<1x8x1xf32>
    %cst_10 = arith.constant 9.99999974E-6 : f32
    %16 = vector.broadcast %cst_10 : f32 to vector<1x8x1xf32>
    %17 = arith.addf %15, %16 : vector<1x8x1xf32>
    %18 = math.rsqrt %17 : vector<1x8x1xf32>
    %19 = vector.broadcast %18 : vector<1x8x1xf32> to vector<1x8x32xf32>
    %20 = arith.mulf %10, %19 : vector<1x8x32xf32>
    %21 = vector.shape_cast %4 : vector<1x32xf32> to vector<1x1x32xf32>
    %22 = vector.broadcast %21 : vector<1x1x32xf32> to vector<1x8x32xf32>
    %23 = arith.mulf %20, %22 : vector<1x8x32xf32>
    %24 = arith.truncf %2 : vector<1x2x32xf32> to vector<1x2x32xbf16>
    %25 = arith.truncf %23 : vector<1x8x32xf32> to vector<1x8x32xbf16>
    %26 = tpu.concatenate %24, %25 in 1 : vector<1x2x32xbf16>, vector<1x8x32xbf16> -> vector<1x10x32xbf16>
    %27 = vector.extract_strided_slice %26 {offsets = [0, 0, 0], sizes = [1, 8, 32], strides = [1, 1, 1]} : vector<1x10x32xbf16> to vector<1x8x32xbf16>
    %28 = vector.extract_strided_slice %26 {offsets = [0, 1, 0], sizes = [1, 8, 32], strides = [1, 1, 1]} : vector<1x10x32xbf16> to vector<1x8x32xbf16>
    %29 = vector.extract_strided_slice %26 {offsets = [0, 2, 0], sizes = [1, 8, 32], strides = [1, 1, 1]} : vector<1x10x32xbf16> to vector<1x8x32xbf16>
    %30 = tpu.concatenate %27, %28, %29 in 2 : vector<1x8x32xbf16>, vector<1x8x32xbf16>, vector<1x8x32xbf16> -> vector<1x8x96xbf16>
    %31 = vector.shape_cast %30 : vector<1x8x96xbf16> to vector<8x96xbf16>
    %c0_11 = arith.constant 0 : index
    %c0_12 = arith.constant 0 : index
    %32 = vector.load %arg4[%c0_11, %c0_12] : memref<96x128xbf16, #tpu.memory_space<vmem>>, vector<96x128xbf16>
    %cst_13 = arith.constant dense<0.000000e+00> : vector<8x128xf32>
    %33 = tpu.matmul %31, %32, %cst_13 {dimension_numbers = #tpu.dot_dimension_numbers<[1], [0], [0], [1], [0, 0, 1, 1], [], []>} : vector<8x96xbf16>, vector<96x128xbf16>, vector<8x128xf32> -> vector<8x128xf32>
    %c0_14 = arith.constant 0 : index
    %c0_15 = arith.constant 0 : index
    %34 = vector.load %arg5[%c0_14, %c0_15] : memref<1x128xf32, #tpu.memory_space<vmem>>, vector<1x128xf32>
    %35 = vector.broadcast %34 : vector<1x128xf32> to vector<8x128xf32>
    %36 = arith.addf %33, %35 : vector<8x128xf32>
    %cst_16 = arith.constant 5.000000e-01 : f32
    %37 = vector.broadcast %cst_16 : f32 to vector<8x128xf32>
    %38 = arith.mulf %37, %36 : vector<8x128xf32>
    %cst_17 = arith.constant 4.471500e-02 : f32
    %39 = vector.broadcast %cst_17 : f32 to vector<8x128xf32>
    %40 = arith.mulf %39, %36 : vector<8x128xf32>
    %41 = arith.mulf %40, %36 : vector<8x128xf32>
    %42 = arith.mulf %41, %36 : vector<8x128xf32>
    %43 = arith.addf %36, %42 : vector<8x128xf32>
    %cst_18 = arith.constant 0.797884583 : f32
    %44 = vector.broadcast %cst_18 : f32 to vector<8x128xf32>
    %45 = arith.mulf %44, %43 : vector<8x128xf32>
    %46 = math.tanh %45 : vector<8x128xf32>
    %cst_19 = arith.constant 1.000000e+00 : f32
    %47 = vector.broadcast %cst_19 : f32 to vector<8x128xf32>
    %48 = arith.addf %47, %46 : vector<8x128xf32>
    %49 = arith.mulf %38, %48 : vector<8x128xf32>
    %50 = vector.shape_cast %49 : vector<8x128xf32> to vector<1x8x128xf32>
    %51 = vector.extract_strided_slice %23 {offsets = [0, 6, 0], sizes = [1, 2, 32], strides = [1, 1, 1]} : vector<1x8x32xf32> to vector<1x2x32xf32>
    %52 = vector.extract_strided_slice %50 {offsets = [0, 6, 0], sizes = [1, 2, 128], strides = [1, 1, 1]} : vector<1x8x128xf32> to vector<1x2x128xf32>
    %53 = tpu.concatenate %51, %52 in 2 : vector<1x2x32xf32>, vector<1x2x128xf32> -> vector<1x2x160xf32>
    %c0_20 = arith.constant 0 : index
    %c0_21 = arith.constant 0 : index
    %c0_22 = arith.constant 0 : index
    %54 = vector.load %arg14[%c0_20, %c0_21, %c0_22] : memref<1x2x160xf32, #tpu.memory_space<vmem>>, vector<1x2x160xf32>
    tpu.vector_store %arg14[%c0_20, %c0_21, %c0_22], %53 {strides = array<i32>} : memref<1x2x160xf32, #tpu.memory_space<vmem>>, vector<1x2x160xf32>,
    %55 = arith.truncf %3 : vector<1x2x128xf32> to vector<1x2x128xbf16>
    %56 = arith.truncf %50 : vector<1x8x128xf32> to vector<1x8x128xbf16>
    %57 = tpu.concatenate %55, %56 in 1 : vector<1x2x128xbf16>, vector<1x8x128xbf16> -> vector<1x10x128xbf16>
    %58 = vector.extract_strided_slice %57 {offsets = [0, 0, 0], sizes = [1, 8, 128], strides = [1, 1, 1]} : vector<1x10x128xbf16> to vector<1x8x128xbf16>
    %59 = vector.extract_strided_slice %57 {offsets = [0, 1, 0], sizes = [1, 8, 128], strides = [1, 1, 1]} : vector<1x10x128xbf16> to vector<1x8x128xbf16>
    %60 = vector.extract_strided_slice %57 {offsets = [0, 2, 0], sizes = [1, 8, 128], strides = [1, 1, 1]} : vector<1x10x128xbf16> to vector<1x8x128xbf16>
    %61 = tpu.concatenate %58, %59, %60 in 2 : vector<1x8x128xbf16>, vector<1x8x128xbf16>, vector<1x8x128xbf16> -> vector<1x8x384xbf16>
    %c0_23 = arith.constant 0 : index
    %c0_24 = arith.constant 0 : index
    %62 = vector.load %arg7[%c0_23, %c0_24] : memref<1x32xf32, #tpu.memory_space<vmem>>, vector<1x32xf32>
    %63 = vector.shape_cast %62 : vector<1x32xf32> to vector<1x1x32xf32>
    %64 = vector.broadcast %63 : vector<1x1x32xf32> to vector<1x8x32xf32>
    %65 = arith.addf %0, %64 : vector<1x8x32xf32>
    %66 = vector.shape_cast %61 : vector<1x8x384xbf16> to vector<8x384xbf16>
    %c0_25 = arith.constant 0 : index
    %c0_26 = arith.constant 0 : index
    %67 = vector.load %arg6[%c0_25, %c0_26] : memref<384x32xbf16, #tpu.memory_space<vmem>>, vector<384x32xbf16>
    %cst_27 = arith.constant dense<0.000000e+00> : vector<8x32xf32>
    %68 = tpu.matmul %66, %67, %cst_27 {dimension_numbers = #tpu.dot_dimension_numbers<[1], [0], [0], [1], [0, 0, 1, 1], [], []>} : vector<8x384xbf16>, vector<384x32xbf16>, vector<8x32xf32> -> vector<8x32xf32>
    %69 = vector.shape_cast %68 : vector<8x32xf32> to vector<1x8x32xf32>
    %70 = arith.addf %65, %69 : vector<1x8x32xf32>
    %c0_28 = arith.constant 0 : index
    %c0_29 = arith.constant 0 : index
    %71 = vector.load %arg8[%c0_28, %c0_29] : memref<1x32xf32, #tpu.memory_space<vmem>>, vector<1x32xf32>
    %cst_30 = arith.constant dense<0.000000e+00> : vector<1x8xf32>
    %72 = vector.multi_reduction <add>, %70, %cst_30 [2] : vector<1x8x32xf32> to vector<1x8xf32>
    %73 = vector.shape_cast %72 : vector<1x8xf32> to vector<1x8x1xf32>
    %cst_31 = arith.constant 3.200000e+01 : f32
    %74 = vector.broadcast %cst_31 : f32 to vector<1x8x1xf32>
    %75 = arith.divf %73, %74 : vector<1x8x1xf32>
    %76 = vector.broadcast %75 : vector<1x8x1xf32> to vector<1x8x32xf32>
    %77 = arith.subf %70, %76 : vector<1x8x32xf32>
    %78 = arith.mulf %77, %77 : vector<1x8x32xf32>
    %cst_32 = arith.constant dense<0.000000e+00> : vector<1x8xf32>
    %79 = vector.multi_reduction <add>, %78, %cst_32 [2] : vector<1x8x32xf32> to vector<1x8xf32>
    %80 = vector.shape_cast %79 : vector<1x8xf32> to vector<1x8x1xf32>
    %cst_33 = arith.constant 3.200000e+01 : f32
    %81 = vector.broadcast %cst_33 : f32 to vector<1x8x1xf32>
    %82 = arith.divf %80, %81 : vector<1x8x1xf32>
    %cst_34 = arith.constant 9.99999974E-6 : f32
    %83 = vector.broadcast %cst_34 : f32 to vector<1x8x1xf32>
    %84 = arith.addf %82, %83 : vector<1x8x1xf32>
    %85 = math.rsqrt %84 : vector<1x8x1xf32>
    %86 = vector.broadcast %85 : vector<1x8x1xf32> to vector<1x8x32xf32>
    %87 = arith.mulf %77, %86 : vector<1x8x32xf32>
    %88 = vector.shape_cast %71 : vector<1x32xf32> to vector<1x1x32xf32>
    %89 = vector.broadcast %88 : vector<1x1x32xf32> to vector<1x8x32xf32>
    %90 = arith.mulf %87, %89 : vector<1x8x32xf32>
    %91 = vector.shape_cast %90 : vector<1x8x32xf32> to vector<8x32xf32>
    %92 = arith.truncf %91 : vector<8x32xf32> to vector<8x32xbf16>
    %c0_35 = arith.constant 0 : index
    %c0_36 = arith.constant 0 : index
    %93 = vector.load %arg9[%c0_35, %c0_36] : memref<32x128xbf16, #tpu.memory_space<vmem>>, vector<32x128xbf16>
    %cst_37 = arith.constant dense<0.000000e+00> : vector<8x128xf32>
    %94 = tpu.matmul %92, %93, %cst_37 {dimension_numbers = #tpu.dot_dimension_numbers<[1], [0], [0], [1], [0, 0, 1, 1], [], []>} : vector<8x32xbf16>, vector<32x128xbf16>, vector<8x128xf32> -> vector<8x128xf32>
    %c0_38 = arith.constant 0 : index
    %c0_39 = arith.constant 0 : index
    %95 = vector.load %arg10[%c0_38, %c0_39] : memref<1x128xf32, #tpu.memory_space<vmem>>, vector<1x128xf32>
    %96 = vector.broadcast %95 : vector<1x128xf32> to vector<8x128xf32>
    %97 = arith.addf %94, %96 : vector<8x128xf32>
    %cst_40 = arith.constant 5.000000e-01 : f32
    %98 = vector.broadcast %cst_40 : f32 to vector<8x128xf32>
    %99 = arith.mulf %98, %97 : vector<8x128xf32>
    %cst_41 = arith.constant 4.471500e-02 : f32
    %100 = vector.broadcast %cst_41 : f32 to vector<8x128xf32>
    %101 = arith.mulf %100, %97 : vector<8x128xf32>
    %102 = arith.mulf %101, %97 : vector<8x128xf32>
    %103 = arith.mulf %102, %97 : vector<8x128xf32>
    %104 = arith.addf %97, %103 : vector<8x128xf32>
    %cst_42 = arith.constant 0.797884583 : f32
    %105 = vector.broadcast %cst_42 : f32 to vector<8x128xf32>
    %106 = arith.mulf %105, %104 : vector<8x128xf32>
    %107 = math.tanh %106 : vector<8x128xf32>
    %cst_43 = arith.constant 1.000000e+00 : f32
    %108 = vector.broadcast %cst_43 : f32 to vector<8x128xf32>
    %109 = arith.addf %108, %107 : vector<8x128xf32>
    %110 = arith.mulf %99, %109 : vector<8x128xf32>
    %111 = arith.truncf %110 : vector<8x128xf32> to vector<8x128xbf16>
    %c0_44 = arith.constant 0 : index
    %c0_45 = arith.constant 0 : index
    %112 = vector.load %arg11[%c0_44, %c0_45] : memref<128x32xbf16, #tpu.memory_space<vmem>>, vector<128x32xbf16>
    %cst_46 = arith.constant dense<0.000000e+00> : vector<8x32xf32>
    %113 = tpu.matmul %111, %112, %cst_46 {dimension_numbers = #tpu.dot_dimension_numbers<[1], [0], [0], [1], [0, 0, 1, 1], [], []>} : vector<8x128xbf16>, vector<128x32xbf16>, vector<8x32xf32> -> vector<8x32xf32>
    %c0_47 = arith.constant 0 : index
    %c0_48 = arith.constant 0 : index
    %114 = vector.load %arg12[%c0_47, %c0_48] : memref<1x32xf32, #tpu.memory_space<vmem>>, vector<1x32xf32>
    %115 = vector.broadcast %114 : vector<1x32xf32> to vector<8x32xf32>
    %116 = arith.addf %113, %115 : vector<8x32xf32>
    %117 = vector.shape_cast %116 : vector<8x32xf32> to vector<1x8x32xf32>
    %118 = arith.addf %117, %70 : vector<1x8x32xf32>
    %c0_49 = arith.constant 0 : index
    %c0_50 = arith.constant 0 : index
    %c0_51 = arith.constant 0 : index
    %119 = vector.load %arg13[%c0_49, %c0_50, %c0_51] : memref<1x8x32xf32, #tpu.memory_space<vmem>>, vector<1x8x32xf32>
    tpu.vector_store %arg13[%c0_49, %c0_50, %c0_51], %118 {strides = array<i32>} : memref<1x8x32xf32, #tpu.memory_space<vmem>>, vector<1x8x32xf32>,
    return
  }
  func.func @transform_0(%arg0: i32) -> (i32, i32, i32) {
    %c0_i32 = arith.constant 0 : i32
    %c0_i32_0 = arith.constant 0 : i32
    %c0_i32_1 = arith.constant 0 : i32
    return %arg0, %c0_i32, %c0_i32_0 : i32, i32, i32
  }
  func.func @transform_1(%arg0: i32) -> (i32, i32, i32) {
    %c0_i32 = arith.constant 0 : i32
    %c0_i32_0 = arith.constant 0 : i32
    %c0_i32_1 = arith.constant 0 : i32
    return %arg0, %c0_i32, %c0_i32_0 : i32, i32, i32
  }
  func.func @transform_2(%arg0: i32) -> (i32, i32) {
    %c0_i32 = arith.constant 0 : i32
    %c0_i32_0 = arith.constant 0 : i32
    %c0_i32_1 = arith.constant 0 : i32
    return %c0_i32, %c0_i32_0 : i32, i32
  }
  func.func @transform_3(%arg0: i32) -> (i32, i32) {
    %c0_i32 = arith.constant 0 : i32
    %c0_i32_0 = arith.constant 0 : i32
    %c0_i32_1 = arith.constant 0 : i32
    return %c0_i32, %c0_i32_0 : i32, i32
  }
  func.func @transform_4(%arg0: i32) -> (i32, i32) {
    %c0_i32 = arith.constant 0 : i32
    %c0_i32_0 = arith.constant 0 : i32
    %c0_i32_1 = arith.constant 0 : i32
    return %c0_i32, %c0_i32_0 : i32, i32
  }
  func.func @transform_5(%arg0: i32) -> (i32, i32) {
    %c0_i32 = arith.constant 0 : i32
    %c0_i32_0 = arith.constant 0 : i32
    %c0_i32_1 = arith.constant 0 : i32
    return %c0_i32, %c0_i32_0 : i32, i32
  }
  func.func @transform_6(%arg0: i32) -> (i32, i32) {
    %c0_i32 = arith.constant 0 : i32
    %c0_i32_0 = arith.constant 0 : i32
    %c0_i32_1 = arith.constant 0 : i32
    return %c0_i32, %c0_i32_0 : i32, i32
  }
  func.func @transform_7(%arg0: i32) -> (i32, i32) {
    %c0_i32 = arith.constant 0 : i32
    %c0_i32_0 = arith.constant 0 : i32
    %c0_i32_1 = arith.constant 0 : i32
    return %c0_i32, %c0_i32_0 : i32, i32
  }
  func.func @transform_8(%arg0: i32) -> (i32, i32) {
    %c0_i32 = arith.constant 0 : i32
    %c0_i32_0 = arith.constant 0 : i32
    %c0_i32_1 = arith.constant 0 : i32
    return %c0_i32, %c0_i32_0 : i32, i32
  }
  func.func @transform_9(%arg0: i32) -> (i32, i32) {
    %c0_i32 = arith.constant 0 : i32
    %c0_i32_0 = arith.constant 0 : i32
    %c0_i32_1 = arith.constant 0 : i32
    return %c0_i32, %c0_i32_0 : i32, i32
  }
  func.func @transform_10(%arg0: i32) -> (i32, i32) {
    %c0_i32 = arith.constant 0 : i32
    %c0_i32_0 = arith.constant 0 : i32
    %c0_i32_1 = arith.constant 0 : i32
    return %c0_i32, %c0_i32_0 : i32, i32
  }
  func.func @transform_11(%arg0: i32) -> (i32, i32) {
    %c0_i32 = arith.constant 0 : i32
    %c0_i32_0 = arith.constant 0 : i32
    %c0_i32_1 = arith.constant 0 : i32
    return %c0_i32, %c0_i32_0 : i32, i32
  }
  func.func @transform_12(%arg0: i32) -> (i32, i32, i32) {
    %c0_i32 = arith.constant 0 : i32
    %c0_i32_0 = arith.constant 0 : i32
    %c0_i32_1 = arith.constant 0 : i32
    return %arg0, %c0_i32, %c0_i32_0 : i32, i32, i32
  }
  func.func @transform_13(%arg0: i32) -> (i32, i32, i32) {
    %c0_i32 = arith.constant 0 : i32
    %c0_i32_0 = arith.constant 0 : i32
    %c0_i32_1 = arith.constant 0 : i32
    return %arg0, %c0_i32, %c0_i32_0 : i32, i32, i32
  }
}

module attributes {stable_mosaic.version = 11 : i64} {
  func.func @kernel(%arg0: i32, %arg1: memref<1x8x32xf32, #tpu.memory_space<vmem>>, %arg2: memref<1x2x160xf32, #tpu.memory_space<vmem>>, %arg3: memref<1x32xf32, #tpu.memory_space<vmem>>, %arg4: memref<96x128xbf16, #tpu.memory_space<vmem>>, %arg5: memref<1x128xf32, #tpu.memory_space<vmem>>, %arg6: memref<384x32xbf16, #tpu.memory_space<vmem>>, %arg7: memref<1x32xf32, #tpu.memory_space<vmem>>, %arg8: memref<1x32xf32, #tpu.memory_space<vmem>>, %arg9: memref<32x128xbf16, #tpu.memory_space<vmem>>, %arg10: memref<1x128xf32, #tpu.memory_space<vmem>>, %arg11: memref<128x32xbf16, #tpu.memory_space<vmem>>, %arg12: memref<1x32xf32, #tpu.memory_space<vmem>>, %arg13: memref<1x32xf32, #tpu.memory_space<vmem>>, %arg14: memref<32x16xbf16, #tpu.memory_space<vmem>>, %arg15: memref<1x16xf32, #tpu.memory_space<vmem>>, %arg16: memref<1x8x16xf32, #tpu.memory_space<vmem>>, %arg17: memref<1x2x160xf32, #tpu.memory_space<vmem>>) attributes {dimension_semantics = [#tpu.dimension_semantics<parallel>], iteration_bounds = array<i64: 2>, scalar_prefetch = 0 : i64, scratch_operands = 0 : i64, tpu.core_type = #tpu.core_type<tc>, window_params = [{transform_indices = @transform_0, window_bounds = array<i64: 1, 8, 32>}, {transform_indices = @transform_1, window_bounds = array<i64: 1, 2, 160>}, {pipeline_mode = #tpu.pipeline_mode<synchronous>, transform_indices = @transform_2, window_bounds = array<i64: 1, 32>}, {pipeline_mode = #tpu.pipeline_mode<synchronous>, transform_indices = @transform_3, window_bounds = array<i64: 96, 128>}, {pipeline_mode = #tpu.pipeline_mode<synchronous>, transform_indices = @transform_4, window_bounds = array<i64: 1, 128>}, {pipeline_mode = #tpu.pipeline_mode<synchronous>, transform_indices = @transform_5, window_bounds = array<i64: 384, 32>}, {pipeline_mode = #tpu.pipeline_mode<synchronous>, transform_indices = @transform_6, window_bounds = array<i64: 1, 32>}, {pipeline_mode = #tpu.pipeline_mode<synchronous>, transform_indices = @transform_7, window_bounds = array<i64: 1, 32>}, {pipeline_mode = #tpu.pipeline_mode<synchronous>, transform_indices = @transform_8, window_bounds = array<i64: 32, 128>}, {pipeline_mode = #tpu.pipeline_mode<synchronous>, transform_indices = @transform_9, window_bounds = array<i64: 1, 128>}, {pipeline_mode = #tpu.pipeline_mode<synchronous>, transform_indices = @transform_10, window_bounds = array<i64: 128, 32>}, {pipeline_mode = #tpu.pipeline_mode<synchronous>, transform_indices = @transform_11, window_bounds = array<i64: 1, 32>}, {pipeline_mode = #tpu.pipeline_mode<synchronous>, transform_indices = @transform_12, window_bounds = array<i64: 1, 32>}, {pipeline_mode = #tpu.pipeline_mode<synchronous>, transform_indices = @transform_13, window_bounds = array<i64: 32, 16>}, {pipeline_mode = #tpu.pipeline_mode<synchronous>, transform_indices = @transform_14, window_bounds = array<i64: 1, 16>}, {transform_indices = @transform_15, window_bounds = array<i64: 1, 8, 16>}, {transform_indices = @transform_16, window_bounds = array<i64: 1, 2, 160>}]} {
    %c0 = arith.constant 0 : index
    %c0_0 = arith.constant 0 : index
    %c0_1 = arith.constant 0 : index
    %0 = vector.load %arg1[%c0, %c0_0, %c0_1] : memref<1x8x32xf32, #tpu.memory_space<vmem>>, vector<1x8x32xf32>
    %c0_2 = arith.constant 0 : index
    %c0_3 = arith.constant 0 : index
    %c0_4 = arith.constant 0 : index
    %1 = vector.load %arg2[%c0_2, %c0_3, %c0_4] : memref<1x2x160xf32, #tpu.memory_space<vmem>>, vector<1x2x160xf32>
    %2 = vector.extract_strided_slice %1 {offsets = [0, 0, 0], sizes = [1, 2, 32], strides = [1, 1, 1]} : vector<1x2x160xf32> to vector<1x2x32xf32>
    %3 = vector.extract_strided_slice %1 {offsets = [0, 0, 32], sizes = [1, 2, 128], strides = [1, 1, 1]} : vector<1x2x160xf32> to vector<1x2x128xf32>
    %c0_5 = arith.constant 0 : index
    %c0_6 = arith.constant 0 : index
    %4 = vector.load %arg3[%c0_5, %c0_6] : memref<1x32xf32, #tpu.memory_space<vmem>>, vector<1x32xf32>
    %cst = arith.constant dense<0.000000e+00> : vector<1x8xf32>
    %5 = vector.multi_reduction <add>, %0, %cst [2] : vector<1x8x32xf32> to vector<1x8xf32>
    %6 = vector.shape_cast %5 : vector<1x8xf32> to vector<1x8x1xf32>
    %cst_7 = arith.constant 3.200000e+01 : f32
    %7 = vector.broadcast %cst_7 : f32 to vector<1x8x1xf32>
    %8 = arith.divf %6, %7 : vector<1x8x1xf32>
    %9 = vector.broadcast %8 : vector<1x8x1xf32> to vector<1x8x32xf32>
    %10 = arith.subf %0, %9 : vector<1x8x32xf32>
    %11 = arith.mulf %10, %10 : vector<1x8x32xf32>
    %cst_8 = arith.constant dense<0.000000e+00> : vector<1x8xf32>
    %12 = vector.multi_reduction <add>, %11, %cst_8 [2] : vector<1x8x32xf32> to vector<1x8xf32>
    %13 = vector.shape_cast %12 : vector<1x8xf32> to vector<1x8x1xf32>
    %cst_9 = arith.constant 3.200000e+01 : f32
    %14 = vector.broadcast %cst_9 : f32 to vector<1x8x1xf32>
    %15 = arith.divf %13, %14 : vector<1x8x1xf32>
    %cst_10 = arith.constant 9.99999974E-6 : f32
    %16 = vector.broadcast %cst_10 : f32 to vector<1x8x1xf32>
    %17 = arith.addf %15, %16 : vector<1x8x1xf32>
    %18 = math.rsqrt %17 : vector<1x8x1xf32>
    %19 = vector.broadcast %18 : vector<1x8x1xf32> to vector<1x8x32xf32>
    %20 = arith.mulf %10, %19 : vector<1x8x32xf32>
    %21 = vector.shape_cast %4 : vector<1x32xf32> to vector<1x1x32xf32>
    %22 = vector.broadcast %21 : vector<1x1x32xf32> to vector<1x8x32xf32>
    %23 = arith.mulf %20, %22 : vector<1x8x32xf32>
    %24 = arith.truncf %2 : vector<1x2x32xf32> to vector<1x2x32xbf16>
    %25 = arith.truncf %23 : vector<1x8x32xf32> to vector<1x8x32xbf16>
    %26 = tpu.concatenate %24, %25 in 1 : vector<1x2x32xbf16>, vector<1x8x32xbf16> -> vector<1x10x32xbf16>
    %27 = vector.extract_strided_slice %26 {offsets = [0, 0, 0], sizes = [1, 8, 32], strides = [1, 1, 1]} : vector<1x10x32xbf16> to vector<1x8x32xbf16>
    %28 = vector.extract_strided_slice %26 {offsets = [0, 1, 0], sizes = [1, 8, 32], strides = [1, 1, 1]} : vector<1x10x32xbf16> to vector<1x8x32xbf16>
    %29 = vector.extract_strided_slice %26 {offsets = [0, 2, 0], sizes = [1, 8, 32], strides = [1, 1, 1]} : vector<1x10x32xbf16> to vector<1x8x32xbf16>
    %30 = tpu.concatenate %27, %28, %29 in 2 : vector<1x8x32xbf16>, vector<1x8x32xbf16>, vector<1x8x32xbf16> -> vector<1x8x96xbf16>
    %31 = vector.shape_cast %30 : vector<1x8x96xbf16> to vector<8x96xbf16>
    %c0_11 = arith.constant 0 : index
    %c0_12 = arith.constant 0 : index
    %32 = vector.load %arg4[%c0_11, %c0_12] : memref<96x128xbf16, #tpu.memory_space<vmem>>, vector<96x128xbf16>
    %cst_13 = arith.constant dense<0.000000e+00> : vector<8x128xf32>
    %33 = tpu.matmul %31, %32, %cst_13 {dimension_numbers = #tpu.dot_dimension_numbers<[1], [0], [0], [1], [0, 0, 1, 1], [], []>} : vector<8x96xbf16>, vector<96x128xbf16>, vector<8x128xf32> -> vector<8x128xf32>
    %c0_14 = arith.constant 0 : index
    %c0_15 = arith.constant 0 : index
    %34 = vector.load %arg5[%c0_14, %c0_15] : memref<1x128xf32, #tpu.memory_space<vmem>>, vector<1x128xf32>
    %35 = vector.broadcast %34 : vector<1x128xf32> to vector<8x128xf32>
    %36 = arith.addf %33, %35 : vector<8x128xf32>
    %cst_16 = arith.constant 5.000000e-01 : f32
    %37 = vector.broadcast %cst_16 : f32 to vector<8x128xf32>
    %38 = arith.mulf %37, %36 : vector<8x128xf32>
    %cst_17 = arith.constant 4.471500e-02 : f32
    %39 = vector.broadcast %cst_17 : f32 to vector<8x128xf32>
    %40 = arith.mulf %39, %36 : vector<8x128xf32>
    %41 = arith.mulf %40, %36 : vector<8x128xf32>
    %42 = arith.mulf %41, %36 : vector<8x128xf32>
    %43 = arith.addf %36, %42 : vector<8x128xf32>
    %cst_18 = arith.constant 0.797884583 : f32
    %44 = vector.broadcast %cst_18 : f32 to vector<8x128xf32>
    %45 = arith.mulf %44, %43 : vector<8x128xf32>
    %46 = math.tanh %45 : vector<8x128xf32>
    %cst_19 = arith.constant 1.000000e+00 : f32
    %47 = vector.broadcast %cst_19 : f32 to vector<8x128xf32>
    %48 = arith.addf %47, %46 : vector<8x128xf32>
    %49 = arith.mulf %38, %48 : vector<8x128xf32>
    %50 = vector.shape_cast %49 : vector<8x128xf32> to vector<1x8x128xf32>
    %51 = vector.extract_strided_slice %23 {offsets = [0, 6, 0], sizes = [1, 2, 32], strides = [1, 1, 1]} : vector<1x8x32xf32> to vector<1x2x32xf32>
    %52 = vector.extract_strided_slice %50 {offsets = [0, 6, 0], sizes = [1, 2, 128], strides = [1, 1, 1]} : vector<1x8x128xf32> to vector<1x2x128xf32>
    %53 = tpu.concatenate %51, %52 in 2 : vector<1x2x32xf32>, vector<1x2x128xf32> -> vector<1x2x160xf32>
    %c0_20 = arith.constant 0 : index
    %c0_21 = arith.constant 0 : index
    %c0_22 = arith.constant 0 : index
    %54 = vector.load %arg17[%c0_20, %c0_21, %c0_22] : memref<1x2x160xf32, #tpu.memory_space<vmem>>, vector<1x2x160xf32>
    tpu.vector_store %arg17[%c0_20, %c0_21, %c0_22], %53 {strides = array<i32>} : memref<1x2x160xf32, #tpu.memory_space<vmem>>, vector<1x2x160xf32>,
    %55 = arith.truncf %3 : vector<1x2x128xf32> to vector<1x2x128xbf16>
    %56 = arith.truncf %50 : vector<1x8x128xf32> to vector<1x8x128xbf16>
    %57 = tpu.concatenate %55, %56 in 1 : vector<1x2x128xbf16>, vector<1x8x128xbf16> -> vector<1x10x128xbf16>
    %58 = vector.extract_strided_slice %57 {offsets = [0, 0, 0], sizes = [1, 8, 128], strides = [1, 1, 1]} : vector<1x10x128xbf16> to vector<1x8x128xbf16>
    %59 = vector.extract_strided_slice %57 {offsets = [0, 1, 0], sizes = [1, 8, 128], strides = [1, 1, 1]} : vector<1x10x128xbf16> to vector<1x8x128xbf16>
    %60 = vector.extract_strided_slice %57 {offsets = [0, 2, 0], sizes = [1, 8, 128], strides = [1, 1, 1]} : vector<1x10x128xbf16> to vector<1x8x128xbf16>
    %61 = tpu.concatenate %58, %59, %60 in 2 : vector<1x8x128xbf16>, vector<1x8x128xbf16>, vector<1x8x128xbf16> -> vector<1x8x384xbf16>
    %c0_23 = arith.constant 0 : index
    %c0_24 = arith.constant 0 : index
    %62 = vector.load %arg7[%c0_23, %c0_24] : memref<1x32xf32, #tpu.memory_space<vmem>>, vector<1x32xf32>
    %63 = vector.shape_cast %62 : vector<1x32xf32> to vector<1x1x32xf32>
    %64 = vector.broadcast %63 : vector<1x1x32xf32> to vector<1x8x32xf32>
    %65 = arith.addf %0, %64 : vector<1x8x32xf32>
    %66 = vector.shape_cast %61 : vector<1x8x384xbf16> to vector<8x384xbf16>
    %c0_25 = arith.constant 0 : index
    %c0_26 = arith.constant 0 : index
    %67 = vector.load %arg6[%c0_25, %c0_26] : memref<384x32xbf16, #tpu.memory_space<vmem>>, vector<384x32xbf16>
    %cst_27 = arith.constant dense<0.000000e+00> : vector<8x32xf32>
    %68 = tpu.matmul %66, %67, %cst_27 {dimension_numbers = #tpu.dot_dimension_numbers<[1], [0], [0], [1], [0, 0, 1, 1], [], []>} : vector<8x384xbf16>, vector<384x32xbf16>, vector<8x32xf32> -> vector<8x32xf32>
    %69 = vector.shape_cast %68 : vector<8x32xf32> to vector<1x8x32xf32>
    %70 = arith.addf %65, %69 : vector<1x8x32xf32>
    %c0_28 = arith.constant 0 : index
    %c0_29 = arith.constant 0 : index
    %71 = vector.load %arg8[%c0_28, %c0_29] : memref<1x32xf32, #tpu.memory_space<vmem>>, vector<1x32xf32>
    %cst_30 = arith.constant dense<0.000000e+00> : vector<1x8xf32>
    %72 = vector.multi_reduction <add>, %70, %cst_30 [2] : vector<1x8x32xf32> to vector<1x8xf32>
    %73 = vector.shape_cast %72 : vector<1x8xf32> to vector<1x8x1xf32>
    %cst_31 = arith.constant 3.200000e+01 : f32
    %74 = vector.broadcast %cst_31 : f32 to vector<1x8x1xf32>
    %75 = arith.divf %73, %74 : vector<1x8x1xf32>
    %76 = vector.broadcast %75 : vector<1x8x1xf32> to vector<1x8x32xf32>
    %77 = arith.subf %70, %76 : vector<1x8x32xf32>
    %78 = arith.mulf %77, %77 : vector<1x8x32xf32>
    %cst_32 = arith.constant dense<0.000000e+00> : vector<1x8xf32>
    %79 = vector.multi_reduction <add>, %78, %cst_32 [2] : vector<1x8x32xf32> to vector<1x8xf32>
    %80 = vector.shape_cast %79 : vector<1x8xf32> to vector<1x8x1xf32>
    %cst_33 = arith.constant 3.200000e+01 : f32
    %81 = vector.broadcast %cst_33 : f32 to vector<1x8x1xf32>
    %82 = arith.divf %80, %81 : vector<1x8x1xf32>
    %cst_34 = arith.constant 9.99999974E-6 : f32
    %83 = vector.broadcast %cst_34 : f32 to vector<1x8x1xf32>
    %84 = arith.addf %82, %83 : vector<1x8x1xf32>
    %85 = math.rsqrt %84 : vector<1x8x1xf32>
    %86 = vector.broadcast %85 : vector<1x8x1xf32> to vector<1x8x32xf32>
    %87 = arith.mulf %77, %86 : vector<1x8x32xf32>
    %88 = vector.shape_cast %71 : vector<1x32xf32> to vector<1x1x32xf32>
    %89 = vector.broadcast %88 : vector<1x1x32xf32> to vector<1x8x32xf32>
    %90 = arith.mulf %87, %89 : vector<1x8x32xf32>
    %91 = vector.shape_cast %90 : vector<1x8x32xf32> to vector<8x32xf32>
    %92 = arith.truncf %91 : vector<8x32xf32> to vector<8x32xbf16>
    %c0_35 = arith.constant 0 : index
    %c0_36 = arith.constant 0 : index
    %93 = vector.load %arg9[%c0_35, %c0_36] : memref<32x128xbf16, #tpu.memory_space<vmem>>, vector<32x128xbf16>
    %cst_37 = arith.constant dense<0.000000e+00> : vector<8x128xf32>
    %94 = tpu.matmul %92, %93, %cst_37 {dimension_numbers = #tpu.dot_dimension_numbers<[1], [0], [0], [1], [0, 0, 1, 1], [], []>} : vector<8x32xbf16>, vector<32x128xbf16>, vector<8x128xf32> -> vector<8x128xf32>
    %c0_38 = arith.constant 0 : index
    %c0_39 = arith.constant 0 : index
    %95 = vector.load %arg10[%c0_38, %c0_39] : memref<1x128xf32, #tpu.memory_space<vmem>>, vector<1x128xf32>
    %96 = vector.broadcast %95 : vector<1x128xf32> to vector<8x128xf32>
    %97 = arith.addf %94, %96 : vector<8x128xf32>
    %cst_40 = arith.constant 5.000000e-01 : f32
    %98 = vector.broadcast %cst_40 : f32 to vector<8x128xf32>
    %99 = arith.mulf %98, %97 : vector<8x128xf32>
    %cst_41 = arith.constant 4.471500e-02 : f32
    %100 = vector.broadcast %cst_41 : f32 to vector<8x128xf32>
    %101 = arith.mulf %100, %97 : vector<8x128xf32>
    %102 = arith.mulf %101, %97 : vector<8x128xf32>
    %103 = arith.mulf %102, %97 : vector<8x128xf32>
    %104 = arith.addf %97, %103 : vector<8x128xf32>
    %cst_42 = arith.constant 0.797884583 : f32
    %105 = vector.broadcast %cst_42 : f32 to vector<8x128xf32>
    %106 = arith.mulf %105, %104 : vector<8x128xf32>
    %107 = math.tanh %106 : vector<8x128xf32>
    %cst_43 = arith.constant 1.000000e+00 : f32
    %108 = vector.broadcast %cst_43 : f32 to vector<8x128xf32>
    %109 = arith.addf %108, %107 : vector<8x128xf32>
    %110 = arith.mulf %99, %109 : vector<8x128xf32>
    %111 = arith.truncf %110 : vector<8x128xf32> to vector<8x128xbf16>
    %c0_44 = arith.constant 0 : index
    %c0_45 = arith.constant 0 : index
    %112 = vector.load %arg11[%c0_44, %c0_45] : memref<128x32xbf16, #tpu.memory_space<vmem>>, vector<128x32xbf16>
    %cst_46 = arith.constant dense<0.000000e+00> : vector<8x32xf32>
    %113 = tpu.matmul %111, %112, %cst_46 {dimension_numbers = #tpu.dot_dimension_numbers<[1], [0], [0], [1], [0, 0, 1, 1], [], []>} : vector<8x128xbf16>, vector<128x32xbf16>, vector<8x32xf32> -> vector<8x32xf32>
    %c0_47 = arith.constant 0 : index
    %c0_48 = arith.constant 0 : index
    %114 = vector.load %arg12[%c0_47, %c0_48] : memref<1x32xf32, #tpu.memory_space<vmem>>, vector<1x32xf32>
    %115 = vector.broadcast %114 : vector<1x32xf32> to vector<8x32xf32>
    %116 = arith.addf %113, %115 : vector<8x32xf32>
    %117 = vector.shape_cast %116 : vector<8x32xf32> to vector<1x8x32xf32>
    %118 = arith.addf %117, %70 : vector<1x8x32xf32>
    %119 = vector.shape_cast %118 : vector<1x8x32xf32> to vector<8x32xf32>
    %c0_49 = arith.constant 0 : index
    %c0_50 = arith.constant 0 : index
    %120 = vector.load %arg13[%c0_49, %c0_50] : memref<1x32xf32, #tpu.memory_space<vmem>>, vector<1x32xf32>
    %cst_51 = arith.constant dense<0.000000e+00> : vector<8xf32>
    %121 = vector.multi_reduction <add>, %119, %cst_51 [1] : vector<8x32xf32> to vector<8xf32>
    %122 = vector.shape_cast %121 : vector<8xf32> to vector<8x1xf32>
    %cst_52 = arith.constant 3.200000e+01 : f32
    %123 = vector.broadcast %cst_52 : f32 to vector<8x1xf32>
    %124 = arith.divf %122, %123 : vector<8x1xf32>
    %125 = vector.broadcast %124 : vector<8x1xf32> to vector<8x32xf32>
    %126 = arith.subf %119, %125 : vector<8x32xf32>
    %127 = arith.mulf %126, %126 : vector<8x32xf32>
    %cst_53 = arith.constant dense<0.000000e+00> : vector<8xf32>
    %128 = vector.multi_reduction <add>, %127, %cst_53 [1] : vector<8x32xf32> to vector<8xf32>
    %129 = vector.shape_cast %128 : vector<8xf32> to vector<8x1xf32>
    %cst_54 = arith.constant 3.200000e+01 : f32
    %130 = vector.broadcast %cst_54 : f32 to vector<8x1xf32>
    %131 = arith.divf %129, %130 : vector<8x1xf32>
    %cst_55 = arith.constant 9.99999974E-6 : f32
    %132 = vector.broadcast %cst_55 : f32 to vector<8x1xf32>
    %133 = arith.addf %131, %132 : vector<8x1xf32>
    %134 = math.rsqrt %133 : vector<8x1xf32>
    %135 = vector.broadcast %134 : vector<8x1xf32> to vector<8x32xf32>
    %136 = arith.mulf %126, %135 : vector<8x32xf32>
    %137 = vector.broadcast %120 : vector<1x32xf32> to vector<8x32xf32>
    %138 = arith.mulf %136, %137 : vector<8x32xf32>
    %139 = arith.truncf %138 : vector<8x32xf32> to vector<8x32xbf16>
    %c0_56 = arith.constant 0 : index
    %c0_57 = arith.constant 0 : index
    %140 = vector.load %arg14[%c0_56, %c0_57] : memref<32x16xbf16, #tpu.memory_space<vmem>>, vector<32x16xbf16>
    %cst_58 = arith.constant dense<0.000000e+00> : vector<8x16xf32>
    %141 = tpu.matmul %139, %140, %cst_58 {dimension_numbers = #tpu.dot_dimension_numbers<[1], [0], [0], [1], [0, 0, 1, 1], [], []>} : vector<8x32xbf16>, vector<32x16xbf16>, vector<8x16xf32> -> vector<8x16xf32>
    %c0_59 = arith.constant 0 : index
    %c0_60 = arith.constant 0 : index
    %142 = vector.load %arg15[%c0_59, %c0_60] : memref<1x16xf32, #tpu.memory_space<vmem>>, vector<1x16xf32>
    %143 = vector.broadcast %142 : vector<1x16xf32> to vector<8x16xf32>
    %144 = arith.addf %141, %143 : vector<8x16xf32>
    %145 = vector.shape_cast %144 : vector<8x16xf32> to vector<1x8x16xf32>
    %c0_61 = arith.constant 0 : index
    %c0_62 = arith.constant 0 : index
    %c0_63 = arith.constant 0 : index
    %146 = vector.load %arg16[%c0_61, %c0_62, %c0_63] : memref<1x8x16xf32, #tpu.memory_space<vmem>>, vector<1x8x16xf32>
    tpu.vector_store %arg16[%c0_61, %c0_62, %c0_63], %145 {strides = array<i32>} : memref<1x8x16xf32, #tpu.memory_space<vmem>>, vector<1x8x16xf32>,
    return
  }
  func.func @transform_0(%arg0: i32) -> (i32, i32, i32) {
    %c0_i32 = arith.constant 0 : i32
    %c0_i32_0 = arith.constant 0 : i32
    %c0_i32_1 = arith.constant 0 : i32
    return %arg0, %c0_i32, %c0_i32_0 : i32, i32, i32
  }
  func.func @transform_1(%arg0: i32) -> (i32, i32, i32) {
    %c0_i32 = arith.constant 0 : i32
    %c0_i32_0 = arith.constant 0 : i32
    %c0_i32_1 = arith.constant 0 : i32
    return %arg0, %c0_i32, %c0_i32_0 : i32, i32, i32
  }
  func.func @transform_2(%arg0: i32) -> (i32, i32) {
    %c0_i32 = arith.constant 0 : i32
    %c0_i32_0 = arith.constant 0 : i32
    %c0_i32_1 = arith.constant 0 : i32
    return %c0_i32, %c0_i32_0 : i32, i32
  }
  func.func @transform_3(%arg0: i32) -> (i32, i32) {
    %c0_i32 = arith.constant 0 : i32
    %c0_i32_0 = arith.constant 0 : i32
    %c0_i32_1 = arith.constant 0 : i32
    return %c0_i32, %c0_i32_0 : i32, i32
  }
  func.func @transform_4(%arg0: i32) -> (i32, i32) {
    %c0_i32 = arith.constant 0 : i32
    %c0_i32_0 = arith.constant 0 : i32
    %c0_i32_1 = arith.constant 0 : i32
    return %c0_i32, %c0_i32_0 : i32, i32
  }
  func.func @transform_5(%arg0: i32) -> (i32, i32) {
    %c0_i32 = arith.constant 0 : i32
    %c0_i32_0 = arith.constant 0 : i32
    %c0_i32_1 = arith.constant 0 : i32
    return %c0_i32, %c0_i32_0 : i32, i32
  }
  func.func @transform_6(%arg0: i32) -> (i32, i32) {
    %c0_i32 = arith.constant 0 : i32
    %c0_i32_0 = arith.constant 0 : i32
    %c0_i32_1 = arith.constant 0 : i32
    return %c0_i32, %c0_i32_0 : i32, i32
  }
  func.func @transform_7(%arg0: i32) -> (i32, i32) {
    %c0_i32 = arith.constant 0 : i32
    %c0_i32_0 = arith.constant 0 : i32
    %c0_i32_1 = arith.constant 0 : i32
    return %c0_i32, %c0_i32_0 : i32, i32
  }
  func.func @transform_8(%arg0: i32) -> (i32, i32) {
    %c0_i32 = arith.constant 0 : i32
    %c0_i32_0 = arith.constant 0 : i32
    %c0_i32_1 = arith.constant 0 : i32
    return %c0_i32, %c0_i32_0 : i32, i32
  }
  func.func @transform_9(%arg0: i32) -> (i32, i32) {
    %c0_i32 = arith.constant 0 : i32
    %c0_i32_0 = arith.constant 0 : i32
    %c0_i32_1 = arith.constant 0 : i32
    return %c0_i32, %c0_i32_0 : i32, i32
  }
  func.func @transform_10(%arg0: i32) -> (i32, i32) {
    %c0_i32 = arith.constant 0 : i32
    %c0_i32_0 = arith.constant 0 : i32
    %c0_i32_1 = arith.constant 0 : i32
    return %c0_i32, %c0_i32_0 : i32, i32
  }
  func.func @transform_11(%arg0: i32) -> (i32, i32) {
    %c0_i32 = arith.constant 0 : i32
    %c0_i32_0 = arith.constant 0 : i32
    %c0_i32_1 = arith.constant 0 : i32
    return %c0_i32, %c0_i32_0 : i32, i32
  }
  func.func @transform_12(%arg0: i32) -> (i32, i32) {
    %c0_i32 = arith.constant 0 : i32
    %c0_i32_0 = arith.constant 0 : i32
    %c0_i32_1 = arith.constant 0 : i32
    return %c0_i32, %c0_i32_0 : i32, i32
  }
  func.func @transform_13(%arg0: i32) -> (i32, i32) {
    %c0_i32 = arith.constant 0 : i32
    %c0_i32_0 = arith.constant 0 : i32
    %c0_i32_1 = arith.constant 0 : i32
    return %c0_i32, %c0_i32_0 : i32, i32
  }
  func.func @transform_14(%arg0: i32) -> (i32, i32) {
    %c0_i32 = arith.constant 0 : i32
    %c0_i32_0 = arith.constant 0 : i32
    %c0_i32_1 = arith.constant 0 : i32
    return %c0_i32, %c0_i32_0 : i32, i32
  }
  func.func @transform_15(%arg0: i32) -> (i32, i32, i32) {
    %c0_i32 = arith.constant 0 : i32
    %c0_i32_0 = arith.constant 0 : i32
    %c0_i32_1 = arith.constant 0 : i32
    return %arg0, %c0_i32, %c0_i32_0 : i32, i32, i32
  }
  func.func @transform_16(%arg0: i32) -> (i32, i32, i32) {
    %c0_i32 = arith.constant 0 : i32
    %c0_i32_0 = arith.constant 0 : i32
    %c0_i32_1 = arith.constant 0 : i32
    return %arg0, %c0_i32, %c0_i32_0 : i32, i32, i32
  }
}

</mosaic_0001>

<bundles_post_ra>
// kernel: pallas_forward.3
= control target key start
LH: loop header
LB: loop body
LE: loop exit
PB: predicated region body
PF: predicated region fallthrough
CT: control target
= control target key end

     0   :  { %s1754_s18 = smov 0   ;;  %s2015_s0 = inlined_call_operand.vmem [shape: f32[2,8,16], index: 0, kind: input, shape index: {}]   ;;  %s2016_s1 = inlined_call_operand.vmem [shape: f32[2,2,160], index: 1, kind: input, shape index: {}]   ;;  %s2017_s2 = inlined_call_operand.vmem [shape: bf16[16,32], index: 2, kind: input, shape index: {}]   ;;  %s2018_s3 = inlined_call_operand.vmem [shape: f32[1,32], index: 3, kind: input, shape index: {}]   ;;  %s2019_s4 = inlined_call_operand.vmem [shape: f32[1,32], index: 4, kind: input, shape index: {}]   ;;  %s2020_s5 = inlined_call_operand.vmem [shape: bf16[96,128], index: 5, kind: input, shape index: {}]   ;;  %s2021_s6 = inlined_call_operand.vmem [shape: f32[1,128], index: 6, kind: input, shape index: {}]   ;;  %s2022_s7 = inlined_call_operand.vmem [shape: bf16[384,32], index: 7, kind: input, shape index: {}]   ;;  %s2023_s8 = inlined_call_operand.vmem [shape: f32[1,32], index: 8, kind: input, shape index: {}]   ;;  %s2024_s9 = inlined_call_operand.vmem [shape: f32[1,32], index: 9, kind: input, shape index: {}]   ;;  %s2025_s10 = inlined_call_operand.vmem [shape: bf16[32,128], index: 10, kind: input, shape index: {}]   ;;  %s2026_s11 = inlined_call_operand.vmem [shape: f32[1,128], index: 11, kind: input, shape index: {}]   ;;  %s2027_s12 = inlined_call_operand.vmem [shape: bf16[128,32], index: 12, kind: input, shape index: {}]   ;;  %s2028_s13 = inlined_call_operand.vmem [shape: f32[1,32], index: 13, kind: input, shape index: {}]   ;;  %s2029_s14 = inlined_call_operand.vmem [shape: f32[2,8,32], index: 14, kind: output, shape index: {0}]   ;;  %s2030_s15 = inlined_call_operand.vmem [shape: f32[2,2,160], index: 15, kind: output, shape index: {1}]  }
   0x1 LB: > { %s1409_s19 = sadd.s32 4294967295, %s1666_s18   ;;  %p1413_p0 = scmp.ge.s32.totalorder %s1666_s18, 1  ;;  %s1666_s18 = sphi %s1754_s18, %s26_s18  }
   0x2   : > { %p449_p1 = scmp.lt.s32.totalorder %s1666_s18, 3 }
   0x4   : > { %p450_p2 = pnand %p1413_p0, %p449_p1 }
   0x5   : > { %v1611_v0 = vld [vmem:[%s2017_s2] sm:$0xff] (!%p450_p2)   ;;  %v1668_v1 = vmov (!%p450_p2), 0.0   ;;  %p505_p3 = scmp.lt.s32.totalorder (!%p450_p2), %s1409_s19, 1  ;;  %vm1669_vm0 = vmmov (!%p450_p2), 0   ;;  %vm541_vm1 = vcmask (!%p450_p2), 130048   ;;  %vm587_vm2 = vcmask (!%p450_p2), 261120  }
   0x6   : > { %453 = sbr.rel (%p450_p2) target bundleno = 2157 (0x86d), region = 76  ;;  %1527 = vmatprep.subr.bf16.mxu0 (!%p450_p2), %v1668_v1  ;;  %1533 = vmatprep.subr.bf16.mxu1 (!%p450_p2), %v1668_v1  ;;  %v1420_v4 = vld [vmem:[%s2018_s3] ss:$0 sm:$0xff] (!%p450_p2)  ;;  %v1613_v17 = vld [vmem:[%s2020_s5 + $0x8] sm:$0xff] (!%p450_p2)   ;;  %v1614_v18 = vld [vmem:[%s2020_s5 + $0x10] sm:$0xff] (!%p450_p2)   ;;  %vm613_vm3 = vcmask (!%p450_p2), 1040384  }
   0x7   : > { %1528 = vmatpush3.bf16.msra.mxu0 (!%p450_p2), %v1611_v0  ;;  %1529 = vmatprep.mubr.msk.bf16.mxu0 (!%p450_p2), %vm1669_vm0, %v1668_v1  ;;  %v1612_v16 = vld [vmem:[%s2020_s5] sm:$0xff] (!%p450_p2)   ;;  %v1615_v19 = vld [vmem:[%s2020_s5 + $0x18] sm:$0xff] (!%p450_p2)   ;;  %v1617_v29 = vld [vmem:[%s2020_s5 + $0x28] sm:$0xff] (!%p450_p2)   ;;  %s1670_s21 = smov (!%p450_p2), 32   ;;  %s1671_s23 = smov (!%p450_p2), 64   ;;  %vm631_vm4 = vcmask (!%p450_p2), 523264  }
   0x8   : > { %1545 = vmatprep.mubr.msk.bf16.mxu1 (!%p450_p2), %vm1669_vm0, %v1668_v1  ;;  %1534 = vmatpush3.bf16.msra.mxu1 (!%p450_p2), %v1612_v16  ;;  %v1616_v20 = vld [vmem:[%s2020_s5 + $0x20] sm:$0xff] (!%p450_p2)   ;;  %vm689_vm5 = vcmask (!%p450_p2), 785408   ;;  %v1620_v62 = vld [vmem:[%s2022_s7 + $0x48] sm:$0xff] (!%p450_p2)   ;;  %s1673_s20 = smov (!%p450_p2), 96   ;;  %vm757_vm6 = vcmask (!%p450_p2), 1041408   ;;  %vm758_vm7 = vcmask (!%p450_p2), 257026  }
   0x9   : > { %1535 = vmatprep.subr.bf16.mxu1 (!%p450_p2), %v1668_v1  ;;  %v1423_v25 = vld [vmem:[%s2019_s4] ss:$0 sm:$0xff] (!%p450_p2)  ;;  %v1622_v0 = vld [vmem:[%s2022_s7 + $0x8] sm:$0xff] (!%p450_p2)   ;;  %vm759_vm8 = vmor (!%p450_p2), %vm758_vm7, %vm757_vm6 }
   0xa   : > { %v1424_v43 = vld [vmem:[%s2021_s6] ss:$0 sm:$0xff] (!%p450_p2) }
   0xb   : > { %v1618_v60 = vld [vmem:[%s2022_s7 + $0x40] sm:$0xff] (!%p450_p2)  }
   0xc   : > { %1536 = vmatpush3.bf16.msra.mxu1 (!%p450_p2), %v1613_v17  ;;  %v1619_v61 = vld [vmem:[%s2022_s7] sm:$0xff] (!%p450_p2)   ;;  %1484 = vmatprep.subr.bf16.mxu0 (!%p450_p2), %v1618_v60 }
   0xd   : > { %s2032_s19 = smov (!%p505_p3, %s1409_s19), 1  ;;  %1537 = vmatprep.subr.bf16.mxu1 %v1668_v1  ;;  %v1621_v63 = vld [vmem:[%s2022_s7 + $0x80] sm:$0xff]  }
   0xe   : > { %s1414_s22 = sshll.u32 %s2032_s19, 3  ;;  %s1473_s26 = sshll.u32 %s2032_s19, 2  ;;  %v1631_v16 = vld [vmem:[%s2022_s7 + $0x20] sm:$0xff]  }
   0xf   : > { %s508_s25 = scalar_lea.vmem %s2015_s0, %s1414_s22  ;;  %s513_s29 = scalar_lea.vmem %s2016_s1, %s1473_s26 }
  0x10   : > { %v524_v2 = vld [vmem:[%s508_s25] sm:$0xff]  ;;  %1538 = vmatpush3.bf16.msra.mxu1 %v1614_v18 }
  0x11   : > { %v525_v3 = vpack.c.bf16 %v524_v2, %v524_v2  ;;  %1539 = vmatprep.subr.bf16.mxu1 %v1668_v1  ;;  %v1817_v27 = vld [vmem:[%s513_s29] sm:$0xf]  ;;  %v1624_v2 = vld [vmem:[%s2022_s7 + $0x88] sm:$0xff]   ;;  %s522_s29 = scalar_lea.vmem %s2030_s15, %s1473_s26 }
  0x12   : > { %v609_v30 = vpack.c.bf16 %v1817_v27, %v1817_v27 }
  0x13   : > { %1530 = vmatmul.mubr.msk.bf16.vlgmr.msra.gmra.mrb[0].mxu0 %vm541_vm1, %v525_v3  ;;  %v1623_v3 = vld [vmem:[%s2022_s7 + $0x50] sm:$0xff]  }
  0x14   : > { %1540 = vmatpush3.bf16.msra.mxu1 %v1615_v19  ;;  %1485 = vmatpush3.bf16.msra.mxu0 %v1619_v61  ;;  %v1632_v19 = vld [vmem:[%s2022_s7 + $0x68] sm:$0xff]  }
  0x15   : > { %1541 = vmatprep.subr.bf16.mxu1 %v1668_v1  ;;  %1486 = vmatprep.subr.bf16.mxu0 %v1620_v62 }
  0x18   : > { %1542 = vmatpush3.bf16.msra.mxu1 %v1616_v20  ;;  %1487 = vmatpush3.bf16.msra.mxu0 %v1622_v0  ;;  %v1633_v20 = vld [vmem:[%s2022_s7 + $0xa0] sm:$0xff]  }
  0x19   : > { %1543 = vmatprep.subr.bf16.mxu1 %v1668_v1  ;;  %1488 = vmatprep.subr.bf16.mxu0 %v1623_v3 }
  0x1c   : > { %1544 = vmatpush3.bf16.msra.mxu1 %v1617_v29  ;;  %v1638_v29 = vld [vmem:[%s2022_s7 + $0x78] sm:$0xff]  }
  0x1d   : > { %1549 = vmatprep.subr.bf16.mxu1 %v1668_v1 }
  0xe6   : > { %v579_v5 = vpop.f32.mrb[0].mxu0 }
  0xe7   : > { %v1782_v6 = vadd.f32 %v1420_v4, %v579_v5  ;;  %v1531_v7 = vpop.f32.mrb[1].mxu0  ;;  %v1625_v4 = vld [vmem:[%s2022_s7 + $0x10] sm:$0xff]  }
  0xe8   : > { %v582_v8 = vpop.f32.mrb[2].mxu0  ;;  %v1627_v5 = vld [vmem:[%s2022_s7 + $0x90] sm:$0xff]   ;;  %v1626_v7 = vld [vmem:[%s2022_s7 + $0x58] sm:$0xff]   ;;  %1489 = vmatpush3.bf16.msra.mxu0 %v1625_v4 }
  0xe9   : > { %v1532_v9 = vpop.f32.mrb[3].mxu0  ;;  %v588_v10 = vsel %vm587_vm2, %v1782_v6, 0.0  ;;  %v1628_v8 = vld [vmem:[%s2022_s7 + $0x18] sm:$0xff]   ;;  %1490 = vmatprep.subr.bf16.mxu0 %v1626_v7 }
  0xea   : > { %589 = vadd.xlane.f32.xlu0 %v588_v10  ;;  %v1672_v9 = vmov 1983009808  }
  0xeb   : > { %v749_v10 = vunpack.c.l.s4 %v1672_v9 }
  0xec   : > { %1491 = vmatpush3.bf16.msra.mxu0 %v1628_v8 }
 0x177   : > { %v590_v11 = vpop.xlane.xlu0 %589 }
 0x178   : > { %v592_v12 = vmul.f32 0.03125, %v590_v11  ;;  %v751_v11 = vlaneseq }
 0x17a   : > { %v593_v13 = vsub.f32 %v1782_v6, %v592_v12  ;;  %v750_v12 = vunpack.c.0.s8 %v749_v10 }
 0x17c   : > { %v594_v14 = vmul.f32 %v593_v13, %v593_v13 }
 0x17e   : > { %v595_v15 = vsel %vm587_vm2, %v594_v14, 0.0  ;;  %v1629_v14 = vld [vmem:[%s2022_s7 + $0x60] sm:$0xff]  }
 0x17f   : > { %596 = vadd.xlane.f32.xlu0 %v595_v15  ;;  %v1630_v15 = vld [vmem:[%s2022_s7 + $0x98] sm:$0xff]   ;;  %1492 = vmatprep.subr.bf16.mxu0 %v1629_v14 }
 0x180   : > { %1493 = vmatpush3.bf16.msra.mxu0 %v1631_v16  ;;  %v1643_v16 = vld [vmem:[%s2025_s10 + $0x8] sm:$0xff]  }
 0x181   : > { %1494 = vmatprep.subr.bf16.mxu0 %v1632_v19 }
 0x20c   : > { %v597_v21 = vpop.xlane.xlu0 %596 }
 0x20d   : > { %v598_v22 = vmul.f32 0.03125, %v597_v21  ;;  %v1634_v21 = vld [vmem:[%s2022_s7 + $0x28] sm:$0xff]  }
 0x20e   : > { %1495 = vmatpush3.bf16.msra.mxu0 %v1634_v21 }
 0x20f   : > { %v599_v23 = vadd.f32 1e-05, %v598_v22  ;;  %v1635_v22 = vld [vmem:[%s2022_s7 + $0x70] sm:$0xff]  }
 0x210   : > { %1496 = vmatprep.subr.bf16.mxu0 %v1635_v22  ;;  %v1457_v22 = vld [vmem:[%s2024_s9] ss:$0 sm:$0xff] }
 0x211   : > { %1652 = vrsqrt.f32 %v599_v23  ;;  %v1636_v23 = vld [vmem:[%s2022_s7 + $0xa8] sm:$0xff]  }
 0x21b   : > { %v1653_v24 = vpop.eup %1652 }
 0x21c   : > { %v601_v26 = vmul.f32 %v1653_v24, %v593_v13  ;;  %v752_v13 = vshrl.u32 %v751_v11, 7  ;;  %v1637_v24 = vld [vmem:[%s2022_s7 + $0x30] sm:$0xff]  }
 0x21d   : > { %1497 = vmatpush3.bf16.msra.mxu0 %v1637_v24 }
 0x21e   : > { %v1819_v28 = vmul.f32 %v1423_v25, %v601_v26  ;;  %v1888_v17 = vsub.s32 %v750_v12, %v752_v13  ;;  %1498 = vmatprep.subr.bf16.mxu0 %v1638_v29  ;;  %v1647_v29 = vld [vmem:[%s2027_s12 + $0x18] sm:$0xff]  }
 0x220   : > { %v610_v31 = vpack.c.bf16 %v1819_v28, %v1819_v28  ;;  %v768_v18 = vrot.slane %v1817_v27, %v1888_v17 }
 0x222   : > { %v612_v32 = vrot.slane %v610_v31, 7  ;;  %v769_v25 = vcombine.high %v768_v18, %v768_v18  ;;  %v772_v26 = vpack.c.bf16 %v768_v18, %v768_v18  ;;  %v1640_v31 = vld [vmem:[%s2022_s7 + $0x38] sm:$0xff]  }
 0x223   : > { %1499 = vmatpush3.bf16.msra.mxu0 %v1640_v31  ;;  %v1649_v31 = vld [vmem:[%s2027_s12 + $0x28] sm:$0xff]  }
 0x224   : > { %v616_v33 = vsel %vm613_vm3, %v609_v30, %v612_v32  ;;  %v1639_v30 = vld [vmem:[%s2022_s7 + $0xb0] sm:$0xff]   ;;  %v773_v32 = vpack.c.bf16 %v769_v25, %v769_v25  ;;  %1577 = vmatprep.subr.bf16.mxu0 %v1668_v1 }
 0x225   : > { %v619_v34 = vshll.u32 %v616_v33, 16  ;;  %v617_v35 = vshrl.u32 %v616_v33, 16  ;;  %v626_v38 = vrot.slane %v616_v33, 1 }
 0x227   : > { %v621_v36 = vrot.slane %v619_v34, 1 }
 0x229   : > { %v622_v37 = vor.u32 %v621_v36, %v617_v35  ;;  %v1641_v36 = vld [vmem:[%s2022_s7 + $0xb8] sm:$0xff]  }
 0x22b   : > { %623 = vrot.lane.b32.xlu1 %v622_v37, %s1670_s21 }
 0x22f   : > { %627 = vrot.lane.b32.xlu1 %v626_v38, %s1671_s23  ;;  %s517_s23 = scalar_lea.vmem %s2029_s14, %s1414_s22 }
 0x29d   : > { %v624_v39 = vpop.permute.xlu1 %623 }
 0x29e   : > { %v630_v40 = vsel %vm587_vm2, %v616_v33, %v624_v39 }
 0x2a1   : > { %v628_v41 = vpop.permute.xlu1 %627 }
 0x2a2   : > { %v633_v42 = vsel %vm631_vm4, %v630_v40, %v628_v41 }
 0x2a3   : > { %1546 = vmatmul.mubr.msk.bf16.vlgmr.msra.gmra.mrb[0].mxu1 %vm689_vm5, %v633_v42 }
 0x2a4   : > { %1565 = vmatprep.mubr.msk.bf16.mxu1 %vm1669_vm0, %v1668_v1  ;;  %1550 = vmatpush3.bf16.msra.mxu1 %v1621_v63 }
 0x2a5   : > { %1551 = vmatprep.subr.bf16.mxu1 %v1668_v1 }
 0x2a8   : > { %1552 = vmatpush3.bf16.msra.mxu1 %v1624_v2 }
 0x2a9   : > { %1553 = vmatprep.subr.bf16.mxu1 %v1668_v1 }
 0x2ac   : > { %1554 = vmatpush3.bf16.msra.mxu1 %v1627_v5 }
 0x2ad   : > { %1555 = vmatprep.subr.bf16.mxu1 %v1668_v1 }
 0x2b0   : > { %1556 = vmatpush3.bf16.msra.mxu1 %v1630_v15 }
 0x2b1   : > { %1557 = vmatprep.subr.bf16.mxu1 %v1668_v1 }
 0x2b4   : > { %1558 = vmatpush3.bf16.msra.mxu1 %v1633_v20 }
 0x2b5   : > { %1559 = vmatprep.subr.bf16.mxu1 %v1668_v1 }
 0x2b8   : > { %1560 = vmatpush3.bf16.msra.mxu1 %v1636_v23 }
 0x2b9   : > { %1561 = vmatprep.subr.bf16.mxu1 %v1668_v1 }
 0x2bc   : > { %1562 = vmatpush3.bf16.msra.mxu1 %v1639_v30  ;;  %v1648_v30 = vld [vmem:[%s2027_s12 + $0x20] sm:$0xff]  }
 0x2bd   : > { %1563 = vmatprep.subr.bf16.mxu1 %v1668_v1 }
 0x2c0   : > { %1564 = vmatpush3.bf16.msra.mxu1 %v1641_v36 }
 0x2c1   : > { %1569 = vmatprep.subr.bf16.mxu1 %v1668_v1 }
 0x376   : > { %v726_v44 = vpop.f32.mrb[0].mxu1 }
 0x377   : > { %v727_v45 = vadd.f32 %v1424_v43, %v726_v44  ;;  %v1547_v46 = vpop.f32.mrb[1].mxu1 }
 0x378   : > { %v729_v47 = vpop.f32.mrb[2].mxu1 }
 0x379   : > { %v733_v48 = vmul.f32 0.044715, %v727_v45  ;;  %v1548_v49 = vpop.f32.mrb[3].mxu1  ;;  %v732_v55 = vmul.f32 0.5, %v727_v45 }
 0x37b   : > { %v734_v50 = vmul.f32 %v733_v48, %v727_v45 }
 0x37d   : > { %v735_v51 = vmul.f32 %v734_v50, %v727_v45 }
 0x37f   : > { %v736_v52 = vadd.f32 %v735_v51, %v727_v45 }
 0x381   : > { %v737_v53 = vmul.f32 0.7978846, %v736_v52 }
 0x383   : > { %1654 = vtanh.f32 %v737_v53 }
 0x38d   : > { %v1655_v54 = vpop.eup %1654 }
 0x38e   : > { %v739_v56 = vadd.f32 1.0, %v1655_v54 }
 0x390   : > { %v1838_v57 = vmul.f32 %v739_v56, %v732_v55 }
 0x392   : > { %v774_v58 = vpack.c.bf16 %v1838_v57, %v1838_v57 }
 0x394   : > { %v776_v59 = vrot.slane %v774_v58, 7  ;;  %v1432_v58 = vld [vmem:[%s2023_s8] ss:$0 sm:$0xff] }
 0x395   : > { %v826_v63 = vadd.f32 %v1432_v58, %v1782_v6 }
 0x396   : > { %777 = vrot.lane.b32.xlu0 %v776_v59, %s1670_s21 }
 0x408   : > { %v778_v27 = vpop.permute.xlu0 %777 }
 0x409   : > { %v781_v33 = vsel %vm613_vm3, %v772_v26, %v778_v27  ;;  %v783_v35 = vsel %vm613_vm3, %v773_v32, %v778_v27  ;;  %v1645_v26 = vld [vmem:[%s2027_s12 + $0x8] sm:$0xff]   ;;  %v1646_v27 = vld [vmem:[%s2027_s12 + $0x10] sm:$0xff]  }
 0x40a   : > { %786 = vrot.lane.b32.xlu1 %v781_v33, %s1673_s20  ;;  %v795_v34 = vshll.u32 %v781_v33, 16  ;;  %v801_v37 = vshll.u32 %v783_v35, 16  ;;  %v811_v38 = vrot.slane %v781_v33, 1  ;;  %v793_v40 = vshrl.u32 %v781_v33, 16  ;;  %v1650_v32 = vld [vmem:[%s2027_s12 + $0x30] sm:$0xff]   ;;  %v1651_v33 = vld [vmem:[%s2027_s12 + $0x38] sm:$0xff]  }
 0x40b   : > { %v799_v43 = vshrl.u32 %v783_v35, 16  ;;  %v812_v45 = vrot.slane %v783_v35, 1 }
 0x40c   : > { %v797_v39 = vrot.slane %v795_v34, 1  ;;  %v803_v42 = vrot.slane %v801_v37, 1  ;;  %v1458_v34 = vld [vmem:[%s2026_s11] ss:$0 sm:$0xff] }
 0x40e   : > { %788 = vrot.lane.b32.xlu1 %v783_v35, %s1673_s20  ;;  %v798_v41 = vor.u32 %v797_v39, %v793_v40  ;;  %v804_v44 = vor.u32 %v803_v42, %v799_v43 }
 0x412   : > { %813 = vrot.lane.b32.xlu1 %v811_v38, %s1673_s20 }
 0x416   : > { %805 = vrot.lane.b32.xlu1 %v798_v41, %s1673_s20 }
 0x41a   : > { %807 = vrot.lane.b32.xlu1 %v804_v44, %s1673_s20 }
 0x41e   : > { %815 = vrot.lane.b32.xlu1 %v812_v45, %s1673_s20 }
 0x47c   : > { %v787_v46 = vpop.permute.xlu1 %786 }
 0x480   : > { %v789_v47 = vpop.permute.xlu1 %788 }
 0x481   : > { %v791_v52 = vsel %vm689_vm5, %v787_v46, %v789_v47 }
 0x484   : > { %v814_v48 = vpop.permute.xlu1 %813 }
 0x488   : > { %v806_v49 = vpop.permute.xlu1 %805 }
 0x48c   : > { %v808_v50 = vpop.permute.xlu1 %807 }
 0x48d   : > { %v809_v51 = vsel %vm689_vm5, %v806_v49, %v808_v50  ;;  %v1462_v49 = vld [vmem:[%s2028_s13] ss:$0 sm:$0xff] }
 0x48e   : > { %1051 = vmatprep.mubr.bf16.mxu0 %v809_v51 }
 0x48f   : > { %1052 = vmatmul.mubr.bf16.vlgmr.msra.gmra.mrb[4].mxu0 %v791_v52 }
 0x490   : > { %v816_v53 = vpop.permute.xlu1 %815  ;;  %1593 = vmatprep.mubr.msk.bf16.mxu0 %vm1669_vm0, %v1668_v1 }
 0x491   : > { %v817_v54 = vsel %vm689_vm5, %v814_v48, %v816_v53 }
 0x492   : > { %1566 = vmatmul.mubr.bf16.vlgmr.msra.gmra.mrb[4].mxu1 %v817_v54 }
 0x493   : > { %1573 = vmatprep.mubr.msk.bf16.mxu1 %vm1669_vm0, %v1668_v1 }
 0x562   : > { %v1500_v55 = vpop.f32.mrb[4].mxu0 }
 0x563   : > { %v1501_v56 = vpop.f32.mrb[5].mxu0 }
 0x564   : > { %v1502_v59 = vadd.f32 %v1501_v56, %v1500_v55  ;;  %v1503_v60 = vpop.f32.mrb[6].mxu0 }
 0x565   : > { %v1504_v61 = vpop.f32.mrb[7].mxu0  ;;  %v1093_v62 = vpop.f32.mrb[4].mxu1 }
 0x566   : > { %v1094_v0 = vadd.f32 %v1502_v59, %v1093_v62  ;;  %v1567_v2 = vpop.f32.mrb[5].mxu1 }
 0x567   : > { %v1096_v3 = vpop.f32.mrb[6].mxu1 }
 0x568   : > { %v1941_v4 = vadd.f32 %v1094_v0, %v826_v63  ;;  %v1568_v5 = vpop.f32.mrb[7].mxu1 }
 0x56a   : > { %v1101_v7 = vsel %vm587_vm2, %v1941_v4, 0.0 }
 0x56b   : > { %1102 = vadd.xlane.f32.xlu0 %v1101_v7 }
 0x581   : > { %742 = vrot.lane.b32.xlu0 %v1838_v57, %s1670_s21 }
 0x5f8   : > { %v1103_v8 = vpop.xlane.xlu0 %1102 }
 0x5f9   : > { %v1104_v9 = vmul.f32 0.03125, %v1103_v8 }
 0x5fb   : > { %v1105_v10 = vsub.f32 %v1941_v4, %v1104_v9 }
 0x5fc   : > { %v743_v11 = vpop.permute.xlu0 %742 }
 0x5fd   : > { %v745_v6 = vsel %vm587_vm2, %v1819_v28, %v743_v11  ;;  %v1106_v12 = vmul.f32 %v1105_v10, %v1105_v10  ;;  %v1642_v28 = vld [vmem:[%s2025_s10] sm:$0xff]  }
 0x5fe   : > { %v747_v13 = vcombine.high %v745_v6, %v743_v11  ;;  %1570 = vmatpush3.bf16.msra.mxu1 %v1642_v28 }
 0x5ff   : > { %v1107_v14 = vsel %vm587_vm2, %v1106_v12, 0.0  ;;  %1571 = vmatprep.subr.bf16.mxu1 %v1668_v1 }
 0x600   : > { %v754_v15 = vrot.slane %v747_v13, %v1888_v17  ;;  %1108 = vadd.xlane.f32.xlu1 %v1107_v14  ;;  %v1644_v17 = vld [vmem:[%s2027_s12] sm:$0xff]  }
 0x601   : > { %1578 = vmatpush3.bf16.msra.mxu0 %v1644_v17 }
 0x602   : > { %v755_v57 = vcombine.high %v754_v15, %v754_v15  ;;  %1572 = vmatpush3.bf16.msra.mxu1 %v1643_v16  ;;  %1579 = vmatprep.subr.bf16.mxu0 %v1668_v1 }
 0x604   : > { %760 = vst.msk [vmem:[%s522_s29] sm:$0xf] %vm759_vm8, %v755_v57 }
 0x605   : > { %1580 = vmatpush3.bf16.msra.mxu0 %v1645_v26 }
 0x606   : > { %1581 = vmatprep.subr.bf16.mxu0 %v1668_v1 }
 0x609   : > { %1582 = vmatpush3.bf16.msra.mxu0 %v1646_v27 }
 0x60a   : > { %1583 = vmatprep.subr.bf16.mxu0 %v1668_v1 }
 0x60d   : > { %1584 = vmatpush3.bf16.msra.mxu0 %v1647_v29 }
 0x60e   : > { %1585 = vmatprep.subr.bf16.mxu0 %v1668_v1 }
 0x611   : > { %1586 = vmatpush3.bf16.msra.mxu0 %v1648_v30 }
 0x612   : > { %1587 = vmatprep.subr.bf16.mxu0 %v1668_v1 }
 0x615   : > { %1588 = vmatpush3.bf16.msra.mxu0 %v1649_v31 }
 0x616   : > { %1589 = vmatprep.subr.bf16.mxu0 %v1668_v1 }
 0x619   : > { %1590 = vmatpush3.bf16.msra.mxu0 %v1650_v32 }
 0x61a   : > { %1591 = vmatprep.subr.bf16.mxu0 %v1668_v1 }
 0x61d   : > { %1592 = vmatpush3.bf16.msra.mxu0 %v1651_v33 }
 0x68d   : > { %v1109_v18 = vpop.xlane.xlu1 %1108 }
 0x68e   : > { %v1110_v19 = vmul.f32 0.03125, %v1109_v18 }
 0x690   : > { %v1111_v20 = vadd.f32 1e-05, %v1110_v19 }
 0x692   : > { %1656 = vrsqrt.f32 %v1111_v20 }
 0x69c   : > { %v1657_v21 = vpop.eup %1656 }
 0x69d   : > { %v1113_v23 = vmul.f32 %v1657_v21, %v1105_v10 }
 0x69f   : > { %v1120_v24 = vmul.f32 %v1457_v22, %v1113_v23 }
 0x6a1   : > { %v1121_v25 = vpack.c.bf16 %v1120_v24, %v1120_v24 }
 0x6a3   : > { %1574 = vmatmul.mubr.msk.bf16.vlgmr.msra.gmra.mrb[8].mxu1 %vm587_vm2, %v1121_v25 }
 0x776   : > { %v1182_v35 = vpop.f32.mrb[8].mxu1 }
 0x777   : > { %v1183_v36 = vadd.f32 %v1458_v34, %v1182_v35  ;;  %v1575_v37 = vpop.f32.mrb[9].mxu1 }
 0x778   : > { %v1185_v38 = vpop.f32.mrb[10].mxu1 }
 0x779   : > { %v1189_v39 = vmul.f32 0.044715, %v1183_v36  ;;  %v1576_v40 = vpop.f32.mrb[11].mxu1  ;;  %v1188_v46 = vmul.f32 0.5, %v1183_v36 }
 0x77b   : > { %v1190_v41 = vmul.f32 %v1189_v39, %v1183_v36 }
 0x77d   : > { %v1191_v42 = vmul.f32 %v1190_v41, %v1183_v36 }
 0x77f   : > { %v1192_v43 = vadd.f32 %v1191_v42, %v1183_v36 }
 0x781   : > { %v1193_v44 = vmul.f32 0.7978846, %v1192_v43 }
 0x783   : > { %1658 = vtanh.f32 %v1193_v44 }
 0x78d   : > { %v1659_v45 = vpop.eup %1658 }
 0x78e   : > { %v1195_v1 = vadd.f32 1.0, %v1659_v45 }
 0x790   : > { %v1196_v47 = vmul.f32 %v1195_v1, %v1188_v46 }
 0x792   : > { %v1197_v48 = vpack.c.bf16 %v1196_v47, %v1196_v47 }
 0x794   : > { %1594 = vmatmul.mubr.bf16.vlgmr.msra.gmra.mrb[8].mxu0 %v1197_v48 }
 0x867   : > { %v1303_v50 = vpop.f32.mrb[8].mxu0 }
 0x868   : > { %v1304_v51 = vadd.f32 %v1462_v49, %v1303_v50  ;;  %v1595_v52 = vpop.f32.mrb[9].mxu0 }
 0x869   : > { %v1306_v53 = vpop.f32.mrb[10].mxu0 }
 0x86a   : > { %v1309_v54 = vadd.f32 %v1304_v51, %v1941_v4  ;;  %v1596_v55 = vpop.f32.mrb[11].mxu0 }
 0x86c   : > { %1310 = vst.msk [vmem:[%s517_s23] sm:$0xff] %vm587_vm2, %v1309_v54 }
 0x86d PF: > { %s26_s18 = sadd.s32 1, %s1666_s18  }
 0x86e   : > { %p23_p4 = scmp.ge.s32.totalorder %s26_s18, 4  }
 0x870   :  { %25 = sbr.rel (!%p23_p4) target bundleno = 1 (0x1), region = 121 }

// kernel: pallas_forward.4
= control target key start
LH: loop header
LB: loop body
LE: loop exit
PB: predicated region body
PF: predicated region fallthrough
CT: control target
= control target key end

     0   :  { %s1618_s25 = smov 0   ;;  %s1870_s0 = inlined_call_operand.vmem [shape: f32[2,8,32], index: 0, kind: input, shape index: {}]   ;;  %s1871_s1 = inlined_call_operand.vmem [shape: f32[2,2,160], index: 1, kind: input, shape index: {}]   ;;  %s1872_s2 = inlined_call_operand.vmem [shape: f32[1,32], index: 2, kind: input, shape index: {}]   ;;  %s1873_s3 = inlined_call_operand.vmem [shape: bf16[96,128], index: 3, kind: input, shape index: {}]   ;;  %s1874_s4 = inlined_call_operand.vmem [shape: f32[1,128], index: 4, kind: input, shape index: {}]   ;;  %s1875_s5 = inlined_call_operand.vmem [shape: bf16[384,32], index: 5, kind: input, shape index: {}]   ;;  %s1876_s6 = inlined_call_operand.vmem [shape: f32[1,32], index: 6, kind: input, shape index: {}]   ;;  %s1877_s7 = inlined_call_operand.vmem [shape: f32[1,32], index: 7, kind: input, shape index: {}]   ;;  %s1878_s8 = inlined_call_operand.vmem [shape: bf16[32,128], index: 8, kind: input, shape index: {}]   ;;  %s1879_s9 = inlined_call_operand.vmem [shape: f32[1,128], index: 9, kind: input, shape index: {}]   ;;  %s1880_s10 = inlined_call_operand.vmem [shape: bf16[128,32], index: 10, kind: input, shape index: {}]   ;;  %s1881_s11 = inlined_call_operand.vmem [shape: f32[1,32], index: 11, kind: input, shape index: {}]   ;;  %s1882_s12 = inlined_call_operand.vmem [shape: f32[2,8,32], index: 12, kind: output, shape index: {0}]   ;;  %s1883_s13 = inlined_call_operand.vmem [shape: f32[2,2,160], index: 13, kind: output, shape index: {1}]  }
   0x1 LB: > { %s1295_s26 = sadd.s32 4294967295, %s1540_s25   ;;  %p1299_p0 = scmp.ge.s32.totalorder %s1540_s25, 1  ;;  %s1540_s25 = sphi %s1618_s25, %s24_s25  }
   0x2   : > { %p399_p1 = scmp.lt.s32.totalorder %s1540_s25, 3 }
   0x4   : > { %p400_p2 = pnand %p1299_p0, %p399_p1 }
   0x5   : > { %p451_p3 = scmp.lt.s32.totalorder (!%p400_p2), %s1295_s26, 1  ;;  %vm473_vm0 = vcmask (!%p400_p2), 261120   ;;  %v1486_v7 = vld [vmem:[%s1873_s3] sm:$0xff] (!%p400_p2)   ;;  %v1542_v8 = vmov (!%p400_p2), 0.0   ;;  %v1487_v9 = vld [vmem:[%s1873_s3 + $0x8] sm:$0xff] (!%p400_p2)   ;;  %v1488_v10 = vld [vmem:[%s1873_s3 + $0x10] sm:$0xff] (!%p400_p2)  }
   0x6   : > { %403 = sbr.rel (%p400_p2) target bundleno = 1941 (0x795), region = 68  ;;  %1408 = vmatprep.subr.bf16.mxu0 (!%p400_p2), %v1542_v8  ;;  %v1489_v11 = vld [vmem:[%s1873_s3 + $0x18] sm:$0xff] (!%p400_p2)   ;;  %v1490_v12 = vld [vmem:[%s1873_s3 + $0x20] sm:$0xff] (!%p400_p2)   ;;  %v1491_v21 = vld [vmem:[%s1873_s3 + $0x28] sm:$0xff] (!%p400_p2)   ;;  %vm499_vm1 = vcmask (!%p400_p2), 1040384   ;;  %vm1543_vm2 = vmmov (!%p400_p2), 0  }
   0x7   : > { %1409 = vmatpush3.bf16.msra.mxu0 (!%p400_p2), %v1486_v7  ;;  %v1306_v17 = vld [vmem:[%s1872_s2] ss:$0 sm:$0xff] (!%p400_p2)  ;;  %1420 = vmatprep.mubr.msk.bf16.mxu0 (!%p400_p2), %vm1543_vm2, %v1542_v8  ;;  %s1544_s18 = smov (!%p400_p2), 32   ;;  %s1545_s19 = smov (!%p400_p2), 64   ;;  %vm517_vm3 = vcmask (!%p400_p2), 523264   ;;  %vm575_vm4 = vcmask (!%p400_p2), 785408  }
   0x8   : > { %1410 = vmatprep.subr.bf16.mxu0 (!%p400_p2), %v1542_v8  ;;  %v1307_v35 = vld [vmem:[%s1874_s4] ss:$0 sm:$0xff] (!%p400_p2)  ;;  %v1494_v54 = vld [vmem:[%s1875_s5 + $0x48] sm:$0xff] (!%p400_p2)   ;;  %v1497_v58 = vld [vmem:[%s1875_s5 + $0x50] sm:$0xff] (!%p400_p2)   ;;  %v1546_v63 = vmov (!%p400_p2), 1983009808  }
   0x9   : > { %v1492_v52 = vld [vmem:[%s1875_s5 + $0x40] sm:$0xff] (!%p400_p2)   ;;  %v1496_v56 = vld [vmem:[%s1875_s5 + $0x8] sm:$0xff] (!%p400_p2)   ;;  %v1499_v59 = vld [vmem:[%s1875_s5 + $0x10] sm:$0xff] (!%p400_p2)   ;;  %s1547_s20 = smov (!%p400_p2), 96   ;;  %vm643_vm5 = vcmask (!%p400_p2), 1041408   ;;  %vm644_vm6 = vcmask (!%p400_p2), 257026  }
   0xa   : > { %v1493_v53 = vld [vmem:[%s1875_s5] sm:$0xff] (!%p400_p2)   ;;  %1365 = vmatprep.subr.bf16.mxu1 (!%p400_p2), %v1492_v52  ;;  %v1498_v57 = vld [vmem:[%s1875_s5 + $0x88] sm:$0xff] (!%p400_p2)   ;;  %v1501_v60 = vld [vmem:[%s1875_s5 + $0x90] sm:$0xff] (!%p400_p2)  }
   0xb   : > { %1411 = vmatpush3.bf16.msra.mxu0 (!%p400_p2), %v1487_v9  ;;  %v1495_v55 = vld [vmem:[%s1875_s5 + $0x80] sm:$0xff] (!%p400_p2)   ;;  %1366 = vmatpush3.bf16.msra.mxu1 (!%p400_p2), %v1493_v53  ;;  %v1500_v61 = vld [vmem:[%s1875_s5 + $0x58] sm:$0xff] (!%p400_p2)   ;;  %vm645_vm7 = vmor (!%p400_p2), %vm644_vm6, %vm643_vm5 }
   0xc   : > { %1412 = vmatprep.subr.bf16.mxu0 (!%p400_p2), %v1542_v8  ;;  %1367 = vmatprep.subr.bf16.mxu1 (!%p400_p2), %v1494_v54  ;;  %v1502_v62 = vld [vmem:[%s1875_s5 + $0x18] sm:$0xff] (!%p400_p2)   ;;  %v1505_v7 = vld [vmem:[%s1875_s5 + $0x20] sm:$0xff] (!%p400_p2)  }
   0xd   : > { %s1885_s26 = smov (!%p451_p3, %s1295_s26), 1 }
   0xe   : > { %s1300_s27 = sshll.u32 %s1885_s26, 3  ;;  %s1356_s24 = sshll.u32 %s1885_s26, 2 }
   0xf   : > { %s454_s30 = scalar_lea.vmem %s1870_s0, %s1300_s27  ;;  %1413 = vmatpush3.bf16.msra.mxu0 %v1488_v10  ;;  %1368 = vmatpush3.bf16.msra.mxu1 %v1496_v56  ;;  %v1506_v10 = vld [vmem:[%s1875_s5 + $0x68] sm:$0xff]   ;;  %s463_s14 = scalar_lea.vmem %s1882_s12, %s1300_s27 }
  0x10   : > { %v1634_v0 = vld [vmem:[%s454_s30] sm:$0xff]  ;;  %1414 = vmatprep.subr.bf16.mxu0 %v1542_v8  ;;  %s459_s30 = scalar_lea.vmem %s1871_s1, %s1356_s24  ;;  %1369 = vmatprep.subr.bf16.mxu1 %v1497_v58 }
  0x11   : > { %v474_v1 = vsel %vm473_vm0, %v1634_v0, 0.0  ;;  %v1670_v19 = vld [vmem:[%s459_s30] sm:$0xf]  ;;  %s468_s30 = scalar_lea.vmem %s1883_s13, %s1356_s24 }
  0x12   : > { %475 = vadd.xlane.f32.xlu0 %v474_v1  ;;  %v495_v22 = vpack.c.bf16 %v1670_v19, %v1670_v19  ;;  %v635_v1 = vunpack.c.l.s4 %v1546_v63 }
  0x13   : > { %1415 = vmatpush3.bf16.msra.mxu0 %v1489_v11  ;;  %1370 = vmatpush3.bf16.msra.mxu1 %v1499_v59  ;;  %v1507_v11 = vld [vmem:[%s1875_s5 + $0xa0] sm:$0xff]  }
  0x14   : > { %1416 = vmatprep.subr.bf16.mxu0 %v1542_v8  ;;  %1371 = vmatprep.subr.bf16.mxu1 %v1500_v61 }
  0x17   : > { %1417 = vmatpush3.bf16.msra.mxu0 %v1490_v12  ;;  %1372 = vmatpush3.bf16.msra.mxu1 %v1502_v62  ;;  %v1508_v12 = vld [vmem:[%s1875_s5 + $0x28] sm:$0xff]  }
  0x18   : > { %1418 = vmatprep.subr.bf16.mxu0 %v1542_v8 }
  0x1b   : > { %1419 = vmatpush3.bf16.msra.mxu0 %v1491_v21  ;;  %v1512_v21 = vld [vmem:[%s1875_s5 + $0x78] sm:$0xff]  }
  0x1c   : > { %1424 = vmatprep.subr.bf16.mxu0 %v1542_v8 }
  0x9f   : > { %v476_v2 = vpop.xlane.xlu0 %475 }
  0xa0   : > { %v478_v3 = vmul.f32 0.03125, %v476_v2  ;;  %v637_v2 = vlaneseq }
  0xa2   : > { %v479_v4 = vsub.f32 %v1634_v0, %v478_v3  ;;  %v636_v3 = vunpack.c.0.s8 %v635_v1 }
  0xa4   : > { %v480_v5 = vmul.f32 %v479_v4, %v479_v4 }
  0xa6   : > { %v481_v6 = vsel %vm473_vm0, %v480_v5, 0.0  ;;  %v1503_v5 = vld [vmem:[%s1875_s5 + $0x60] sm:$0xff]  }
  0xa7   : > { %482 = vadd.xlane.f32.xlu0 %v481_v6  ;;  %v1504_v6 = vld [vmem:[%s1875_s5 + $0x98] sm:$0xff]   ;;  %1373 = vmatprep.subr.bf16.mxu1 %v1503_v5 }
  0xa8   : > { %1374 = vmatpush3.bf16.msra.mxu1 %v1505_v7  ;;  %v1517_v7 = vld [vmem:[%s1878_s8 + $0x8] sm:$0xff]  }
  0xa9   : > { %1375 = vmatprep.subr.bf16.mxu1 %v1506_v10 }
  0xac   : > { %1376 = vmatpush3.bf16.msra.mxu1 %v1508_v12 }
 0x134   : > { %v483_v13 = vpop.xlane.xlu0 %482 }
 0x135   : > { %v484_v14 = vmul.f32 0.03125, %v483_v13 }
 0x137   : > { %v485_v15 = vadd.f32 1e-05, %v484_v14  ;;  %v1509_v14 = vld [vmem:[%s1875_s5 + $0x70] sm:$0xff]  }
 0x138   : > { %1377 = vmatprep.subr.bf16.mxu1 %v1509_v14  ;;  %v1340_v14 = vld [vmem:[%s1877_s7] ss:$0 sm:$0xff] }
 0x139   : > { %1526 = vrsqrt.f32 %v485_v15  ;;  %v1510_v15 = vld [vmem:[%s1875_s5 + $0xa8] sm:$0xff]  }
 0x143   : > { %v1527_v16 = vpop.eup %1526 }
 0x144   : > { %v487_v18 = vmul.f32 %v1527_v16, %v479_v4  ;;  %v638_v4 = vshrl.u32 %v637_v2, 7  ;;  %v1511_v16 = vld [vmem:[%s1875_s5 + $0x30] sm:$0xff]  }
 0x145   : > { %1378 = vmatpush3.bf16.msra.mxu1 %v1511_v16 }
 0x146   : > { %v1672_v20 = vmul.f32 %v1306_v17, %v487_v18  ;;  %v1743_v9 = vsub.s32 %v636_v3, %v638_v4  ;;  %1379 = vmatprep.subr.bf16.mxu1 %v1512_v21  ;;  %v1521_v21 = vld [vmem:[%s1880_s10 + $0x18] sm:$0xff]  }
 0x148   : > { %v496_v23 = vpack.c.bf16 %v1672_v20, %v1672_v20  ;;  %v654_v13 = vrot.slane %v1670_v19, %v1743_v9 }
 0x14a   : > { %v498_v24 = vrot.slane %v496_v23, 7  ;;  %v655_v17 = vcombine.high %v654_v13, %v654_v13  ;;  %v658_v18 = vpack.c.bf16 %v654_v13, %v654_v13  ;;  %v1514_v23 = vld [vmem:[%s1875_s5 + $0x38] sm:$0xff]  }
 0x14b   : > { %1380 = vmatpush3.bf16.msra.mxu1 %v1514_v23  ;;  %v1523_v23 = vld [vmem:[%s1880_s10 + $0x28] sm:$0xff]  }
 0x14c   : > { %v502_v25 = vsel %vm499_vm1, %v495_v22, %v498_v24  ;;  %v1513_v22 = vld [vmem:[%s1875_s5 + $0xb0] sm:$0xff]   ;;  %v659_v24 = vpack.c.bf16 %v655_v17, %v655_v17  ;;  %1452 = vmatprep.subr.bf16.mxu1 %v1542_v8 }
 0x14d   : > { %v505_v26 = vshll.u32 %v502_v25, 16  ;;  %v503_v27 = vshrl.u32 %v502_v25, 16  ;;  %v512_v30 = vrot.slane %v502_v25, 1 }
 0x14f   : > { %v507_v28 = vrot.slane %v505_v26, 1 }
 0x151   : > { %v508_v29 = vor.u32 %v507_v28, %v503_v27  ;;  %v1515_v28 = vld [vmem:[%s1875_s5 + $0xb8] sm:$0xff]  }
 0x153   : > { %509 = vrot.lane.b32.xlu1 %v508_v29, %s1544_s18 }
 0x157   : > { %513 = vrot.lane.b32.xlu1 %v512_v30, %s1545_s19 }
 0x1c5   : > { %v510_v31 = vpop.permute.xlu1 %509 }
 0x1c6   : > { %v516_v32 = vsel %vm473_vm0, %v502_v25, %v510_v31 }
 0x1c9   : > { %v514_v33 = vpop.permute.xlu1 %513 }
 0x1ca   : > { %v519_v34 = vsel %vm517_vm3, %v516_v32, %v514_v33 }
 0x1cb   : > { %1421 = vmatmul.mubr.msk.bf16.vlgmr.msra.gmra.mrb[0].mxu0 %vm575_vm4, %v519_v34 }
 0x1cc   : > { %1440 = vmatprep.mubr.msk.bf16.mxu0 %vm1543_vm2, %v1542_v8  ;;  %1425 = vmatpush3.bf16.msra.mxu0 %v1495_v55 }
 0x1cd   : > { %1426 = vmatprep.subr.bf16.mxu0 %v1542_v8 }
 0x1d0   : > { %1427 = vmatpush3.bf16.msra.mxu0 %v1498_v57 }
 0x1d1   : > { %1428 = vmatprep.subr.bf16.mxu0 %v1542_v8 }
 0x1d4   : > { %1429 = vmatpush3.bf16.msra.mxu0 %v1501_v60 }
 0x1d5   : > { %1430 = vmatprep.subr.bf16.mxu0 %v1542_v8 }
 0x1d8   : > { %1431 = vmatpush3.bf16.msra.mxu0 %v1504_v6 }
 0x1d9   : > { %1432 = vmatprep.subr.bf16.mxu0 %v1542_v8 }
 0x1dc   : > { %1433 = vmatpush3.bf16.msra.mxu0 %v1507_v11 }
 0x1dd   : > { %1434 = vmatprep.subr.bf16.mxu0 %v1542_v8 }
 0x1e0   : > { %1435 = vmatpush3.bf16.msra.mxu0 %v1510_v15 }
 0x1e1   : > { %1436 = vmatprep.subr.bf16.mxu0 %v1542_v8 }
 0x1e4   : > { %1437 = vmatpush3.bf16.msra.mxu0 %v1513_v22  ;;  %v1522_v22 = vld [vmem:[%s1880_s10 + $0x20] sm:$0xff]  }
 0x1e5   : > { %1438 = vmatprep.subr.bf16.mxu0 %v1542_v8 }
 0x1e8   : > { %1439 = vmatpush3.bf16.msra.mxu0 %v1515_v28 }
 0x1e9   : > { %1444 = vmatprep.subr.bf16.mxu0 %v1542_v8 }
 0x29e   : > { %v612_v36 = vpop.f32.mrb[0].mxu0 }
 0x29f   : > { %v613_v37 = vadd.f32 %v1307_v35, %v612_v36  ;;  %v1422_v38 = vpop.f32.mrb[1].mxu0 }
 0x2a0   : > { %v615_v39 = vpop.f32.mrb[2].mxu0 }
 0x2a1   : > { %v619_v40 = vmul.f32 0.044715, %v613_v37  ;;  %v1423_v41 = vpop.f32.mrb[3].mxu0  ;;  %v618_v47 = vmul.f32 0.5, %v613_v37 }
 0x2a3   : > { %v620_v42 = vmul.f32 %v619_v40, %v613_v37 }
 0x2a5   : > { %v621_v43 = vmul.f32 %v620_v42, %v613_v37 }
 0x2a7   : > { %v622_v44 = vadd.f32 %v621_v43, %v613_v37 }
 0x2a9   : > { %v623_v45 = vmul.f32 0.7978846, %v622_v44 }
 0x2ab   : > { %1528 = vtanh.f32 %v623_v45 }
 0x2b5   : > { %v1529_v46 = vpop.eup %1528 }
 0x2b6   : > { %v625_v48 = vadd.f32 1.0, %v1529_v46 }
 0x2b8   : > { %v1693_v49 = vmul.f32 %v625_v48, %v618_v47  ;;  %v1315_v47 = vld [vmem:[%s1876_s6] ss:$0 sm:$0xff] }
 0x2ba   : > { %v660_v50 = vpack.c.bf16 %v1693_v49, %v1693_v49 }
 0x2bc   : > { %v662_v51 = vrot.slane %v660_v50, 7 }
 0x2be   : > { %663 = vrot.lane.b32.xlu0 %v662_v51, %s1544_s18  ;;  %v712_v51 = vadd.f32 %v1315_v47, %v1634_v0 }
 0x330   : > { %v664_v19 = vpop.permute.xlu0 %663 }
 0x331   : > { %v667_v25 = vsel %vm499_vm1, %v658_v18, %v664_v19  ;;  %v669_v27 = vsel %vm499_vm1, %v659_v24, %v664_v19  ;;  %v1519_v18 = vld [vmem:[%s1880_s10 + $0x8] sm:$0xff]   ;;  %v1520_v19 = vld [vmem:[%s1880_s10 + $0x10] sm:$0xff]  }
 0x332   : > { %672 = vrot.lane.b32.xlu1 %v667_v25, %s1547_s20  ;;  %v681_v26 = vshll.u32 %v667_v25, 16  ;;  %v687_v29 = vshll.u32 %v669_v27, 16  ;;  %v697_v30 = vrot.slane %v667_v25, 1  ;;  %v679_v32 = vshrl.u32 %v667_v25, 16  ;;  %v1524_v24 = vld [vmem:[%s1880_s10 + $0x30] sm:$0xff]   ;;  %v1525_v25 = vld [vmem:[%s1880_s10 + $0x38] sm:$0xff]  }
 0x333   : > { %v685_v35 = vshrl.u32 %v669_v27, 16  ;;  %v698_v37 = vrot.slane %v669_v27, 1 }
 0x334   : > { %v683_v31 = vrot.slane %v681_v26, 1  ;;  %v689_v34 = vrot.slane %v687_v29, 1  ;;  %v1341_v26 = vld [vmem:[%s1879_s9] ss:$0 sm:$0xff] }
 0x336   : > { %674 = vrot.lane.b32.xlu1 %v669_v27, %s1547_s20  ;;  %v684_v33 = vor.u32 %v683_v31, %v679_v32  ;;  %v690_v36 = vor.u32 %v689_v34, %v685_v35 }
 0x33a   : > { %699 = vrot.lane.b32.xlu1 %v697_v30, %s1547_s20 }
 0x33e   : > { %691 = vrot.lane.b32.xlu1 %v684_v33, %s1547_s20 }
 0x342   : > { %693 = vrot.lane.b32.xlu1 %v690_v36, %s1547_s20 }
 0x346   : > { %701 = vrot.lane.b32.xlu1 %v698_v37, %s1547_s20 }
 0x3a4   : > { %v673_v38 = vpop.permute.xlu1 %672 }
 0x3a8   : > { %v675_v39 = vpop.permute.xlu1 %674 }
 0x3a9   : > { %v677_v44 = vsel %vm575_vm4, %v673_v38, %v675_v39 }
 0x3ac   : > { %v700_v40 = vpop.permute.xlu1 %699 }
 0x3b0   : > { %v692_v41 = vpop.permute.xlu1 %691 }
 0x3b4   : > { %v694_v42 = vpop.permute.xlu1 %693 }
 0x3b5   : > { %v695_v43 = vsel %vm575_vm4, %v692_v41, %v694_v42  ;;  %v1345_v41 = vld [vmem:[%s1881_s11] ss:$0 sm:$0xff] }
 0x3b6   : > { %937 = vmatprep.mubr.bf16.mxu1 %v695_v43 }
 0x3b7   : > { %938 = vmatmul.mubr.bf16.vlgmr.msra.gmra.mrb[0].mxu1 %v677_v44 }
 0x3b8   : > { %v702_v45 = vpop.permute.xlu1 %701  ;;  %1468 = vmatprep.mubr.msk.bf16.mxu1 %vm1543_vm2, %v1542_v8 }
 0x3b9   : > { %v703_v46 = vsel %vm575_vm4, %v700_v40, %v702_v45 }
 0x3ba   : > { %1441 = vmatmul.mubr.bf16.vlgmr.msra.gmra.mrb[4].mxu0 %v703_v46 }
 0x3bb   : > { %1448 = vmatprep.mubr.msk.bf16.mxu0 %vm1543_vm2, %v1542_v8 }
 0x48a   : > { %v1381_v48 = vpop.f32.mrb[0].mxu1 }
 0x48b   : > { %v1382_v50 = vpop.f32.mrb[1].mxu1 }
 0x48c   : > { %v1383_v52 = vadd.f32 %v1382_v50, %v1381_v48  ;;  %v1384_v53 = vpop.f32.mrb[2].mxu1 }
 0x48d   : > { %v1385_v54 = vpop.f32.mrb[3].mxu1  ;;  %v979_v55 = vpop.f32.mrb[4].mxu0 }
 0x48e   : > { %v980_v56 = vadd.f32 %v1383_v52, %v979_v55  ;;  %v1442_v57 = vpop.f32.mrb[5].mxu0 }
 0x48f   : > { %v982_v58 = vpop.f32.mrb[6].mxu0 }
 0x490   : > { %v1796_v59 = vadd.f32 %v980_v56, %v712_v51  ;;  %v1443_v60 = vpop.f32.mrb[7].mxu0 }
 0x492   : > { %v987_v61 = vsel %vm473_vm0, %v1796_v59, 0.0 }
 0x493   : > { %988 = vadd.xlane.f32.xlu0 %v987_v61 }
 0x4a9   : > { %628 = vrot.lane.b32.xlu0 %v1693_v49, %s1544_s18 }
 0x520   : > { %v989_v62 = vpop.xlane.xlu0 %988 }
 0x521   : > { %v990_v0 = vmul.f32 0.03125, %v989_v62 }
 0x523   : > { %v991_v63 = vsub.f32 %v1796_v59, %v990_v0 }
 0x524   : > { %v629_v1 = vpop.permute.xlu0 %628 }
 0x525   : > { %v631_v2 = vsel %vm473_vm0, %v1672_v20, %v629_v1  ;;  %v992_v3 = vmul.f32 %v991_v63, %v991_v63  ;;  %v1516_v20 = vld [vmem:[%s1878_s8] sm:$0xff]  }
 0x526   : > { %v633_v4 = vcombine.high %v631_v2, %v629_v1  ;;  %1445 = vmatpush3.bf16.msra.mxu0 %v1516_v20 }
 0x527   : > { %v993_v5 = vsel %vm473_vm0, %v992_v3, 0.0  ;;  %1446 = vmatprep.subr.bf16.mxu0 %v1542_v8 }
 0x528   : > { %v640_v6 = vrot.slane %v633_v4, %v1743_v9  ;;  %994 = vadd.xlane.f32.xlu1 %v993_v5  ;;  %v1518_v9 = vld [vmem:[%s1880_s10] sm:$0xff]  }
 0x529   : > { %1453 = vmatpush3.bf16.msra.mxu1 %v1518_v9 }
 0x52a   : > { %v641_v49 = vcombine.high %v640_v6, %v640_v6  ;;  %1447 = vmatpush3.bf16.msra.mxu0 %v1517_v7  ;;  %1454 = vmatprep.subr.bf16.mxu1 %v1542_v8 }
 0x52c   : > { %646 = vst.msk [vmem:[%s468_s30] sm:$0xf] %vm645_vm7, %v641_v49 }
 0x52d   : > { %1455 = vmatpush3.bf16.msra.mxu1 %v1519_v18 }
 0x52e   : > { %1456 = vmatprep.subr.bf16.mxu1 %v1542_v8 }
 0x531   : > { %1457 = vmatpush3.bf16.msra.mxu1 %v1520_v19 }
 0x532   : > { %1458 = vmatprep.subr.bf16.mxu1 %v1542_v8 }
 0x535   : > { %1459 = vmatpush3.bf16.msra.mxu1 %v1521_v21 }
 0x536   : > { %1460 = vmatprep.subr.bf16.mxu1 %v1542_v8 }
 0x539   : > { %1461 = vmatpush3.bf16.msra.mxu1 %v1522_v22 }
 0x53a   : > { %1462 = vmatprep.subr.bf16.mxu1 %v1542_v8 }
 0x53d   : > { %1463 = vmatpush3.bf16.msra.mxu1 %v1523_v23 }
 0x53e   : > { %1464 = vmatprep.subr.bf16.mxu1 %v1542_v8 }
 0x541   : > { %1465 = vmatpush3.bf16.msra.mxu1 %v1524_v24 }
 0x542   : > { %1466 = vmatprep.subr.bf16.mxu1 %v1542_v8 }
 0x545   : > { %1467 = vmatpush3.bf16.msra.mxu1 %v1525_v25 }
 0x5b5   : > { %v995_v10 = vpop.xlane.xlu1 %994 }
 0x5b6   : > { %v996_v11 = vmul.f32 0.03125, %v995_v10 }
 0x5b8   : > { %v997_v12 = vadd.f32 1e-05, %v996_v11 }
 0x5ba   : > { %1530 = vrsqrt.f32 %v997_v12 }
 0x5c4   : > { %v1531_v13 = vpop.eup %1530 }
 0x5c5   : > { %v999_v15 = vmul.f32 %v1531_v13, %v991_v63 }
 0x5c7   : > { %v1006_v16 = vmul.f32 %v1340_v14, %v999_v15 }
 0x5c9   : > { %v1007_v17 = vpack.c.bf16 %v1006_v16, %v1006_v16 }
 0x5cb   : > { %1449 = vmatmul.mubr.msk.bf16.vlgmr.msra.gmra.mrb[8].mxu0 %vm473_vm0, %v1007_v17 }
 0x69e   : > { %v1068_v27 = vpop.f32.mrb[8].mxu0 }
 0x69f   : > { %v1069_v28 = vadd.f32 %v1341_v26, %v1068_v27  ;;  %v1450_v29 = vpop.f32.mrb[9].mxu0 }
 0x6a0   : > { %v1071_v30 = vpop.f32.mrb[10].mxu0 }
 0x6a1   : > { %v1075_v31 = vmul.f32 0.044715, %v1069_v28  ;;  %v1451_v32 = vpop.f32.mrb[11].mxu0  ;;  %v1074_v38 = vmul.f32 0.5, %v1069_v28 }
 0x6a3   : > { %v1076_v33 = vmul.f32 %v1075_v31, %v1069_v28 }
 0x6a5   : > { %v1077_v34 = vmul.f32 %v1076_v33, %v1069_v28 }
 0x6a7   : > { %v1078_v35 = vadd.f32 %v1077_v34, %v1069_v28 }
 0x6a9   : > { %v1079_v36 = vmul.f32 0.7978846, %v1078_v35 }
 0x6ab   : > { %1532 = vtanh.f32 %v1079_v36 }
 0x6b5   : > { %v1533_v37 = vpop.eup %1532 }
 0x6b6   : > { %v1081_v8 = vadd.f32 1.0, %v1533_v37 }
 0x6b8   : > { %v1082_v39 = vmul.f32 %v1081_v8, %v1074_v38 }
 0x6ba   : > { %v1083_v40 = vpack.c.bf16 %v1082_v39, %v1082_v39 }
 0x6bc   : > { %1469 = vmatmul.mubr.bf16.vlgmr.msra.gmra.mrb[4].mxu1 %v1083_v40 }
 0x78f   : > { %v1189_v42 = vpop.f32.mrb[4].mxu1 }
 0x790   : > { %v1190_v43 = vadd.f32 %v1345_v41, %v1189_v42  ;;  %v1470_v44 = vpop.f32.mrb[5].mxu1 }
 0x791   : > { %v1192_v45 = vpop.f32.mrb[6].mxu1 }
 0x792   : > { %v1195_v46 = vadd.f32 %v1190_v43, %v1796_v59  ;;  %v1471_v47 = vpop.f32.mrb[7].mxu1 }
 0x794   : > { %1196 = vst.msk [vmem:[%s463_s14] sm:$0xff] %vm473_vm0, %v1195_v46 }
 0x795 PF: > { %s24_s25 = sadd.s32 1, %s1540_s25  }
 0x796   : > { %p21_p4 = scmp.ge.s32.totalorder %s24_s25, 4  }
 0x798   :  { %23 = sbr.rel (!%p21_p4) target bundleno = 1 (0x1), region = 113 }

// kernel: pallas_forward.5
= control target key start
LH: loop header
LB: loop body
LE: loop exit
PB: predicated region body
PF: predicated region fallthrough
CT: control target
= control target key end

     0   :  { %s2281_s0 = inlined_call_operand.vmem [shape: f32[2,8,32], index: 0, kind: input, shape index: {}]   ;;  %s2282_s1 = inlined_call_operand.vmem [shape: f32[2,2,160], index: 1, kind: input, shape index: {}]   ;;  %s2283_s2 = inlined_call_operand.vmem [shape: f32[1,32], index: 2, kind: input, shape index: {}]   ;;  %s2284_s3 = inlined_call_operand.vmem [shape: bf16[96,128], index: 3, kind: input, shape index: {}]   ;;  %s2285_s4 = inlined_call_operand.vmem [shape: f32[1,128], index: 4, kind: input, shape index: {}]   ;;  %s2286_s5 = inlined_call_operand.vmem [shape: bf16[384,32], index: 5, kind: input, shape index: {}]   ;;  %s2287_s6 = inlined_call_operand.vmem [shape: f32[1,32], index: 6, kind: input, shape index: {}]   ;;  %s2288_s7 = inlined_call_operand.vmem [shape: f32[1,32], index: 7, kind: input, shape index: {}]   ;;  %s2289_s8 = inlined_call_operand.vmem [shape: bf16[32,128], index: 8, kind: input, shape index: {}]   ;;  %s2290_s9 = inlined_call_operand.vmem [shape: f32[1,128], index: 9, kind: input, shape index: {}]   ;;  %s2291_s10 = inlined_call_operand.vmem [shape: bf16[128,32], index: 10, kind: input, shape index: {}]   ;;  %s2292_s11 = inlined_call_operand.vmem [shape: f32[1,32], index: 11, kind: input, shape index: {}]   ;;  %s2293_s12 = inlined_call_operand.vmem [shape: f32[1,32], index: 12, kind: input, shape index: {}]   ;;  %s2294_s13 = inlined_call_operand.vmem [shape: bf16[32,16], index: 13, kind: input, shape index: {}]   ;;  %s2295_s14 = inlined_call_operand.vmem [shape: f32[1,16], index: 14, kind: input, shape index: {}]   ;;  %s2296_s15 = inlined_call_operand.hbm [shape: f32[2,8,16], index: 15, kind: output, shape index: {0}]   ;;  %s2297_s16 = inlined_call_operand.vmem [shape: f32[2,2,160], index: 16, kind: output, shape index: {1}]  }
   0x1   :  { %2303 = sst [smem:[#allocation8_spill]] %s2281_s0 }
   0x2   :  { %2304 = sst [smem:[#allocation9_spill]] %s2282_s1 }
   0x3   :  { %2305 = sst [smem:[#allocation10_spill]] %s2283_s2 }
   0x4   :  { %22 = vsyncpa [#allocation3], 0 }
   0x5   :  { %24 = vsyncpa [#allocation3 + $0x1], 0  ;;  %s1932_s21 = smov 0   ;;  %s1934_s22 = smov 0  }
   0x6   :  { %s1936_s23 = smov 0   ;;  %s1938_s24 = smov 0  }
   0x7 LB: > { %2306 = sst [smem:[#allocation5_spill]] %s1834_s23  ;;  %s1953_s25 = sadd.s32 4294967295, %s1838_s24   ;;  %s1838_s24 = sphi %s1938_s24, %s2316_s24   ;;  %s1834_s23 = sphi %s1936_s23, %s2318_s23   ;;  %s1830_s22 = sphi %s1934_s22, %s2320_s22   ;;  %s1826_s21 = sphi %s1932_s21, %s2319_s21  }
   0x8   : > { %s1485_s26 = sadd.s32 4294967294, %s1838_s24   ;;  %s1957_s27 = sadd.s32 1, %s1838_s24  }
   0x9   : > { %2307 = sst [smem:[#allocation6_spill]] %s1957_s27  ;;  %s362_s28 = sadd.s32 1, %s1834_s23 }
   0xa   : > { %s359_s29 = ssub.s32 %s1838_s24, %s1957_s27  ;;  %p372_p0 = scmp.ne.s32.totalorder %s1834_s23, %s1830_s22 }
   0xb   : > { %p360_p1 = scmp.eq.s32.totalorder %s359_s29, 0  ;;  %p373_p2 = scmp.eq.s32.totalorder %s1953_s25, 1 }
   0xc   : > { %p378_p3 = scmp.ne.s32.totalorder %s1830_s22, %s1826_s21  ;;  %p379_p4 = scmp.eq.s32.totalorder %s1485_s26, 1 }
   0xd   : > { %s1968_s30 = scalar_select %p360_p1, %s1834_s23, %s362_s28  }
   0xe   : > { %p1970_p5 = por %p373_p2, %p372_p0  ;;  %p1974_p6 = por %p379_p4, %p378_p3 }
   0xf   : > { %2308 = sst [smem:[#allocation7_spill]] %s1968_s30  ;;  %p1488_p7 = scmp.ge.s32.totalorder %s1838_s24, 1 }
  0x10   : > { %p477_p8 = scmp.lt.s32.totalorder %s1838_s24, 3 }
  0x12   : > { %p478_p9 = pnand %p1488_p7, %p477_p8 }
  0x13   : > { %p536_p10 = scmp.lt.s32.totalorder (!%p478_p9), %s1953_s25, 1  ;;  %vm554_vm0 = vcmask (!%p478_p9), 261120   ;;  %s2311_s28 = sld [smem:[#allocation8_spill]] (!%p478_p9)  ;;  %v1724_v7 = vld [vmem:[%s2284_s3] sm:$0xff] (!%p478_p9)   ;;  %v1840_v8 = vmov (!%p478_p9), 0.0   ;;  %v1725_v9 = vld [vmem:[%s2284_s3 + $0x8] sm:$0xff] (!%p478_p9)  }
  0x14   : > { %481 = sbr.rel (%p478_p9) target bundleno = 2496 (0x9c0), region = 80  ;;  %1607 = vmatprep.subr.bf16.mxu0 (!%p478_p9), %v1840_v8  ;;  %v1726_v10 = vld [vmem:[%s2284_s3 + $0x10] sm:$0xff] (!%p478_p9)   ;;  %v1727_v11 = vld [vmem:[%s2284_s3 + $0x18] sm:$0xff] (!%p478_p9)   ;;  %v1728_v12 = vld [vmem:[%s2284_s3 + $0x20] sm:$0xff] (!%p478_p9)   ;;  %s2312_s1 = sld [smem:[#allocation9_spill]] (!%p478_p9)  ;;  %vm580_vm1 = vcmask (!%p478_p9), 1040384  }
  0x15   : > { %1608 = vmatpush3.bf16.msra.mxu0 (!%p478_p9), %v1724_v7  ;;  %s2313_s2 = sld [smem:[#allocation10_spill]] (!%p478_p9)  ;;  %v1729_v21 = vld [vmem:[%s2284_s3 + $0x28] sm:$0xff] (!%p478_p9)   ;;  %vm1841_vm2 = vmmov (!%p478_p9), 0   ;;  %s2302_s27 = smov (!%p478_p9), 32   ;;  %vm598_vm3 = vcmask (!%p478_p9), 523264   ;;  %vm656_vm4 = vcmask (!%p478_p9), 785408  }
  0x16   : > { %1609 = vmatprep.subr.bf16.mxu0 (!%p478_p9), %v1840_v8  ;;  %1619 = vmatprep.mubr.msk.bf16.mxu0 (!%p478_p9), %vm1841_vm2, %v1840_v8  ;;  %s1843_s26 = smov (!%p478_p9), 64   ;;  %v1496_v35 = vld [vmem:[%s2285_s4] ss:$0 sm:$0xff] (!%p478_p9)  ;;  %v1732_v54 = vld [vmem:[%s2286_s5 + $0x48] sm:$0xff] (!%p478_p9)   ;;  %v1735_v58 = vld [vmem:[%s2286_s5 + $0x50] sm:$0xff] (!%p478_p9)   ;;  %vm724_vm5 = vcmask (!%p478_p9), 1041408  }
  0x17   : > { %v1730_v52 = vld [vmem:[%s2286_s5 + $0x40] sm:$0xff] (!%p478_p9)   ;;  %v1734_v56 = vld [vmem:[%s2286_s5 + $0x8] sm:$0xff] (!%p478_p9)   ;;  %v1737_v59 = vld [vmem:[%s2286_s5 + $0x10] sm:$0xff] (!%p478_p9)   ;;  %v1844_v63 = vmov (!%p478_p9), 1983009808   ;;  %vm725_vm6 = vcmask (!%p478_p9), 257026  }
  0x18   : > { %v1731_v53 = vld [vmem:[%s2286_s5] sm:$0xff] (!%p478_p9)   ;;  %1561 = vmatprep.subr.bf16.mxu1 (!%p478_p9), %v1730_v52  ;;  %v1736_v57 = vld [vmem:[%s2286_s5 + $0x88] sm:$0xff] (!%p478_p9)   ;;  %v1739_v60 = vld [vmem:[%s2286_s5 + $0x90] sm:$0xff] (!%p478_p9)   ;;  %vm1365_vm8 = vcmask (!%p478_p9), 130048  }
  0x19   : > { %1610 = vmatpush3.bf16.msra.mxu0 (!%p478_p9), %v1725_v9  ;;  %v1733_v55 = vld [vmem:[%s2286_s5 + $0x80] sm:$0xff] (!%p478_p9)   ;;  %1562 = vmatpush3.bf16.msra.mxu1 (!%p478_p9), %v1731_v53  ;;  %v1738_v61 = vld [vmem:[%s2286_s5 + $0x58] sm:$0xff] (!%p478_p9)   ;;  %vm726_vm7 = vmor (!%p478_p9), %vm725_vm6, %vm724_vm5 }
  0x1a   : > { %1611 = vmatprep.subr.bf16.mxu0 (!%p478_p9), %v1840_v8  ;;  %1563 = vmatprep.subr.bf16.mxu1 (!%p478_p9), %v1732_v54  ;;  %v1740_v62 = vld [vmem:[%s2286_s5 + $0x18] sm:$0xff] (!%p478_p9)   ;;  %v1743_v7 = vld [vmem:[%s2286_s5 + $0x20] sm:$0xff] (!%p478_p9)  }
  0x1b   : > { %s1982_s18 = scalar_select %p536_p10, %s1953_s25, 1  ;;  %v1495_v17 = vld [vmem:[%s2313_s2] ss:$0 sm:$0xff] }
  0x1d   : > { %s1490_s19 = sshll.u32 %s1982_s18, 3  ;;  %1612 = vmatpush3.bf16.msra.mxu0 %v1726_v10  ;;  %s2301_s20 = sshll.u32 %s1982_s18, 2  ;;  %1564 = vmatpush3.bf16.msra.mxu1 %v1734_v56  ;;  %v1744_v10 = vld [vmem:[%s2286_s5 + $0x68] sm:$0xff]  }
  0x1e   : > { %s539_s29 = scalar_lea.vmem %s2311_s28, %s1490_s19  ;;  %1613 = vmatprep.subr.bf16.mxu0 %v1840_v8  ;;  %s544_s23 = scalar_lea.vmem %s2312_s1, %s2301_s20  ;;  %1565 = vmatprep.subr.bf16.mxu1 %v1735_v58 }
  0x1f   : > { %v1988_v0 = vld [vmem:[%s539_s29] sm:$0xff]  ;;  %s1845_s28 = smov 96   ;;  %s2314_s29 = smov 32  }
  0x20   : > { %v555_v1 = vsel %vm554_vm0, %v1988_v0, 0.0  ;;  %v2024_v19 = vld [vmem:[%s544_s23] sm:$0xf]  ;;  %s526_s20 = sand.u32 1, %s1830_s22  }
  0x21   : > { %556 = vadd.xlane.f32.xlu0 %v555_v1  ;;  %1614 = vmatpush3.bf16.msra.mxu0 %v1727_v11  ;;  %v576_v22 = vpack.c.bf16 %v2024_v19, %v2024_v19  ;;  %v716_v1 = vunpack.c.l.s4 %v1844_v63  ;;  %v1745_v11 = vld [vmem:[%s2286_s5 + $0xa0] sm:$0xff]  }
  0x22   : > { %1615 = vmatprep.subr.bf16.mxu0 %v1840_v8  ;;  %1566 = vmatpush3.bf16.msra.mxu1 %v1737_v59 }
  0x23   : > { %1567 = vmatprep.subr.bf16.mxu1 %v1738_v61 }
  0x25   : > { %1616 = vmatpush3.bf16.msra.mxu0 %v1728_v12  ;;  %v1746_v12 = vld [vmem:[%s2286_s5 + $0x28] sm:$0xff]  }
  0x26   : > { %1617 = vmatprep.subr.bf16.mxu0 %v1840_v8  ;;  %1568 = vmatpush3.bf16.msra.mxu1 %v1740_v62 }
  0x29   : > { %1618 = vmatpush3.bf16.msra.mxu0 %v1729_v21  ;;  %v1750_v21 = vld [vmem:[%s2286_s5 + $0x78] sm:$0xff]  }
  0x2a   : > { %1623 = vmatprep.subr.bf16.mxu0 %v1840_v8 }
  0xae   : > { %v557_v2 = vpop.xlane.xlu0 %556 }
  0xaf   : > { %v559_v3 = vmul.f32 0.03125, %v557_v2  ;;  %v718_v2 = vlaneseq }
  0xb1   : > { %v560_v4 = vsub.f32 %v1988_v0, %v559_v3  ;;  %v717_v3 = vunpack.c.0.s8 %v716_v1 }
  0xb3   : > { %v561_v5 = vmul.f32 %v560_v4, %v560_v4 }
  0xb5   : > { %v562_v6 = vsel %vm554_vm0, %v561_v5, 0.0  ;;  %v1741_v5 = vld [vmem:[%s2286_s5 + $0x60] sm:$0xff]  }
  0xb6   : > { %563 = vadd.xlane.f32.xlu0 %v562_v6  ;;  %v1742_v6 = vld [vmem:[%s2286_s5 + $0x98] sm:$0xff]   ;;  %1569 = vmatprep.subr.bf16.mxu1 %v1741_v5 }
  0xb7   : > { %1570 = vmatpush3.bf16.msra.mxu1 %v1743_v7 }
  0xb8   : > { %1571 = vmatprep.subr.bf16.mxu1 %v1744_v10 }
  0xbb   : > { %1572 = vmatpush3.bf16.msra.mxu1 %v1746_v12 }
 0x143   : > { %v564_v13 = vpop.xlane.xlu0 %563 }
 0x144   : > { %v565_v14 = vmul.f32 0.03125, %v564_v13 }
 0x146   : > { %v566_v15 = vadd.f32 1e-05, %v565_v14  ;;  %v1747_v14 = vld [vmem:[%s2286_s5 + $0x70] sm:$0xff]  }
 0x147   : > { %1573 = vmatprep.subr.bf16.mxu1 %v1747_v14 }
 0x148   : > { %1766 = vrsqrt.f32 %v566_v15  ;;  %v1748_v15 = vld [vmem:[%s2286_s5 + $0xa8] sm:$0xff]  }
 0x152   : > { %v1767_v16 = vpop.eup %1766 }
 0x153   : > { %v568_v18 = vmul.f32 %v1767_v16, %v560_v4  ;;  %v719_v4 = vshrl.u32 %v718_v2, 7  ;;  %v1749_v16 = vld [vmem:[%s2286_s5 + $0x30] sm:$0xff]  }
 0x154   : > { %1574 = vmatpush3.bf16.msra.mxu1 %v1749_v16 }
 0x155   : > { %v2026_v20 = vmul.f32 %v1495_v17, %v568_v18  ;;  %v2097_v9 = vsub.s32 %v717_v3, %v719_v4  ;;  %1575 = vmatprep.subr.bf16.mxu1 %v1750_v21  ;;  %v1754_v3 = vld [vmem:[%s2289_s8] sm:$0xff]   ;;  %v1755_v4 = vld [vmem:[%s2289_s8 + $0x8] sm:$0xff]   ;;  %v1759_v21 = vld [vmem:[%s2291_s10 + $0x18] sm:$0xff]  }
 0x157   : > { %v577_v23 = vpack.c.bf16 %v2026_v20, %v2026_v20  ;;  %v735_v13 = vrot.slane %v2024_v19, %v2097_v9 }
 0x159   : > { %v579_v24 = vrot.slane %v577_v23, 7  ;;  %v736_v17 = vcombine.high %v735_v13, %v735_v13  ;;  %v739_v18 = vpack.c.bf16 %v735_v13, %v735_v13  ;;  %v1752_v23 = vld [vmem:[%s2286_s5 + $0x38] sm:$0xff]  }
 0x15a   : > { %1576 = vmatpush3.bf16.msra.mxu1 %v1752_v23  ;;  %v1761_v23 = vld [vmem:[%s2291_s10 + $0x28] sm:$0xff]  }
 0x15b   : > { %v583_v25 = vsel %vm580_vm1, %v576_v22, %v579_v24  ;;  %v1751_v22 = vld [vmem:[%s2286_s5 + $0xb0] sm:$0xff]   ;;  %v740_v24 = vpack.c.bf16 %v736_v17, %v736_v17  ;;  %1643 = vmatprep.subr.bf16.mxu1 %v1840_v8  ;;  %v1756_v17 = vld [vmem:[%s2291_s10] sm:$0xff]  }
 0x15c   : > { %v586_v26 = vshll.u32 %v583_v25, 16  ;;  %v584_v27 = vshrl.u32 %v583_v25, 16  ;;  %v593_v30 = vrot.slane %v583_v25, 1 }
 0x15e   : > { %v588_v28 = vrot.slane %v586_v26, 1 }
 0x160   : > { %v589_v29 = vor.u32 %v588_v28, %v584_v27  ;;  %v1753_v28 = vld [vmem:[%s2286_s5 + $0xb8] sm:$0xff]  }
 0x162   : > { %590 = vrot.lane.b32.xlu1 %v589_v29, %s2302_s27 }
 0x166   : > { %594 = vrot.lane.b32.xlu1 %v593_v30, %s1843_s26 }
 0x1d4   : > { %v591_v31 = vpop.permute.xlu1 %590 }
 0x1d5   : > { %v597_v32 = vsel %vm554_vm0, %v583_v25, %v591_v31 }
 0x1d8   : > { %v595_v33 = vpop.permute.xlu1 %594 }
 0x1d9   : > { %v600_v34 = vsel %vm598_vm3, %v597_v32, %v595_v33 }
 0x1da   : > { %1620 = vmatmul.mubr.msk.bf16.vlgmr.msra.gmra.mrb[0].mxu0 %vm656_vm4, %v600_v34 }
 0x1db   : > { %1639 = vmatprep.mubr.msk.bf16.mxu0 %vm1841_vm2, %v1840_v8  ;;  %1624 = vmatpush3.bf16.msra.mxu0 %v1733_v55 }
 0x1dc   : > { %1625 = vmatprep.subr.bf16.mxu0 %v1840_v8 }
 0x1df   : > { %1626 = vmatpush3.bf16.msra.mxu0 %v1736_v57 }
 0x1e0   : > { %1627 = vmatprep.subr.bf16.mxu0 %v1840_v8 }
 0x1e3   : > { %1628 = vmatpush3.bf16.msra.mxu0 %v1739_v60 }
 0x1e4   : > { %1629 = vmatprep.subr.bf16.mxu0 %v1840_v8 }
 0x1e7   : > { %1630 = vmatpush3.bf16.msra.mxu0 %v1742_v6 }
 0x1e8   : > { %1631 = vmatprep.subr.bf16.mxu0 %v1840_v8 }
 0x1eb   : > { %1632 = vmatpush3.bf16.msra.mxu0 %v1745_v11 }
 0x1ec   : > { %1633 = vmatprep.subr.bf16.mxu0 %v1840_v8 }
 0x1ef   : > { %1634 = vmatpush3.bf16.msra.mxu0 %v1748_v15  ;;  %v1529_v15 = vld [vmem:[%s2288_s7] ss:$0 sm:$0xff] }
 0x1f0   : > { %1635 = vmatprep.subr.bf16.mxu0 %v1840_v8 }
 0x1f3   : > { %1636 = vmatpush3.bf16.msra.mxu0 %v1751_v22  ;;  %v1760_v22 = vld [vmem:[%s2291_s10 + $0x20] sm:$0xff]  }
 0x1f4   : > { %1637 = vmatprep.subr.bf16.mxu0 %v1840_v8 }
 0x1f7   : > { %1638 = vmatpush3.bf16.msra.mxu0 %v1753_v28 }
 0x1f8   : > { %1671 = vmatprep.subr.bf16.mxu0 %v1840_v8 }
 0x2ad   : > { %v693_v36 = vpop.f32.mrb[0].mxu0 }
 0x2ae   : > { %v694_v37 = vadd.f32 %v1496_v35, %v693_v36  ;;  %v1621_v38 = vpop.f32.mrb[1].mxu0 }
 0x2af   : > { %v696_v39 = vpop.f32.mrb[2].mxu0 }
 0x2b0   : > { %v700_v40 = vmul.f32 0.044715, %v694_v37  ;;  %v1622_v41 = vpop.f32.mrb[3].mxu0  ;;  %v699_v47 = vmul.f32 0.5, %v694_v37 }
 0x2b2   : > { %v701_v42 = vmul.f32 %v700_v40, %v694_v37 }
 0x2b4   : > { %v702_v43 = vmul.f32 %v701_v42, %v694_v37 }
 0x2b6   : > { %v703_v44 = vadd.f32 %v702_v43, %v694_v37 }
 0x2b8   : > { %v704_v45 = vmul.f32 0.7978846, %v703_v44 }
 0x2ba   : > { %1768 = vtanh.f32 %v704_v45 }
 0x2c4   : > { %v1769_v46 = vpop.eup %1768 }
 0x2c5   : > { %v706_v48 = vadd.f32 1.0, %v1769_v46 }
 0x2c7   : > { %v2047_v49 = vmul.f32 %v706_v48, %v699_v47  ;;  %v1504_v47 = vld [vmem:[%s2287_s6] ss:$0 sm:$0xff] }
 0x2c9   : > { %v741_v50 = vpack.c.bf16 %v2047_v49, %v2047_v49 }
 0x2cb   : > { %v743_v51 = vrot.slane %v741_v50, 7 }
 0x2cd   : > { %744 = vrot.lane.b32.xlu0 %v743_v51, %s2302_s27  ;;  %v793_v51 = vadd.f32 %v1504_v47, %v1988_v0 }
 0x33f   : > { %v745_v19 = vpop.permute.xlu0 %744 }
 0x340   : > { %v748_v25 = vsel %vm580_vm1, %v739_v18, %v745_v19  ;;  %v750_v27 = vsel %vm580_vm1, %v740_v24, %v745_v19  ;;  %v1757_v18 = vld [vmem:[%s2291_s10 + $0x8] sm:$0xff]   ;;  %v1758_v19 = vld [vmem:[%s2291_s10 + $0x10] sm:$0xff]  }
 0x341   : > { %753 = vrot.lane.b32.xlu1 %v748_v25, %s1845_s28  ;;  %v762_v26 = vshll.u32 %v748_v25, 16  ;;  %v768_v29 = vshll.u32 %v750_v27, 16  ;;  %v778_v30 = vrot.slane %v748_v25, 1  ;;  %v760_v32 = vshrl.u32 %v748_v25, 16  ;;  %v1762_v24 = vld [vmem:[%s2291_s10 + $0x30] sm:$0xff]   ;;  %v1763_v25 = vld [vmem:[%s2291_s10 + $0x38] sm:$0xff]  }
 0x342   : > { %v766_v35 = vshrl.u32 %v750_v27, 16  ;;  %v779_v37 = vrot.slane %v750_v27, 1 }
 0x343   : > { %v764_v31 = vrot.slane %v762_v26, 1  ;;  %v770_v34 = vrot.slane %v768_v29, 1  ;;  %v1530_v26 = vld [vmem:[%s2290_s9] ss:$0 sm:$0xff] }
 0x345   : > { %755 = vrot.lane.b32.xlu1 %v750_v27, %s1845_s28  ;;  %v765_v33 = vor.u32 %v764_v31, %v760_v32  ;;  %v771_v36 = vor.u32 %v770_v34, %v766_v35 }
 0x349   : > { %780 = vrot.lane.b32.xlu1 %v778_v30, %s1845_s28 }
 0x34d   : > { %772 = vrot.lane.b32.xlu1 %v765_v33, %s1845_s28 }
 0x351   : > { %774 = vrot.lane.b32.xlu1 %v771_v36, %s1845_s28 }
 0x355   : > { %782 = vrot.lane.b32.xlu1 %v779_v37, %s1845_s28  ;;  %s2315_s28 = sshll.u32 %s1982_s18, 2 }
 0x356   : > { %s549_s23 = scalar_lea.vmem %s2297_s16, %s2315_s28  ;;  %s1489_s28 = sshll.u32 %s526_s20, 3 }
 0x357   : > { %s528_s30 = scalar_lea.vmem [#allocation2], %s1489_s28  ;;  %s1846_s28 = smov [#allocation2]  }
 0x358   : > { %s1780_s2 = sshll.u32 %s1846_s28, 4  ;;  %s1781_s2 = int_to_ptr.vmem [resolvable:$false] %s1780_s2 }
 0x359   : > { %s1782_s27 = scalar_lea.vmem %s1781_s2, 256 }
 0x3b3   : > { %v754_v38 = vpop.permute.xlu1 %753 }
 0x3b7   : > { %v756_v39 = vpop.permute.xlu1 %755 }
 0x3b8   : > { %v758_v44 = vsel %vm656_vm4, %v754_v38, %v756_v39 }
 0x3bb   : > { %v781_v40 = vpop.permute.xlu1 %780 }
 0x3bf   : > { %v773_v41 = vpop.permute.xlu1 %772 }
 0x3c3   : > { %v775_v42 = vpop.permute.xlu1 %774 }
 0x3c4   : > { %v776_v43 = vsel %vm656_vm4, %v773_v41, %v775_v42  ;;  %v1534_v42 = vld [vmem:[%s2292_s11] ss:$0 sm:$0xff] }
 0x3c5   : > { %1018 = vmatprep.mubr.bf16.mxu1 %v776_v43 }
 0x3c6   : > { %1019 = vmatmul.mubr.bf16.vlgmr.msra.gmra.mrb[0].mxu1 %v758_v44 }
 0x3c7   : > { %v783_v45 = vpop.permute.xlu1 %782  ;;  %1647 = vmatprep.mubr.msk.bf16.mxu1 %vm1841_vm2, %v1840_v8  ;;  %1644 = vmatpush3.bf16.msra.mxu1 %v1754_v3 }
 0x3c8   : > { %v784_v46 = vsel %vm656_vm4, %v781_v40, %v783_v45  ;;  %1645 = vmatprep.subr.bf16.mxu1 %v1840_v8 }
 0x3c9   : > { %1640 = vmatmul.mubr.bf16.vlgmr.msra.gmra.mrb[4].mxu0 %v784_v46 }
 0x3ca   : > { %1675 = vmatprep.mubr.msk.bf16.mxu0 %vm1841_vm2, %v1840_v8 }
 0x3cb   : > { %1646 = vmatpush3.bf16.msra.mxu1 %v1755_v4 }
 0x3cc   : > { %1651 = vmatprep.subr.bf16.mxu1 %v1840_v8 }
 0x499   : > { %v1577_v48 = vpop.f32.mrb[0].mxu1 }
 0x49a   : > { %v1578_v50 = vpop.f32.mrb[1].mxu1 }
 0x49b   : > { %v1579_v52 = vadd.f32 %v1578_v50, %v1577_v48  ;;  %v1580_v53 = vpop.f32.mrb[2].mxu1 }
 0x49c   : > { %v1581_v54 = vpop.f32.mrb[3].mxu1  ;;  %v1060_v55 = vpop.f32.mrb[4].mxu0 }
 0x49d   : > { %v1061_v56 = vadd.f32 %v1579_v52, %v1060_v55  ;;  %v1641_v57 = vpop.f32.mrb[5].mxu0 }
 0x49e   : > { %v1063_v58 = vpop.f32.mrb[6].mxu0  ;;  %v1765_v57 = vld [vmem:[%s2294_s13 + $0x8] sm:$0xff]  }
 0x49f   : > { %v2150_v59 = vadd.f32 %v1061_v56, %v793_v51  ;;  %v1642_v60 = vpop.f32.mrb[7].mxu0  ;;  %v1764_v56 = vld [vmem:[%s2294_s13] sm:$0xff]  }
 0x4a0   : > { %1672 = vmatpush3.bf16.msra.mxu0 %v1764_v56 }
 0x4a1   : > { %v1068_v61 = vsel %vm554_vm0, %v2150_v59, 0.0  ;;  %1673 = vmatprep.subr.bf16.mxu0 %v1840_v8 }
 0x4a2   : > { %1069 = vadd.xlane.f32.xlu0 %v1068_v61 }
 0x4a4   : > { %1674 = vmatpush3.bf16.msra.mxu0 %v1765_v57 }
 0x52f   : > { %v1070_v62 = vpop.xlane.xlu0 %1069 }
 0x530   : > { %v1071_v63 = vmul.f32 0.03125, %v1070_v62  ;;  %v1543_v62 = vld [vmem:[%s2293_s12] ss:$0 sm:$0xff] }
 0x532   : > { %v1072_v1 = vsub.f32 %v2150_v59, %v1071_v63 }
 0x534   : > { %v1073_v2 = vmul.f32 %v1072_v1, %v1072_v1 }
 0x536   : > { %v1074_v0 = vsel %vm554_vm0, %v1073_v2, 0.0 }
 0x537   : > { %1075 = vadd.xlane.f32.xlu1 %v1074_v0 }
 0x548   : > { %709 = vrot.lane.b32.xlu1 %v2047_v49, %s2314_s29  ;;  %s1386_s29 = sshll.u32 %s528_s30, 4  ;;  %s2241_s29 = int_to_ptr.vmem [resolvable:$true] %s1386_s29 }
 0x549   : > { %s1776_s1 = scalar_lea.vmem %s2241_s29, 128  ;;  %p1783_p0 = scmp.lt.s32.totalorder %s2241_s29, %s1781_s2 }
 0x54a   : > { %p1777_p11 = scmp.ne.s32.totalorder %s2241_s29, %s1776_s1  ;;  %p1784_p1 = scmp.lt.s32.totalorder %s1782_s27, %s1776_s1 }
 0x54c   : > { %p1778_p12 = pnand %p1777_p11, %p1970_p5  ;;  %p1785_p2 = por %p1784_p1, %p1783_p0 }
 0x54e   : > { %p1779_p13 = pneg %p1778_p12 }
 0x550   : > { %p1786_p3 = pnand %p1785_p2, %p1779_p13 }
 0x5c4   : > { %v1076_v5 = vpop.xlane.xlu1 %1075 }
 0x5c5   : > { %v1077_v6 = vmul.f32 0.03125, %v1076_v5 }
 0x5c7   : > { %v1078_v7 = vadd.f32 1e-05, %v1077_v6 }
 0x5c8   : > { %v710_v10 = vpop.permute.xlu1 %709 }
 0x5c9   : > { %1770 = vrsqrt.f32 %v1078_v7  ;;  %v712_v49 = vsel %vm554_vm0, %v2026_v20, %v710_v10 }
 0x5ca   : > { %v714_v11 = vcombine.high %v712_v49, %v710_v10 }
 0x5cc   : > { %v721_v12 = vrot.slane %v714_v11, %v2097_v9 }
 0x5ce   : > { %v722_v13 = vcombine.high %v721_v12, %v721_v12 }
 0x5d0   : > { %727 = vst.msk [vmem:[%s549_s23] sm:$0xf] %vm726_vm7, %v722_v13  ;;  %s1549_s23 = sshll.u32 %s1953_s25, 7  ;;  %s1368_s25 = scalar_lea.sflag [#allocation3], %s526_s20 }
 0x5d1   : > { %s2239_s18 = scalar_lea.hbm %s2296_s15, %s1549_s23 }
 0x5d3   : > { %v1771_v14 = vpop.eup %1770 }
 0x5d4   : > { %v1080_v16 = vmul.f32 %v1771_v14, %v1072_v1 }
 0x5d6   : > { %v1087_v20 = vmul.f32 %v1529_v15, %v1080_v16 }
 0x5d8   : > { %v1088_v9 = vpack.c.bf16 %v1087_v20, %v1087_v20 }
 0x5da   : > { %1648 = vmatmul.mubr.msk.bf16.vlgmr.msra.gmra.mrb[4].mxu1 %vm554_vm0, %v1088_v9 }
 0x5db   : > { %1652 = vmatpush3.bf16.msra.mxu1 %v1756_v17  ;;  %1667 = vmatprep.mubr.msk.bf16.mxu1 %vm1841_vm2, %v1840_v8 }
 0x5dc   : > { %1653 = vmatprep.subr.bf16.mxu1 %v1840_v8 }
 0x5df   : > { %1654 = vmatpush3.bf16.msra.mxu1 %v1757_v18 }
 0x5e0   : > { %1655 = vmatprep.subr.bf16.mxu1 %v1840_v8 }
 0x5e3   : > { %1656 = vmatpush3.bf16.msra.mxu1 %v1758_v19 }
 0x5e4   : > { %1657 = vmatprep.subr.bf16.mxu1 %v1840_v8 }
 0x5e7   : > { %1658 = vmatpush3.bf16.msra.mxu1 %v1759_v21 }
 0x5e8   : > { %1659 = vmatprep.subr.bf16.mxu1 %v1840_v8 }
 0x5eb   : > { %1660 = vmatpush3.bf16.msra.mxu1 %v1760_v22 }
 0x5ec   : > { %1661 = vmatprep.subr.bf16.mxu1 %v1840_v8 }
 0x5ef   : > { %1662 = vmatpush3.bf16.msra.mxu1 %v1761_v23 }
 0x5f0   : > { %1663 = vmatprep.subr.bf16.mxu1 %v1840_v8 }
 0x5f3   : > { %1664 = vmatpush3.bf16.msra.mxu1 %v1762_v24 }
 0x5f4   : > { %1665 = vmatprep.subr.bf16.mxu1 %v1840_v8  ;;  %v1544_v8 = vld [vmem:[%s2295_s14] ss:$0 sm:$0xff] }
 0x5f7   : > { %1666 = vmatpush3.bf16.msra.mxu1 %v1763_v25 }
 0x6ad   : > { %v1149_v27 = vpop.f32.mrb[4].mxu1 }
 0x6ae   : > { %v1150_v28 = vadd.f32 %v1530_v26, %v1149_v27  ;;  %v1649_v29 = vpop.f32.mrb[5].mxu1 }
 0x6af   : > { %v1152_v30 = vpop.f32.mrb[6].mxu1 }
 0x6b0   : > { %v1156_v31 = vmul.f32 0.044715, %v1150_v28  ;;  %v1650_v32 = vpop.f32.mrb[7].mxu1  ;;  %v1155_v38 = vmul.f32 0.5, %v1150_v28 }
 0x6b2   : > { %v1157_v33 = vmul.f32 %v1156_v31, %v1150_v28 }
 0x6b4   : > { %v1158_v34 = vmul.f32 %v1157_v33, %v1150_v28 }
 0x6b6   : > { %v1159_v35 = vadd.f32 %v1158_v34, %v1150_v28 }
 0x6b8   : > { %v1160_v36 = vmul.f32 0.7978846, %v1159_v35 }
 0x6ba   : > { %1772 = vtanh.f32 %v1160_v36 }
 0x6c4   : > { %v1773_v37 = vpop.eup %1772 }
 0x6c5   : > { %v1162_v39 = vadd.f32 1.0, %v1773_v37 }
 0x6c7   : > { %v1163_v40 = vmul.f32 %v1162_v39, %v1155_v38 }
 0x6c9   : > { %v1164_v41 = vpack.c.bf16 %v1163_v40, %v1163_v40 }
 0x6cb   : > { %1668 = vmatmul.mubr.bf16.vlgmr.msra.gmra.mrb[8].mxu1 %v1164_v41 }
 0x79e   : > { %v1270_v43 = vpop.f32.mrb[8].mxu1 }
 0x79f   : > { %v1271_v44 = vadd.f32 %v1534_v42, %v1270_v43  ;;  %v1669_v45 = vpop.f32.mrb[9].mxu1 }
 0x7a0   : > { %v1273_v46 = vpop.f32.mrb[10].mxu1 }
 0x7a1   : > { %v1670_v47 = vpop.f32.mrb[11].mxu1  ;;  %v1276_v48 = vadd.f32 %v1271_v44, %v2150_v59 }
 0x7a3   : > { %v1278_v50 = vsel %vm554_vm0, %v1276_v48, 0.0 }
 0x7a4   : > { %1279 = vadd.xlane.f32.xlu0 %v1278_v50 }
 0x831   : > { %v1280_v51 = vpop.xlane.xlu0 %1279 }
 0x832   : > { %v1281_v52 = vmul.f32 0.03125, %v1280_v51 }
 0x834   : > { %v1282_v53 = vsub.f32 %v1276_v48, %v1281_v52 }
 0x836   : > { %v1283_v54 = vmul.f32 %v1282_v53, %v1282_v53 }
 0x838   : > { %v1284_v55 = vsel %vm554_vm0, %v1283_v54, 0.0 }
 0x839   : > { %1285 = vadd.xlane.f32.xlu0 %v1284_v55 }
 0x8c6   : > { %v1286_v58 = vpop.xlane.xlu0 %1285 }
 0x8c7   : > { %v1287_v59 = vmul.f32 0.03125, %v1286_v58 }
 0x8c9   : > { %v1288_v60 = vadd.f32 1e-05, %v1287_v59 }
 0x8cb   : > { %1774 = vrsqrt.f32 %v1288_v60 }
 0x8d5   : > { %v1775_v61 = vpop.eup %1774 }
 0x8d6   : > { %v1290_v63 = vmul.f32 %v1775_v61, %v1282_v53 }
 0x8d8   : > { %v1297_v1 = vmul.f32 %v1543_v62, %v1290_v63 }
 0x8da   : > { %v1298_v2 = vpack.c.bf16 %v1297_v1, %v1297_v1 }
 0x8dc   : > { %1676 = vmatmul.mubr.msk.bf16.vlgmr.msra.gmra.mrb[8].mxu0 %vm554_vm0, %v1298_v2 }
 0x9af   : > { %v1359_v0 = vpop.f32.mrb[8].mxu0 }
 0x9b0   : > { %v1360_v3 = vadd.f32 %v1544_v8, %v1359_v0  ;;  %v1677_v4 = vpop.f32.mrb[9].mxu0 }
 0x9b1   : > { %v1362_v5 = vpop.f32.mrb[10].mxu0 }
 0x9b2   : > { %v1678_v6 = vpop.f32.mrb[11].mxu0  ;;  %1366 = vst.msk [vmem:[%s528_s30] sm:$0xff] %vm1365_vm8, %v1360_v3 }
 0x9b3   : > { %1789 = shalt.err (!%p1786_p3)
}
 0x9b4   : > { %s1790_s20 = scalar_lea.hbm %s2239_s18, 128  ;;  %s1794_s19 = scalar_lea.hbm %s2296_s15, 256 }
 0x9b5   : > { %p1791_p4 = scmp.ne.s32.totalorder %s2239_s18, %s1790_s20  ;;  %p1795_p9 = scmp.lt.u32.totalorder %s2239_s18, %s2296_s15 }
 0x9b6   : > { %p1796_p10 = scmp.lt.u32.totalorder %s1794_s19, %s1790_s20  ;;  %p1798_p12 = scmp.lt.u32.totalorder %s1790_s20, %s2239_s18 }
 0x9b7   : > { %p1792_p7 = pnand %p1791_p4, %p1970_p5 }
 0x9b8   : > { %p1797_p11 = por %p1796_p10, %p1795_p9 }
 0x9b9   : > { %p1793_p8 = pneg %p1792_p7 }
 0x9ba   : > { %p1799_p13 = por %p1798_p12, %p1797_p11 }
 0x9bc   : > { %p1800_p0 = pnand %p1799_p13, %p1793_p8 }
 0x9be   : > { %1803 = shalt.err (!%p1800_p0)
}
 0x9bf   : > { %1679 = dma.vmem_to_hbm [thread:$0]  (%p1970_p5), %s2241_s29, 128, %s2239_s18, %s1368_s25  }
 0x9c0 PF: > { %p1685_p1 = scmp.ge.s32.totalorder %s1838_s24, 2  ;;  %s1401_s1 = sand.u32 1, %s1826_s21  }
 0x9c1   : > { %s1402_s2 = scalar_lea.sflag [#allocation3], %s1401_s1 }
 0x9c2   : > { %p1682_p2 = pnand %p1685_p1, %p1974_p6 }
 0x9c4   : > { %1821 = dma.done.wait (!%p1682_p2), %s1402_s2, 128  }
 0x9c5   : > { %1823 = vsyncadd (!%p1682_p2), %s1402_s2, 4294967168  ;;  %s2316_s24 = sld [smem:[#allocation6_spill]]  ;;  %s2317_s27 = sld [smem:[#allocation5_spill]] }
 0x9c6   : > { %s2318_s23 = sld [smem:[#allocation7_spill]]  ;;  %s2319_s21 = smov %s1830_s22 }
 0x9cb   : > { %p27_p3 = scmp.ge.s32.totalorder %s2316_s24, 4   ;;  %s2320_s22 = smov %s2317_s27 }
 0x9cd   :  { %29 = sbr.rel (!%p27_p3) target bundleno = 7 (0x7), region = 130 }
 0x9d4   :  { %1415 = vsyncpa [#allocation3], 1 }
 0x9d5   :  { %1417 = vsyncpa [#allocation3 + $0x1], 1 }

</bundles_post_ra>
